<compile_context>
chip_gen: v5e
topology: v5e:2x2
jax: 0.10.0
libtpu: 0.0.40
codegen_flags: <defaults>
</compile_context>

<pallas_src>
import functools

import jax
import jax.numpy as jnp
from jax.experimental import pallas as pl
from jax.experimental.pallas import tpu as pltpu

# Compiler-params class name differs across JAX versions.
_CompilerParams = getattr(pltpu, "CompilerParams", None) or getattr(
    pltpu, "TPUCompilerParams"
)

# ----------------------------------------------------------------------------
# Pallas kernels
# ----------------------------------------------------------------------------


def _conv_mm_kernel(wt_ref, p_ref, bias_ref, *rest, relu, has_residual):
    """Fused conv-as-matmul: out = [relu]( Wt @ patches + bias [+ residual] ).

    Transposed ("lane-dense") formulation: the output's lane dim is the spatial
    dim M = N*Ho*Wo; BN scale is pre-folded into Wt (bf16), epilogue in f32.
    """
    if has_residual:
        res_ref, o_ref = rest
    else:
        (o_ref,) = rest
    acc = jnp.dot(wt_ref[...], p_ref[...], preferred_element_type=jnp.float32)
    acc = acc + bias_ref[...]
    if has_residual:
        acc = acc + res_ref[...].astype(jnp.float32)
    if relu:
        acc = jnp.maximum(acc, 0.0)
    o_ref[...] = acc.astype(o_ref.dtype)


def _maxpool_kernel(p_ref, o_ref):
    # p: (9, C, M) -> elementwise max over the 9 shifted views (VPU, lane-dense M)
    o_ref[...] = jnp.max(p_ref[...], axis=0)


def _pool_fc_kernel(x_ref, w_ref, b_ref, o_ref):
    # x: (N, C, HW); fused global average pool + flatten + classifier.
    pooled = jnp.mean(x_ref[...].astype(jnp.float32), axis=-1)  # (N, C)
    o_ref[...] = (
        jnp.dot(pooled, w_ref[...], preferred_element_type=jnp.float32) + b_ref[...]
    )


# ----------------------------------------------------------------------------
# Pallas wrappers
# ----------------------------------------------------------------------------


def _pick_tile_m(m):
    for t in (512, 256, 128):
        if m % t == 0:
            return min(t, 256)  # cap at 256: MXU-wide lanes, modest VMEM per step
    return m


def conv_matmul(wt, patches, bias, residual, *, relu, out_dtype=jnp.bfloat16):
    """(Cout,K)bf16 @ (K,M)bf16 + bias [+res] [+relu] -> (Cout,M), tiled over M."""
    cout, k = wt.shape
    k2, m = patches.shape
    assert k == k2
    tile_m = _pick_tile_m(m)
    grid = (m // tile_m,)
    bias = bias.reshape(cout, 1).astype(jnp.float32)

    in_specs = [
        pl.BlockSpec((cout, k), lambda i: (0, 0)),
        pl.BlockSpec((k, tile_m), lambda i: (0, i)),
        pl.BlockSpec((cout, 1), lambda i: (0, 0)),
    ]
    args = [wt, patches, bias]
    if residual is not None:
        in_specs.append(pl.BlockSpec((cout, tile_m), lambda i: (0, i)))
        args.append(residual)

    kernel = functools.partial(
        _conv_mm_kernel, relu=relu, has_residual=residual is not None
    )
    return pl.pallas_call(
        kernel,
        out_shape=jax.ShapeDtypeStruct((cout, m), out_dtype),
        grid=grid,
        in_specs=in_specs,
        out_specs=pl.BlockSpec((cout, tile_m), lambda i: (0, i)),
        compiler_params=_CompilerParams(dimension_semantics=("parallel",)),
    )(*args)


def extract_patches_cm(x, kh, kw, stride, pad, pad_value=0.0):
    """im2col in channel-major layout: (C,N,H,W) -> (kh*kw*C, N*Ho*Wo).

    # TODO(synk): the patch matrix is still materialized in HBM by XLA; a fully
    # fused window-accumulation (grid over kh*kw) would avoid the 9x/49x blowup.
    """
    c, n, h, w = x.shape
    if pad > 0:
        x = jnp.pad(
            x, ((0, 0), (0, 0), (pad, pad), (pad, pad)), constant_values=pad_value
        )
    ho = (h + 2 * pad - kh) // stride + 1
    wo = (w + 2 * pad - kw) // stride + 1
    views = []
    for i in range(kh):
        for j in range(kw):
            views.append(x[:, :, i : i + stride * ho : stride, j : j + stride * wo : stride])
    p = jnp.stack(views, axis=0)  # (kh*kw, C, N, Ho, Wo)  -- matches Wt's K order
    return p.reshape(kh * kw * c, n * ho * wo), (n, ho, wo)


def conv_bn(x, wt, bias, kh, kw, stride, pad, relu=False, residual=None):
    """Conv2d (bias-free) + folded BatchNorm (+ fused residual / ReLU).

    x: (Cin, N, H, W).  Returns (Cout, N, Ho, Wo) bf16.
    """
    cout = wt.shape[0]
    patches, (n, ho, wo) = extract_patches_cm(x, kh, kw, stride, pad)
    patches = patches.astype(jnp.bfloat16)
    m = n * ho * wo
    res2d = None if residual is None else residual.reshape(cout, m)
    out = conv_matmul(wt, patches, bias, res2d, relu=relu)
    return out.reshape(cout, n, ho, wo)


def maxpool_3x3_s2(x):
    """3x3 / stride-2 / pad-1 max pool: elementwise max of 9 lane-dense views."""
    c, n, h, w = x.shape
    xp = jnp.pad(
        x, ((0, 0), (0, 0), (1, 1), (1, 1)), constant_values=float("-inf")
    )
    ho = (h + 2 - 3) // 2 + 1
    wo = (w + 2 - 3) // 2 + 1
    views = [
        xp[:, :, i : i + 2 * ho : 2, j : j + 2 * wo : 2]
        for i in range(3)
        for j in range(3)
    ]
    m = n * ho * wo
    p = jnp.stack(views, axis=0).reshape(9, c, m)
    out = pl.pallas_call(
        _maxpool_kernel,
        out_shape=jax.ShapeDtypeStruct((c, m), x.dtype),
        grid=(1,),
        in_specs=[pl.BlockSpec((9, c, m), lambda i: (0, 0, 0))],
        out_specs=pl.BlockSpec((c, m), lambda i: (0, 0)),
    )(p)
    return out.reshape(c, n, ho, wo)


def pool_fc(x, fc_w, fc_b):
    """Fused global average pool + flatten + fc.  x: (C,N,H,W) -> (N, classes)."""
    c, n, h, w = x.shape
    xr = jnp.transpose(x, (1, 0, 2, 3)).reshape(n, c, h * w)
    classes = fc_w.shape[1]
    return pl.pallas_call(
        _pool_fc_kernel,
        out_shape=jax.ShapeDtypeStruct((n, classes), jnp.float32),
        grid=(1,),
        in_specs=[
            pl.BlockSpec((n, c, h * w), lambda i: (0, 0, 0)),
            pl.BlockSpec((c, classes), lambda i: (0, 0)),
            pl.BlockSpec((1, classes), lambda i: (0, 0)),
        ],
        out_specs=pl.BlockSpec((n, classes), lambda i: (0, 0)),
    )(xr, fc_w.astype(jnp.float32), fc_b.reshape(1, classes).astype(jnp.float32))


# ----------------------------------------------------------------------------
# ResNet (BasicBlock, resnet18-style) — synthetic deterministic parameters.
# BN is folded into the conv weights at parameter-prep time (bf16 weights).
# ----------------------------------------------------------------------------

BASE_C = 8  # layer channel widths: 8, 16, 32, 64
NUM_CLASSES = 10
BN_EPS = 1e-5


def _bn_fold(key, c):
    k1, k2 = jax.random.split(key)
    gamma = 1.0 + 0.1 * jax.random.normal(k1, (c,), jnp.float32)
    beta = 0.1 * jax.random.normal(k2, (c,), jnp.float32)
    running_mean = jnp.zeros((c,), jnp.float32)
    running_var = jnp.ones((c,), jnp.float32)
    scale = gamma / jnp.sqrt(running_var + BN_EPS)
    bias = beta - running_mean * scale
    return scale, bias


def _conv_bn_params(kw_key, bn_key, kh, kw, cin, cout):
    """Conv weight, BN scale folded in, pre-transposed to (Cout, kh*kw*Cin) bf16."""
    w = 0.1 * jax.random.normal(kw_key, (kh, kw, cin, cout), jnp.float32)
    scale, bias = _bn_fold(bn_key, cout)
    wt = jnp.transpose(w, (3, 0, 1, 2)).reshape(cout, kh * kw * cin)
    wt = (wt * scale[:, None]).astype(jnp.bfloat16)
    return wt, bias


def init_params(key):
    keys = iter(jax.random.split(key, 128))
    p = {}
    # stem: conv1 7x7 s2 p3 + bn1 + relu, then maxpool 3x3 s2 p1
    p["conv1_wt"], p["conv1_b"] = _conv_bn_params(next(keys), next(keys), 7, 7, 3, BASE_C)

    widths = [BASE_C, 2 * BASE_C, 4 * BASE_C, 8 * BASE_C]
    layers = []
    in_c = BASE_C
    for li, out_c in enumerate(widths):
        blocks = []
        for bi in range(2):  # resnet18: 2 BasicBlocks per layer
            stride = 2 if (li > 0 and bi == 0) else 1
            blk = {"stride": stride}
            blk["w1t"], blk["b1"] = _conv_bn_params(next(keys), next(keys), 3, 3, in_c, out_c)
            blk["w2t"], blk["b2"] = _conv_bn_params(next(keys), next(keys), 3, 3, out_c, out_c)
            if stride != 1 or in_c != out_c:
                blk["wdt"], blk["bd"] = _conv_bn_params(next(keys), next(keys), 1, 1, in_c, out_c)
            blocks.append(blk)
            in_c = out_c
        layers.append(blocks)
    p["layers"] = layers

    p["fc_w"] = 0.1 * jax.random.normal(next(keys), (widths[-1], NUM_CLASSES), jnp.float32)
    p["fc_b"] = jnp.zeros((NUM_CLASSES,), jnp.float32)
    return p


def basic_block(x, blk):
    stride = blk["stride"]
    if "wdt" in blk:
        identity = conv_bn(x, blk["wdt"], blk["bd"], 1, 1, stride, 0, relu=False)
    else:
        identity = x
    out = conv_bn(x, blk["w1t"], blk["b1"], 3, 3, stride, 1, relu=True)
    # second conv: residual add + ReLU fused into the matmul epilogue
    out = conv_bn(out, blk["w2t"], blk["b2"], 3, 3, 1, 1, relu=True, residual=identity)
    return out


def resnet_gradcam_forward(x_nchw, params):
    """ResNetWithGradCAM.forward: features_before -> features(layer4)
    -> avgpool -> flatten -> fc.  Input x is NCHW (PyTorch convention)."""
    # TODO(synk): x.register_hook(activations_hook) is a backward-pass gradient
    #             hook with no forward semantics; omitted.
    x = jnp.transpose(x_nchw, (1, 0, 2, 3)).astype(jnp.float32)  # -> (C, N, H, W)

    # features_before = conv1+bn1+relu, maxpool, layer1, layer2, layer3
    x = conv_bn(x, params["conv1_wt"], params["conv1_b"], 7, 7, 2, 3, relu=True)
    x = maxpool_3x3_s2(x)
    for li in range(3):
        for blk in params["layers"][li]:
            x = basic_block(x, blk)

    # features = layer4 (Grad-CAM activations)
    for blk in params["layers"][3]:
        x = basic_block(x, blk)

    # fused pool + flatten + classifier
    return pool_fc(x, params["fc_w"], params["fc_b"])


# ----------------------------------------------------------------------------
# main
# ----------------------------------------------------------------------------

if __name__ == "__main__":
    key = jax.random.PRNGKey(0)
    k_params, k_x = jax.random.split(key)
    params = init_params(k_params)

    # small, ResNet-consistent input: batch=2, RGB, 32x32 (NCHW like PyTorch)
    x = jax.random.normal(k_x, (2, 3, 32, 32), jnp.float32)

    logits = jax.jit(lambda inp: resnet_gradcam_forward(inp, params))(x)
    logits = jax.block_until_ready(logits)

    assert logits.shape == (2, NUM_CLASSES)
    assert bool(jnp.all(jnp.isfinite(logits)))
    print("KERNEL_OK")
</pallas_src>

<mosaic_0001>
module attributes {stable_mosaic.version = 11 : i64} {
  func.func @_conv_mm_kernel(%arg0: i32, %arg1: memref<8x147xbf16, #tpu.memory_space<vmem>>, %arg2: memref<147x256xbf16, #tpu.memory_space<vmem>>, %arg3: memref<8x1xf32, #tpu.memory_space<vmem>>, %arg4: memref<8x256xbf16, #tpu.memory_space<vmem>>) attributes {dimension_semantics = [#tpu.dimension_semantics<parallel>], iteration_bounds = array<i64: 2>, scalar_prefetch = 0 : i64, scratch_operands = 0 : i64, tpu.core_type = #tpu.core_type<tc>, window_params = [{pipeline_mode = #tpu.pipeline_mode<synchronous>, transform_indices = @transform_0, window_bounds = array<i64: 8, 147>}, {transform_indices = @transform_1, window_bounds = array<i64: 147, 256>}, {pipeline_mode = #tpu.pipeline_mode<synchronous>, transform_indices = @transform_2, window_bounds = array<i64: 8, 1>}, {transform_indices = @transform_3, window_bounds = array<i64: 8, 256>}]} {
    %c0 = arith.constant 0 : index
    %c0_0 = arith.constant 0 : index
    %0 = vector.load %arg1[%c0, %c0_0] : memref<8x147xbf16, #tpu.memory_space<vmem>>, vector<8x147xbf16>
    %c0_1 = arith.constant 0 : index
    %c0_2 = arith.constant 0 : index
    %1 = vector.load %arg2[%c0_1, %c0_2] : memref<147x256xbf16, #tpu.memory_space<vmem>>, vector<147x256xbf16>
    %cst = arith.constant dense<0.000000e+00> : vector<8x256xf32>
    %2 = tpu.matmul %0, %1, %cst {dimension_numbers = #tpu.dot_dimension_numbers<[1], [0], [0], [1], [0, 0, 1, 1], [], []>} : vector<8x147xbf16>, vector<147x256xbf16>, vector<8x256xf32> -> vector<8x256xf32>
    %c0_3 = arith.constant 0 : index
    %c0_4 = arith.constant 0 : index
    %3 = vector.load %arg3[%c0_3, %c0_4] : memref<8x1xf32, #tpu.memory_space<vmem>>, vector<8x1xf32>
    %4 = vector.broadcast %3 : vector<8x1xf32> to vector<8x256xf32>
    %5 = arith.addf %2, %4 : vector<8x256xf32>
    %cst_5 = arith.constant 0.000000e+00 : f32
    %6 = vector.broadcast %cst_5 : f32 to vector<8x256xf32>
    %7 = arith.maximumf %5, %6 : vector<8x256xf32>
    %8 = arith.truncf %7 : vector<8x256xf32> to vector<8x256xbf16>
    %c0_6 = arith.constant 0 : index
    %c0_7 = arith.constant 0 : index
    %9 = vector.load %arg4[%c0_6, %c0_7] : memref<8x256xbf16, #tpu.memory_space<vmem>>, vector<8x256xbf16>
    tpu.vector_store %arg4[%c0_6, %c0_7], %8 {strides = array<i32>} : memref<8x256xbf16, #tpu.memory_space<vmem>>, vector<8x256xbf16>,
    return
  }
  func.func @transform_0(%arg0: i32) -> (i32, i32) {
    %c0_i32 = arith.constant 0 : i32
    %c0_i32_0 = arith.constant 0 : i32
    %c0_i32_1 = arith.constant 0 : i32
    return %c0_i32, %c0_i32_0 : i32, i32
  }
  func.func @transform_1(%arg0: i32) -> (i32, i32) {
    %c0_i32 = arith.constant 0 : i32
    %c0_i32_0 = arith.constant 0 : i32
    return %c0_i32, %arg0 : i32, i32
  }
  func.func @transform_2(%arg0: i32) -> (i32, i32) {
    %c0_i32 = arith.constant 0 : i32
    %c0_i32_0 = arith.constant 0 : i32
    %c0_i32_1 = arith.constant 0 : i32
    return %c0_i32, %c0_i32_0 : i32, i32
  }
  func.func @transform_3(%arg0: i32) -> (i32, i32) {
    %c0_i32 = arith.constant 0 : i32
    %c0_i32_0 = arith.constant 0 : i32
    return %c0_i32, %arg0 : i32, i32
  }
}

module attributes {stable_mosaic.version = 11 : i64} {
  func.func @_maxpool_kernel(%arg0: i32, %arg1: memref<9x8x128xbf16, #tpu.memory_space<vmem>>, %arg2: memref<8x128xbf16, #tpu.memory_space<vmem>>) attributes {dimension_semantics = [#tpu.dimension_semantics<arbitrary>], iteration_bounds = array<i64: 1>, scalar_prefetch = 0 : i64, scratch_operands = 0 : i64, tpu.core_type = #tpu.core_type<tc>, window_params = [{pipeline_mode = #tpu.pipeline_mode<synchronous>, transform_indices = @transform_0, window_bounds = array<i64: 9, 8, 128>}, {pipeline_mode = #tpu.pipeline_mode<synchronous>, transform_indices = @transform_1, window_bounds = array<i64: 8, 128>}]} {
    %c0 = arith.constant 0 : index
    %c0_0 = arith.constant 0 : index
    %c0_1 = arith.constant 0 : index
    %0 = vector.load %arg1[%c0, %c0_0, %c0_1] : memref<9x8x128xbf16, #tpu.memory_space<vmem>>, vector<9x8x128xbf16>
    %cst = arith.constant dense<0xFF80> : vector<8x128xbf16>
    %1 = vector.multi_reduction <maximumf>, %0, %cst [0] : vector<9x8x128xbf16> to vector<8x128xbf16>
    %c0_2 = arith.constant 0 : index
    %c0_3 = arith.constant 0 : index
    %2 = vector.load %arg2[%c0_2, %c0_3] : memref<8x128xbf16, #tpu.memory_space<vmem>>, vector<8x128xbf16>
    tpu.vector_store %arg2[%c0_2, %c0_3], %1 {strides = array<i32>} : memref<8x128xbf16, #tpu.memory_space<vmem>>, vector<8x128xbf16>,
    return
  }
  func.func @transform_0(%arg0: i32) -> (i32, i32, i32) {
    %c0_i32 = arith.constant 0 : i32
    %c0_i32_0 = arith.constant 0 : i32
    %c0_i32_1 = arith.constant 0 : i32
    %c0_i32_2 = arith.constant 0 : i32
    return %c0_i32, %c0_i32_0, %c0_i32_1 : i32, i32, i32
  }
  func.func @transform_1(%arg0: i32) -> (i32, i32) {
    %c0_i32 = arith.constant 0 : i32
    %c0_i32_0 = arith.constant 0 : i32
    %c0_i32_1 = arith.constant 0 : i32
    return %c0_i32, %c0_i32_0 : i32, i32
  }
}

module attributes {stable_mosaic.version = 11 : i64} {
  func.func @_conv_mm_kernel(%arg0: i32, %arg1: memref<8x72xbf16, #tpu.memory_space<vmem>>, %arg2: memref<72x128xbf16, #tpu.memory_space<vmem>>, %arg3: memref<8x1xf32, #tpu.memory_space<vmem>>, %arg4: memref<8x128xbf16, #tpu.memory_space<vmem>>) attributes {dimension_semantics = [#tpu.dimension_semantics<parallel>], iteration_bounds = array<i64: 1>, scalar_prefetch = 0 : i64, scratch_operands = 0 : i64, tpu.core_type = #tpu.core_type<tc>, window_params = [{pipeline_mode = #tpu.pipeline_mode<synchronous>, transform_indices = @transform_0, window_bounds = array<i64: 8, 72>}, {transform_indices = @transform_1, window_bounds = array<i64: 72, 128>}, {pipeline_mode = #tpu.pipeline_mode<synchronous>, transform_indices = @transform_2, window_bounds = array<i64: 8, 1>}, {transform_indices = @transform_3, window_bounds = array<i64: 8, 128>}]} {
    %c0 = arith.constant 0 : index
    %c0_0 = arith.constant 0 : index
    %0 = vector.load %arg1[%c0, %c0_0] : memref<8x72xbf16, #tpu.memory_space<vmem>>, vector<8x72xbf16>
    %c0_1 = arith.constant 0 : index
    %c0_2 = arith.constant 0 : index
    %1 = vector.load %arg2[%c0_1, %c0_2] : memref<72x128xbf16, #tpu.memory_space<vmem>>, vector<72x128xbf16>
    %cst = arith.constant dense<0.000000e+00> : vector<8x128xf32>
    %2 = tpu.matmul %0, %1, %cst {dimension_numbers = #tpu.dot_dimension_numbers<[1], [0], [0], [1], [0, 0, 1, 1], [], []>} : vector<8x72xbf16>, vector<72x128xbf16>, vector<8x128xf32> -> vector<8x128xf32>
    %c0_3 = arith.constant 0 : index
    %c0_4 = arith.constant 0 : index
    %3 = vector.load %arg3[%c0_3, %c0_4] : memref<8x1xf32, #tpu.memory_space<vmem>>, vector<8x1xf32>
    %4 = vector.broadcast %3 : vector<8x1xf32> to vector<8x128xf32>
    %5 = arith.addf %2, %4 : vector<8x128xf32>
    %cst_5 = arith.constant 0.000000e+00 : f32
    %6 = vector.broadcast %cst_5 : f32 to vector<8x128xf32>
    %7 = arith.maximumf %5, %6 : vector<8x128xf32>
    %8 = arith.truncf %7 : vector<8x128xf32> to vector<8x128xbf16>
    %c0_6 = arith.constant 0 : index
    %c0_7 = arith.constant 0 : index
    %9 = vector.load %arg4[%c0_6, %c0_7] : memref<8x128xbf16, #tpu.memory_space<vmem>>, vector<8x128xbf16>
    tpu.vector_store %arg4[%c0_6, %c0_7], %8 {strides = array<i32>} : memref<8x128xbf16, #tpu.memory_space<vmem>>, vector<8x128xbf16>,
    return
  }
  func.func @transform_0(%arg0: i32) -> (i32, i32) {
    %c0_i32 = arith.constant 0 : i32
    %c0_i32_0 = arith.constant 0 : i32
    %c0_i32_1 = arith.constant 0 : i32
    return %c0_i32, %c0_i32_0 : i32, i32
  }
  func.func @transform_1(%arg0: i32) -> (i32, i32) {
    %c0_i32 = arith.constant 0 : i32
    %c0_i32_0 = arith.constant 0 : i32
    return %c0_i32, %arg0 : i32, i32
  }
  func.func @transform_2(%arg0: i32) -> (i32, i32) {
    %c0_i32 = arith.constant 0 : i32
    %c0_i32_0 = arith.constant 0 : i32
    %c0_i32_1 = arith.constant 0 : i32
    return %c0_i32, %c0_i32_0 : i32, i32
  }
  func.func @transform_3(%arg0: i32) -> (i32, i32) {
    %c0_i32 = arith.constant 0 : i32
    %c0_i32_0 = arith.constant 0 : i32
    return %c0_i32, %arg0 : i32, i32
  }
}

module attributes {stable_mosaic.version = 11 : i64} {
  func.func @_conv_mm_kernel(%arg0: i32, %arg1: memref<8x72xbf16, #tpu.memory_space<vmem>>, %arg2: memref<72x128xbf16, #tpu.memory_space<vmem>>, %arg3: memref<8x1xf32, #tpu.memory_space<vmem>>, %arg4: memref<8x128xbf16, #tpu.memory_space<vmem>>, %arg5: memref<8x128xbf16, #tpu.memory_space<vmem>>) attributes {dimension_semantics = [#tpu.dimension_semantics<parallel>], iteration_bounds = array<i64: 1>, scalar_prefetch = 0 : i64, scratch_operands = 0 : i64, tpu.core_type = #tpu.core_type<tc>, window_params = [{pipeline_mode = #tpu.pipeline_mode<synchronous>, transform_indices = @transform_0, window_bounds = array<i64: 8, 72>}, {transform_indices = @transform_1, window_bounds = array<i64: 72, 128>}, {pipeline_mode = #tpu.pipeline_mode<synchronous>, transform_indices = @transform_2, window_bounds = array<i64: 8, 1>}, {transform_indices = @transform_3, window_bounds = array<i64: 8, 128>}, {transform_indices = @transform_4, window_bounds = array<i64: 8, 128>}]} {
    %c0 = arith.constant 0 : index
    %c0_0 = arith.constant 0 : index
    %0 = vector.load %arg1[%c0, %c0_0] : memref<8x72xbf16, #tpu.memory_space<vmem>>, vector<8x72xbf16>
    %c0_1 = arith.constant 0 : index
    %c0_2 = arith.constant 0 : index
    %1 = vector.load %arg2[%c0_1, %c0_2] : memref<72x128xbf16, #tpu.memory_space<vmem>>, vector<72x128xbf16>
    %cst = arith.constant dense<0.000000e+00> : vector<8x128xf32>
    %2 = tpu.matmul %0, %1, %cst {dimension_numbers = #tpu.dot_dimension_numbers<[1], [0], [0], [1], [0, 0, 1, 1], [], []>} : vector<8x72xbf16>, vector<72x128xbf16>, vector<8x128xf32> -> vector<8x128xf32>
    %c0_3 = arith.constant 0 : index
    %c0_4 = arith.constant 0 : index
    %3 = vector.load %arg3[%c0_3, %c0_4] : memref<8x1xf32, #tpu.memory_space<vmem>>, vector<8x1xf32>
    %4 = vector.broadcast %3 : vector<8x1xf32> to vector<8x128xf32>
    %5 = arith.addf %2, %4 : vector<8x128xf32>
    %c0_5 = arith.constant 0 : index
    %c0_6 = arith.constant 0 : index
    %6 = vector.load %arg4[%c0_5, %c0_6] : memref<8x128xbf16, #tpu.memory_space<vmem>>, vector<8x128xbf16>
    %7 = arith.extf %6 : vector<8x128xbf16> to vector<8x128xf32>
    %8 = arith.addf %5, %7 : vector<8x128xf32>
    %cst_7 = arith.constant 0.000000e+00 : f32
    %9 = vector.broadcast %cst_7 : f32 to vector<8x128xf32>
    %10 = arith.maximumf %8, %9 : vector<8x128xf32>
    %11 = arith.truncf %10 : vector<8x128xf32> to vector<8x128xbf16>
    %c0_8 = arith.constant 0 : index
    %c0_9 = arith.constant 0 : index
    %12 = vector.load %arg5[%c0_8, %c0_9] : memref<8x128xbf16, #tpu.memory_space<vmem>>, vector<8x128xbf16>
    tpu.vector_store %arg5[%c0_8, %c0_9], %11 {strides = array<i32>} : memref<8x128xbf16, #tpu.memory_space<vmem>>, vector<8x128xbf16>,
    return
  }
  func.func @transform_0(%arg0: i32) -> (i32, i32) {
    %c0_i32 = arith.constant 0 : i32
    %c0_i32_0 = arith.constant 0 : i32
    %c0_i32_1 = arith.constant 0 : i32
    return %c0_i32, %c0_i32_0 : i32, i32
  }
  func.func @transform_1(%arg0: i32) -> (i32, i32) {
    %c0_i32 = arith.constant 0 : i32
    %c0_i32_0 = arith.constant 0 : i32
    return %c0_i32, %arg0 : i32, i32
  }
  func.func @transform_2(%arg0: i32) -> (i32, i32) {
    %c0_i32 = arith.constant 0 : i32
    %c0_i32_0 = arith.constant 0 : i32
    %c0_i32_1 = arith.constant 0 : i32
    return %c0_i32, %c0_i32_0 : i32, i32
  }
  func.func @transform_3(%arg0: i32) -> (i32, i32) {
    %c0_i32 = arith.constant 0 : i32
    %c0_i32_0 = arith.constant 0 : i32
    return %c0_i32, %arg0 : i32, i32
  }
  func.func @transform_4(%arg0: i32) -> (i32, i32) {
    %c0_i32 = arith.constant 0 : i32
    %c0_i32_0 = arith.constant 0 : i32
    return %c0_i32, %arg0 : i32, i32
  }
}

module attributes {stable_mosaic.version = 11 : i64} {
  func.func @_conv_mm_kernel(%arg0: i32, %arg1: memref<16x72xbf16, #tpu.memory_space<vmem>>, %arg2: memref<72x32xbf16, #tpu.memory_space<vmem>>, %arg3: memref<16x1xf32, #tpu.memory_space<vmem>>, %arg4: memref<16x32xbf16, #tpu.memory_space<vmem>>) attributes {dimension_semantics = [#tpu.dimension_semantics<parallel>], iteration_bounds = array<i64: 1>, scalar_prefetch = 0 : i64, scratch_operands = 0 : i64, tpu.core_type = #tpu.core_type<tc>, window_params = [{pipeline_mode = #tpu.pipeline_mode<synchronous>, transform_indices = @transform_0, window_bounds = array<i64: 16, 72>}, {transform_indices = @transform_1, window_bounds = array<i64: 72, 32>}, {pipeline_mode = #tpu.pipeline_mode<synchronous>, transform_indices = @transform_2, window_bounds = array<i64: 16, 1>}, {transform_indices = @transform_3, window_bounds = array<i64: 16, 32>}]} {
    %c0 = arith.constant 0 : index
    %c0_0 = arith.constant 0 : index
    %0 = vector.load %arg1[%c0, %c0_0] : memref<16x72xbf16, #tpu.memory_space<vmem>>, vector<16x72xbf16>
    %c0_1 = arith.constant 0 : index
    %c0_2 = arith.constant 0 : index
    %1 = vector.load %arg2[%c0_1, %c0_2] : memref<72x32xbf16, #tpu.memory_space<vmem>>, vector<72x32xbf16>
    %cst = arith.constant dense<0.000000e+00> : vector<16x32xf32>
    %2 = tpu.matmul %0, %1, %cst {dimension_numbers = #tpu.dot_dimension_numbers<[1], [0], [0], [1], [0, 0, 1, 1], [], []>} : vector<16x72xbf16>, vector<72x32xbf16>, vector<16x32xf32> -> vector<16x32xf32>
    %c0_3 = arith.constant 0 : index
    %c0_4 = arith.constant 0 : index
    %3 = vector.load %arg3[%c0_3, %c0_4] : memref<16x1xf32, #tpu.memory_space<vmem>>, vector<16x1xf32>
    %4 = vector.broadcast %3 : vector<16x1xf32> to vector<16x32xf32>
    %5 = arith.addf %2, %4 : vector<16x32xf32>
    %cst_5 = arith.constant 0.000000e+00 : f32
    %6 = vector.broadcast %cst_5 : f32 to vector<16x32xf32>
    %7 = arith.maximumf %5, %6 : vector<16x32xf32>
    %8 = arith.truncf %7 : vector<16x32xf32> to vector<16x32xbf16>
    %c0_6 = arith.constant 0 : index
    %c0_7 = arith.constant 0 : index
    %9 = vector.load %arg4[%c0_6, %c0_7] : memref<16x32xbf16, #tpu.memory_space<vmem>>, vector<16x32xbf16>
    tpu.vector_store %arg4[%c0_6, %c0_7], %8 {strides = array<i32>} : memref<16x32xbf16, #tpu.memory_space<vmem>>, vector<16x32xbf16>,
    return
  }
  func.func @transform_0(%arg0: i32) -> (i32, i32) {
    %c0_i32 = arith.constant 0 : i32
    %c0_i32_0 = arith.constant 0 : i32
    %c0_i32_1 = arith.constant 0 : i32
    return %c0_i32, %c0_i32_0 : i32, i32
  }
  func.func @transform_1(%arg0: i32) -> (i32, i32) {
    %c0_i32 = arith.constant 0 : i32
    %c0_i32_0 = arith.constant 0 : i32
    return %c0_i32, %arg0 : i32, i32
  }
  func.func @transform_2(%arg0: i32) -> (i32, i32) {
    %c0_i32 = arith.constant 0 : i32
    %c0_i32_0 = arith.constant 0 : i32
    %c0_i32_1 = arith.constant 0 : i32
    return %c0_i32, %c0_i32_0 : i32, i32
  }
  func.func @transform_3(%arg0: i32) -> (i32, i32) {
    %c0_i32 = arith.constant 0 : i32
    %c0_i32_0 = arith.constant 0 : i32
    return %c0_i32, %arg0 : i32, i32
  }
}

module attributes {stable_mosaic.version = 11 : i64} {
  func.func @_conv_mm_kernel(%arg0: i32, %arg1: memref<16x144xbf16, #tpu.memory_space<vmem>>, %arg2: memref<144x32xbf16, #tpu.memory_space<vmem>>, %arg3: memref<16x1xf32, #tpu.memory_space<vmem>>, %arg4: memref<16x32xbf16, #tpu.memory_space<vmem>>, %arg5: memref<16x32xbf16, #tpu.memory_space<vmem>>) attributes {dimension_semantics = [#tpu.dimension_semantics<parallel>], iteration_bounds = array<i64: 1>, scalar_prefetch = 0 : i64, scratch_operands = 0 : i64, tpu.core_type = #tpu.core_type<tc>, window_params = [{pipeline_mode = #tpu.pipeline_mode<synchronous>, transform_indices = @transform_0, window_bounds = array<i64: 16, 144>}, {transform_indices = @transform_1, window_bounds = array<i64: 144, 32>}, {pipeline_mode = #tpu.pipeline_mode<synchronous>, transform_indices = @transform_2, window_bounds = array<i64: 16, 1>}, {transform_indices = @transform_3, window_bounds = array<i64: 16, 32>}, {transform_indices = @transform_4, window_bounds = array<i64: 16, 32>}]} {
    %c0 = arith.constant 0 : index
    %c0_0 = arith.constant 0 : index
    %0 = vector.load %arg1[%c0, %c0_0] : memref<16x144xbf16, #tpu.memory_space<vmem>>, vector<16x144xbf16>
    %c0_1 = arith.constant 0 : index
    %c0_2 = arith.constant 0 : index
    %1 = vector.load %arg2[%c0_1, %c0_2] : memref<144x32xbf16, #tpu.memory_space<vmem>>, vector<144x32xbf16>
    %cst = arith.constant dense<0.000000e+00> : vector<16x32xf32>
    %2 = tpu.matmul %0, %1, %cst {dimension_numbers = #tpu.dot_dimension_numbers<[1], [0], [0], [1], [0, 0, 1, 1], [], []>} : vector<16x144xbf16>, vector<144x32xbf16>, vector<16x32xf32> -> vector<16x32xf32>
    %c0_3 = arith.constant 0 : index
    %c0_4 = arith.constant 0 : index
    %3 = vector.load %arg3[%c0_3, %c0_4] : memref<16x1xf32, #tpu.memory_space<vmem>>, vector<16x1xf32>
    %4 = vector.broadcast %3 : vector<16x1xf32> to vector<16x32xf32>
    %5 = arith.addf %2, %4 : vector<16x32xf32>
    %c0_5 = arith.constant 0 : index
    %c0_6 = arith.constant 0 : index
    %6 = vector.load %arg4[%c0_5, %c0_6] : memref<16x32xbf16, #tpu.memory_space<vmem>>, vector<16x32xbf16>
    %7 = arith.extf %6 : vector<16x32xbf16> to vector<16x32xf32>
    %8 = arith.addf %5, %7 : vector<16x32xf32>
    %cst_7 = arith.constant 0.000000e+00 : f32
    %9 = vector.broadcast %cst_7 : f32 to vector<16x32xf32>
    %10 = arith.maximumf %8, %9 : vector<16x32xf32>
    %11 = arith.truncf %10 : vector<16x32xf32> to vector<16x32xbf16>
    %c0_8 = arith.constant 0 : index
    %c0_9 = arith.constant 0 : index
    %12 = vector.load %arg5[%c0_8, %c0_9] : memref<16x32xbf16, #tpu.memory_space<vmem>>, vector<16x32xbf16>
    tpu.vector_store %arg5[%c0_8, %c0_9], %11 {strides = array<i32>} : memref<16x32xbf16, #tpu.memory_space<vmem>>, vector<16x32xbf16>,
    return
  }
  func.func @transform_0(%arg0: i32) -> (i32, i32) {
    %c0_i32 = arith.constant 0 : i32
    %c0_i32_0 = arith.constant 0 : i32
    %c0_i32_1 = arith.constant 0 : i32
    return %c0_i32, %c0_i32_0 : i32, i32
  }
  func.func @transform_1(%arg0: i32) -> (i32, i32) {
    %c0_i32 = arith.constant 0 : i32
    %c0_i32_0 = arith.constant 0 : i32
    return %c0_i32, %arg0 : i32, i32
  }
  func.func @transform_2(%arg0: i32) -> (i32, i32) {
    %c0_i32 = arith.constant 0 : i32
    %c0_i32_0 = arith.constant 0 : i32
    %c0_i32_1 = arith.constant 0 : i32
    return %c0_i32, %c0_i32_0 : i32, i32
  }
  func.func @transform_3(%arg0: i32) -> (i32, i32) {
    %c0_i32 = arith.constant 0 : i32
    %c0_i32_0 = arith.constant 0 : i32
    return %c0_i32, %arg0 : i32, i32
  }
  func.func @transform_4(%arg0: i32) -> (i32, i32) {
    %c0_i32 = arith.constant 0 : i32
    %c0_i32_0 = arith.constant 0 : i32
    return %c0_i32, %arg0 : i32, i32
  }
}

module attributes {stable_mosaic.version = 11 : i64} {
  func.func @_conv_mm_kernel(%arg0: i32, %arg1: memref<16x8xbf16, #tpu.memory_space<vmem>>, %arg2: memref<8x32xbf16, #tpu.memory_space<vmem>>, %arg3: memref<16x1xf32, #tpu.memory_space<vmem>>, %arg4: memref<16x32xbf16, #tpu.memory_space<vmem>>) attributes {dimension_semantics = [#tpu.dimension_semantics<parallel>], iteration_bounds = array<i64: 1>, scalar_prefetch = 0 : i64, scratch_operands = 0 : i64, tpu.core_type = #tpu.core_type<tc>, window_params = [{pipeline_mode = #tpu.pipeline_mode<synchronous>, transform_indices = @transform_0, window_bounds = array<i64: 16, 8>}, {transform_indices = @transform_1, window_bounds = array<i64: 8, 32>}, {pipeline_mode = #tpu.pipeline_mode<synchronous>, transform_indices = @transform_2, window_bounds = array<i64: 16, 1>}, {transform_indices = @transform_3, window_bounds = array<i64: 16, 32>}]} {
    %c0 = arith.constant 0 : index
    %c0_0 = arith.constant 0 : index
    %0 = vector.load %arg1[%c0, %c0_0] : memref<16x8xbf16, #tpu.memory_space<vmem>>, vector<16x8xbf16>
    %c0_1 = arith.constant 0 : index
    %c0_2 = arith.constant 0 : index
    %1 = vector.load %arg2[%c0_1, %c0_2] : memref<8x32xbf16, #tpu.memory_space<vmem>>, vector<8x32xbf16>
    %cst = arith.constant dense<0.000000e+00> : vector<16x32xf32>
    %2 = tpu.matmul %0, %1, %cst {dimension_numbers = #tpu.dot_dimension_numbers<[1], [0], [0], [1], [0, 0, 1, 1], [], []>} : vector<16x8xbf16>, vector<8x32xbf16>, vector<16x32xf32> -> vector<16x32xf32>
    %c0_3 = arith.constant 0 : index
    %c0_4 = arith.constant 0 : index
    %3 = vector.load %arg3[%c0_3, %c0_4] : memref<16x1xf32, #tpu.memory_space<vmem>>, vector<16x1xf32>
    %4 = vector.broadcast %3 : vector<16x1xf32> to vector<16x32xf32>
    %5 = arith.addf %2, %4 : vector<16x32xf32>
    %6 = arith.truncf %5 : vector<16x32xf32> to vector<16x32xbf16>
    %c0_5 = arith.constant 0 : index
    %c0_6 = arith.constant 0 : index
    %7 = vector.load %arg4[%c0_5, %c0_6] : memref<16x32xbf16, #tpu.memory_space<vmem>>, vector<16x32xbf16>
    tpu.vector_store %arg4[%c0_5, %c0_6], %6 {strides = array<i32>} : memref<16x32xbf16, #tpu.memory_space<vmem>>, vector<16x32xbf16>,
    return
  }
  func.func @transform_0(%arg0: i32) -> (i32, i32) {
    %c0_i32 = arith.constant 0 : i32
    %c0_i32_0 = arith.constant 0 : i32
    %c0_i32_1 = arith.constant 0 : i32
    return %c0_i32, %c0_i32_0 : i32, i32
  }
  func.func @transform_1(%arg0: i32) -> (i32, i32) {
    %c0_i32 = arith.constant 0 : i32
    %c0_i32_0 = arith.constant 0 : i32
    return %c0_i32, %arg0 : i32, i32
  }
  func.func @transform_2(%arg0: i32) -> (i32, i32) {
    %c0_i32 = arith.constant 0 : i32
    %c0_i32_0 = arith.constant 0 : i32
    %c0_i32_1 = arith.constant 0 : i32
    return %c0_i32, %c0_i32_0 : i32, i32
  }
  func.func @transform_3(%arg0: i32) -> (i32, i32) {
    %c0_i32 = arith.constant 0 : i32
    %c0_i32_0 = arith.constant 0 : i32
    return %c0_i32, %arg0 : i32, i32
  }
}

module attributes {stable_mosaic.version = 11 : i64} {
  func.func @_conv_mm_kernel(%arg0: i32, %arg1: memref<16x144xbf16, #tpu.memory_space<vmem>>, %arg2: memref<144x32xbf16, #tpu.memory_space<vmem>>, %arg3: memref<16x1xf32, #tpu.memory_space<vmem>>, %arg4: memref<16x32xbf16, #tpu.memory_space<vmem>>) attributes {dimension_semantics = [#tpu.dimension_semantics<parallel>], iteration_bounds = array<i64: 1>, scalar_prefetch = 0 : i64, scratch_operands = 0 : i64, tpu.core_type = #tpu.core_type<tc>, window_params = [{pipeline_mode = #tpu.pipeline_mode<synchronous>, transform_indices = @transform_0, window_bounds = array<i64: 16, 144>}, {transform_indices = @transform_1, window_bounds = array<i64: 144, 32>}, {pipeline_mode = #tpu.pipeline_mode<synchronous>, transform_indices = @transform_2, window_bounds = array<i64: 16, 1>}, {transform_indices = @transform_3, window_bounds = array<i64: 16, 32>}]} {
    %c0 = arith.constant 0 : index
    %c0_0 = arith.constant 0 : index
    %0 = vector.load %arg1[%c0, %c0_0] : memref<16x144xbf16, #tpu.memory_space<vmem>>, vector<16x144xbf16>
    %c0_1 = arith.constant 0 : index
    %c0_2 = arith.constant 0 : index
    %1 = vector.load %arg2[%c0_1, %c0_2] : memref<144x32xbf16, #tpu.memory_space<vmem>>, vector<144x32xbf16>
    %cst = arith.constant dense<0.000000e+00> : vector<16x32xf32>
    %2 = tpu.matmul %0, %1, %cst {dimension_numbers = #tpu.dot_dimension_numbers<[1], [0], [0], [1], [0, 0, 1, 1], [], []>} : vector<16x144xbf16>, vector<144x32xbf16>, vector<16x32xf32> -> vector<16x32xf32>
    %c0_3 = arith.constant 0 : index
    %c0_4 = arith.constant 0 : index
    %3 = vector.load %arg3[%c0_3, %c0_4] : memref<16x1xf32, #tpu.memory_space<vmem>>, vector<16x1xf32>
    %4 = vector.broadcast %3 : vector<16x1xf32> to vector<16x32xf32>
    %5 = arith.addf %2, %4 : vector<16x32xf32>
    %cst_5 = arith.constant 0.000000e+00 : f32
    %6 = vector.broadcast %cst_5 : f32 to vector<16x32xf32>
    %7 = arith.maximumf %5, %6 : vector<16x32xf32>
    %8 = arith.truncf %7 : vector<16x32xf32> to vector<16x32xbf16>
    %c0_6 = arith.constant 0 : index
    %c0_7 = arith.constant 0 : index
    %9 = vector.load %arg4[%c0_6, %c0_7] : memref<16x32xbf16, #tpu.memory_space<vmem>>, vector<16x32xbf16>
    tpu.vector_store %arg4[%c0_6, %c0_7], %8 {strides = array<i32>} : memref<16x32xbf16, #tpu.memory_space<vmem>>, vector<16x32xbf16>,
    return
  }
  func.func @transform_0(%arg0: i32) -> (i32, i32) {
    %c0_i32 = arith.constant 0 : i32
    %c0_i32_0 = arith.constant 0 : i32
    %c0_i32_1 = arith.constant 0 : i32
    return %c0_i32, %c0_i32_0 : i32, i32
  }
  func.func @transform_1(%arg0: i32) -> (i32, i32) {
    %c0_i32 = arith.constant 0 : i32
    %c0_i32_0 = arith.constant 0 : i32
    return %c0_i32, %arg0 : i32, i32
  }
  func.func @transform_2(%arg0: i32) -> (i32, i32) {
    %c0_i32 = arith.constant 0 : i32
    %c0_i32_0 = arith.constant 0 : i32
    %c0_i32_1 = arith.constant 0 : i32
    return %c0_i32, %c0_i32_0 : i32, i32
  }
  func.func @transform_3(%arg0: i32) -> (i32, i32) {
    %c0_i32 = arith.constant 0 : i32
    %c0_i32_0 = arith.constant 0 : i32
    return %c0_i32, %arg0 : i32, i32
  }
}

module attributes {stable_mosaic.version = 11 : i64} {
  func.func @_conv_mm_kernel(%arg0: i32, %arg1: memref<32x144xbf16, #tpu.memory_space<vmem>>, %arg2: memref<144x8xbf16, #tpu.memory_space<vmem>>, %arg3: memref<32x1xf32, #tpu.memory_space<vmem>>, %arg4: memref<32x8xbf16, #tpu.memory_space<vmem>>) attributes {dimension_semantics = [#tpu.dimension_semantics<parallel>], iteration_bounds = array<i64: 1>, scalar_prefetch = 0 : i64, scratch_operands = 0 : i64, tpu.core_type = #tpu.core_type<tc>, window_params = [{pipeline_mode = #tpu.pipeline_mode<synchronous>, transform_indices = @transform_0, window_bounds = array<i64: 32, 144>}, {transform_indices = @transform_1, window_bounds = array<i64: 144, 8>}, {pipeline_mode = #tpu.pipeline_mode<synchronous>, transform_indices = @transform_2, window_bounds = array<i64: 32, 1>}, {transform_indices = @transform_3, window_bounds = array<i64: 32, 8>}]} {
    %c0 = arith.constant 0 : index
    %c0_0 = arith.constant 0 : index
    %0 = vector.load %arg1[%c0, %c0_0] : memref<32x144xbf16, #tpu.memory_space<vmem>>, vector<32x144xbf16>
    %c0_1 = arith.constant 0 : index
    %c0_2 = arith.constant 0 : index
    %1 = vector.load %arg2[%c0_1, %c0_2] : memref<144x8xbf16, #tpu.memory_space<vmem>>, vector<144x8xbf16>
    %cst = arith.constant dense<0.000000e+00> : vector<32x8xf32>
    %2 = tpu.matmul %0, %1, %cst {dimension_numbers = #tpu.dot_dimension_numbers<[1], [0], [0], [1], [0, 0, 1, 1], [], []>} : vector<32x144xbf16>, vector<144x8xbf16>, vector<32x8xf32> -> vector<32x8xf32>
    %c0_3 = arith.constant 0 : index
    %c0_4 = arith.constant 0 : index
    %3 = vector.load %arg3[%c0_3, %c0_4] : memref<32x1xf32, #tpu.memory_space<vmem>>, vector<32x1xf32>
    %4 = vector.broadcast %3 : vector<32x1xf32> to vector<32x8xf32>
    %5 = arith.addf %2, %4 : vector<32x8xf32>
    %cst_5 = arith.constant 0.000000e+00 : f32
    %6 = vector.broadcast %cst_5 : f32 to vector<32x8xf32>
    %7 = arith.maximumf %5, %6 : vector<32x8xf32>
    %8 = arith.truncf %7 : vector<32x8xf32> to vector<32x8xbf16>
    %c0_6 = arith.constant 0 : index
    %c0_7 = arith.constant 0 : index
    %9 = vector.load %arg4[%c0_6, %c0_7] : memref<32x8xbf16, #tpu.memory_space<vmem>>, vector<32x8xbf16>
    tpu.vector_store %arg4[%c0_6, %c0_7], %8 {strides = array<i32>} : memref<32x8xbf16, #tpu.memory_space<vmem>>, vector<32x8xbf16>,
    return
  }
  func.func @transform_0(%arg0: i32) -> (i32, i32) {
    %c0_i32 = arith.constant 0 : i32
    %c0_i32_0 = arith.constant 0 : i32
    %c0_i32_1 = arith.constant 0 : i32
    return %c0_i32, %c0_i32_0 : i32, i32
  }
  func.func @transform_1(%arg0: i32) -> (i32, i32) {
    %c0_i32 = arith.constant 0 : i32
    %c0_i32_0 = arith.constant 0 : i32
    return %c0_i32, %arg0 : i32, i32
  }
  func.func @transform_2(%arg0: i32) -> (i32, i32) {
    %c0_i32 = arith.constant 0 : i32
    %c0_i32_0 = arith.constant 0 : i32
    %c0_i32_1 = arith.constant 0 : i32
    return %c0_i32, %c0_i32_0 : i32, i32
  }
  func.func @transform_3(%arg0: i32) -> (i32, i32) {
    %c0_i32 = arith.constant 0 : i32
    %c0_i32_0 = arith.constant 0 : i32
    return %c0_i32, %arg0 : i32, i32
  }
}

module attributes {stable_mosaic.version = 11 : i64} {
  func.func @_conv_mm_kernel(%arg0: i32, %arg1: memref<32x16xbf16, #tpu.memory_space<vmem>>, %arg2: memref<16x8xbf16, #tpu.memory_space<vmem>>, %arg3: memref<32x1xf32, #tpu.memory_space<vmem>>, %arg4: memref<32x8xbf16, #tpu.memory_space<vmem>>) attributes {dimension_semantics = [#tpu.dimension_semantics<parallel>], iteration_bounds = array<i64: 1>, scalar_prefetch = 0 : i64, scratch_operands = 0 : i64, tpu.core_type = #tpu.core_type<tc>, window_params = [{pipeline_mode = #tpu.pipeline_mode<synchronous>, transform_indices = @transform_0, window_bounds = array<i64: 32, 16>}, {transform_indices = @transform_1, window_bounds = array<i64: 16, 8>}, {pipeline_mode = #tpu.pipeline_mode<synchronous>, transform_indices = @transform_2, window_bounds = array<i64: 32, 1>}, {transform_indices = @transform_3, window_bounds = array<i64: 32, 8>}]} {
    %c0 = arith.constant 0 : index
    %c0_0 = arith.constant 0 : index
    %0 = vector.load %arg1[%c0, %c0_0] : memref<32x16xbf16, #tpu.memory_space<vmem>>, vector<32x16xbf16>
    %c0_1 = arith.constant 0 : index
    %c0_2 = arith.constant 0 : index
    %1 = vector.load %arg2[%c0_1, %c0_2] : memref<16x8xbf16, #tpu.memory_space<vmem>>, vector<16x8xbf16>
    %cst = arith.constant dense<0.000000e+00> : vector<32x8xf32>
    %2 = tpu.matmul %0, %1, %cst {dimension_numbers = #tpu.dot_dimension_numbers<[1], [0], [0], [1], [0, 0, 1, 1], [], []>} : vector<32x16xbf16>, vector<16x8xbf16>, vector<32x8xf32> -> vector<32x8xf32>
    %c0_3 = arith.constant 0 : index
    %c0_4 = arith.constant 0 : index
    %3 = vector.load %arg3[%c0_3, %c0_4] : memref<32x1xf32, #tpu.memory_space<vmem>>, vector<32x1xf32>
    %4 = vector.broadcast %3 : vector<32x1xf32> to vector<32x8xf32>
    %5 = arith.addf %2, %4 : vector<32x8xf32>
    %6 = arith.truncf %5 : vector<32x8xf32> to vector<32x8xbf16>
    %c0_5 = arith.constant 0 : index
    %c0_6 = arith.constant 0 : index
    %7 = vector.load %arg4[%c0_5, %c0_6] : memref<32x8xbf16, #tpu.memory_space<vmem>>, vector<32x8xbf16>
    tpu.vector_store %arg4[%c0_5, %c0_6], %6 {strides = array<i32>} : memref<32x8xbf16, #tpu.memory_space<vmem>>, vector<32x8xbf16>,
    return
  }
  func.func @transform_0(%arg0: i32) -> (i32, i32) {
    %c0_i32 = arith.constant 0 : i32
    %c0_i32_0 = arith.constant 0 : i32
    %c0_i32_1 = arith.constant 0 : i32
    return %c0_i32, %c0_i32_0 : i32, i32
  }
  func.func @transform_1(%arg0: i32) -> (i32, i32) {
    %c0_i32 = arith.constant 0 : i32
    %c0_i32_0 = arith.constant 0 : i32
    return %c0_i32, %arg0 : i32, i32
  }
  func.func @transform_2(%arg0: i32) -> (i32, i32) {
    %c0_i32 = arith.constant 0 : i32
    %c0_i32_0 = arith.constant 0 : i32
    %c0_i32_1 = arith.constant 0 : i32
    return %c0_i32, %c0_i32_0 : i32, i32
  }
  func.func @transform_3(%arg0: i32) -> (i32, i32) {
    %c0_i32 = arith.constant 0 : i32
    %c0_i32_0 = arith.constant 0 : i32
    return %c0_i32, %arg0 : i32, i32
  }
}

module attributes {stable_mosaic.version = 11 : i64} {
  func.func @_conv_mm_kernel(%arg0: i32, %arg1: memref<32x288xbf16, #tpu.memory_space<vmem>>, %arg2: memref<288x8xbf16, #tpu.memory_space<vmem>>, %arg3: memref<32x1xf32, #tpu.memory_space<vmem>>, %arg4: memref<32x8xbf16, #tpu.memory_space<vmem>>, %arg5: memref<32x8xbf16, #tpu.memory_space<vmem>>) attributes {dimension_semantics = [#tpu.dimension_semantics<parallel>], iteration_bounds = array<i64: 1>, scalar_prefetch = 0 : i64, scratch_operands = 0 : i64, tpu.core_type = #tpu.core_type<tc>, window_params = [{pipeline_mode = #tpu.pipeline_mode<synchronous>, transform_indices = @transform_0, window_bounds = array<i64: 32, 288>}, {transform_indices = @transform_1, window_bounds = array<i64: 288, 8>}, {pipeline_mode = #tpu.pipeline_mode<synchronous>, transform_indices = @transform_2, window_bounds = array<i64: 32, 1>}, {transform_indices = @transform_3, window_bounds = array<i64: 32, 8>}, {transform_indices = @transform_4, window_bounds = array<i64: 32, 8>}]} {
    %c0 = arith.constant 0 : index
    %c0_0 = arith.constant 0 : index
    %0 = vector.load %arg1[%c0, %c0_0] : memref<32x288xbf16, #tpu.memory_space<vmem>>, vector<32x288xbf16>
    %c0_1 = arith.constant 0 : index
    %c0_2 = arith.constant 0 : index
    %1 = vector.load %arg2[%c0_1, %c0_2] : memref<288x8xbf16, #tpu.memory_space<vmem>>, vector<288x8xbf16>
    %cst = arith.constant dense<0.000000e+00> : vector<32x8xf32>
    %2 = tpu.matmul %0, %1, %cst {dimension_numbers = #tpu.dot_dimension_numbers<[1], [0], [0], [1], [0, 0, 1, 1], [], []>} : vector<32x288xbf16>, vector<288x8xbf16>, vector<32x8xf32> -> vector<32x8xf32>
    %c0_3 = arith.constant 0 : index
    %c0_4 = arith.constant 0 : index
    %3 = vector.load %arg3[%c0_3, %c0_4] : memref<32x1xf32, #tpu.memory_space<vmem>>, vector<32x1xf32>
    %4 = vector.broadcast %3 : vector<32x1xf32> to vector<32x8xf32>
    %5 = arith.addf %2, %4 : vector<32x8xf32>
    %c0_5 = arith.constant 0 : index
    %c0_6 = arith.constant 0 : index
    %6 = vector.load %arg4[%c0_5, %c0_6] : memref<32x8xbf16, #tpu.memory_space<vmem>>, vector<32x8xbf16>
    %7 = arith.extf %6 : vector<32x8xbf16> to vector<32x8xf32>
    %8 = arith.addf %5, %7 : vector<32x8xf32>
    %cst_7 = arith.constant 0.000000e+00 : f32
    %9 = vector.broadcast %cst_7 : f32 to vector<32x8xf32>
    %10 = arith.maximumf %8, %9 : vector<32x8xf32>
    %11 = arith.truncf %10 : vector<32x8xf32> to vector<32x8xbf16>
    %c0_8 = arith.constant 0 : index
    %c0_9 = arith.constant 0 : index
    %12 = vector.load %arg5[%c0_8, %c0_9] : memref<32x8xbf16, #tpu.memory_space<vmem>>, vector<32x8xbf16>
    tpu.vector_store %arg5[%c0_8, %c0_9], %11 {strides = array<i32>} : memref<32x8xbf16, #tpu.memory_space<vmem>>, vector<32x8xbf16>,
    return
  }
  func.func @transform_0(%arg0: i32) -> (i32, i32) {
    %c0_i32 = arith.constant 0 : i32
    %c0_i32_0 = arith.constant 0 : i32
    %c0_i32_1 = arith.constant 0 : i32
    return %c0_i32, %c0_i32_0 : i32, i32
  }
  func.func @transform_1(%arg0: i32) -> (i32, i32) {
    %c0_i32 = arith.constant 0 : i32
    %c0_i32_0 = arith.constant 0 : i32
    return %c0_i32, %arg0 : i32, i32
  }
  func.func @transform_2(%arg0: i32) -> (i32, i32) {
    %c0_i32 = arith.constant 0 : i32
    %c0_i32_0 = arith.constant 0 : i32
    %c0_i32_1 = arith.constant 0 : i32
    return %c0_i32, %c0_i32_0 : i32, i32
  }
  func.func @transform_3(%arg0: i32) -> (i32, i32) {
    %c0_i32 = arith.constant 0 : i32
    %c0_i32_0 = arith.constant 0 : i32
    return %c0_i32, %arg0 : i32, i32
  }
  func.func @transform_4(%arg0: i32) -> (i32, i32) {
    %c0_i32 = arith.constant 0 : i32
    %c0_i32_0 = arith.constant 0 : i32
    return %c0_i32, %arg0 : i32, i32
  }
}

module attributes {stable_mosaic.version = 11 : i64} {
  func.func @_conv_mm_kernel(%arg0: i32, %arg1: memref<32x288xbf16, #tpu.memory_space<vmem>>, %arg2: memref<288x8xbf16, #tpu.memory_space<vmem>>, %arg3: memref<32x1xf32, #tpu.memory_space<vmem>>, %arg4: memref<32x8xbf16, #tpu.memory_space<vmem>>) attributes {dimension_semantics = [#tpu.dimension_semantics<parallel>], iteration_bounds = array<i64: 1>, scalar_prefetch = 0 : i64, scratch_operands = 0 : i64, tpu.core_type = #tpu.core_type<tc>, window_params = [{pipeline_mode = #tpu.pipeline_mode<synchronous>, transform_indices = @transform_0, window_bounds = array<i64: 32, 288>}, {transform_indices = @transform_1, window_bounds = array<i64: 288, 8>}, {pipeline_mode = #tpu.pipeline_mode<synchronous>, transform_indices = @transform_2, window_bounds = array<i64: 32, 1>}, {transform_indices = @transform_3, window_bounds = array<i64: 32, 8>}]} {
    %c0 = arith.constant 0 : index
    %c0_0 = arith.constant 0 : index
    %0 = vector.load %arg1[%c0, %c0_0] : memref<32x288xbf16, #tpu.memory_space<vmem>>, vector<32x288xbf16>
    %c0_1 = arith.constant 0 : index
    %c0_2 = arith.constant 0 : index
    %1 = vector.load %arg2[%c0_1, %c0_2] : memref<288x8xbf16, #tpu.memory_space<vmem>>, vector<288x8xbf16>
    %cst = arith.constant dense<0.000000e+00> : vector<32x8xf32>
    %2 = tpu.matmul %0, %1, %cst {dimension_numbers = #tpu.dot_dimension_numbers<[1], [0], [0], [1], [0, 0, 1, 1], [], []>} : vector<32x288xbf16>, vector<288x8xbf16>, vector<32x8xf32> -> vector<32x8xf32>
    %c0_3 = arith.constant 0 : index
    %c0_4 = arith.constant 0 : index
    %3 = vector.load %arg3[%c0_3, %c0_4] : memref<32x1xf32, #tpu.memory_space<vmem>>, vector<32x1xf32>
    %4 = vector.broadcast %3 : vector<32x1xf32> to vector<32x8xf32>
    %5 = arith.addf %2, %4 : vector<32x8xf32>
    %cst_5 = arith.constant 0.000000e+00 : f32
    %6 = vector.broadcast %cst_5 : f32 to vector<32x8xf32>
    %7 = arith.maximumf %5, %6 : vector<32x8xf32>
    %8 = arith.truncf %7 : vector<32x8xf32> to vector<32x8xbf16>
    %c0_6 = arith.constant 0 : index
    %c0_7 = arith.constant 0 : index
    %9 = vector.load %arg4[%c0_6, %c0_7] : memref<32x8xbf16, #tpu.memory_space<vmem>>, vector<32x8xbf16>
    tpu.vector_store %arg4[%c0_6, %c0_7], %8 {strides = array<i32>} : memref<32x8xbf16, #tpu.memory_space<vmem>>, vector<32x8xbf16>,
    return
  }
  func.func @transform_0(%arg0: i32) -> (i32, i32) {
    %c0_i32 = arith.constant 0 : i32
    %c0_i32_0 = arith.constant 0 : i32
    %c0_i32_1 = arith.constant 0 : i32
    return %c0_i32, %c0_i32_0 : i32, i32
  }
  func.func @transform_1(%arg0: i32) -> (i32, i32) {
    %c0_i32 = arith.constant 0 : i32
    %c0_i32_0 = arith.constant 0 : i32
    return %c0_i32, %arg0 : i32, i32
  }
  func.func @transform_2(%arg0: i32) -> (i32, i32) {
    %c0_i32 = arith.constant 0 : i32
    %c0_i32_0 = arith.constant 0 : i32
    %c0_i32_1 = arith.constant 0 : i32
    return %c0_i32, %c0_i32_0 : i32, i32
  }
  func.func @transform_3(%arg0: i32) -> (i32, i32) {
    %c0_i32 = arith.constant 0 : i32
    %c0_i32_0 = arith.constant 0 : i32
    return %c0_i32, %arg0 : i32, i32
  }
}

module attributes {stable_mosaic.version = 11 : i64} {
  func.func @_conv_mm_kernel(%arg0: i32, %arg1: memref<64x288xbf16, #tpu.memory_space<vmem>>, %arg2: memref<288x2xbf16, #tpu.memory_space<vmem>>, %arg3: memref<64x1xf32, #tpu.memory_space<vmem>>, %arg4: memref<64x2xbf16, #tpu.memory_space<vmem>>) attributes {dimension_semantics = [#tpu.dimension_semantics<parallel>], iteration_bounds = array<i64: 1>, scalar_prefetch = 0 : i64, scratch_operands = 0 : i64, tpu.core_type = #tpu.core_type<tc>, window_params = [{pipeline_mode = #tpu.pipeline_mode<synchronous>, transform_indices = @transform_0, window_bounds = array<i64: 64, 288>}, {transform_indices = @transform_1, window_bounds = array<i64: 288, 2>}, {pipeline_mode = #tpu.pipeline_mode<synchronous>, transform_indices = @transform_2, window_bounds = array<i64: 64, 1>}, {transform_indices = @transform_3, window_bounds = array<i64: 64, 2>}]} {
    %c0 = arith.constant 0 : index
    %c0_0 = arith.constant 0 : index
    %0 = vector.load %arg1[%c0, %c0_0] : memref<64x288xbf16, #tpu.memory_space<vmem>>, vector<64x288xbf16>
    %c0_1 = arith.constant 0 : index
    %c0_2 = arith.constant 0 : index
    %1 = vector.load %arg2[%c0_1, %c0_2] : memref<288x2xbf16, #tpu.memory_space<vmem>>, vector<288x2xbf16>
    %cst = arith.constant dense<0.000000e+00> : vector<64x2xf32>
    %2 = tpu.matmul %0, %1, %cst {dimension_numbers = #tpu.dot_dimension_numbers<[1], [0], [0], [1], [0, 0, 1, 1], [], []>} : vector<64x288xbf16>, vector<288x2xbf16>, vector<64x2xf32> -> vector<64x2xf32>
    %c0_3 = arith.constant 0 : index
    %c0_4 = arith.constant 0 : index
    %3 = vector.load %arg3[%c0_3, %c0_4] : memref<64x1xf32, #tpu.memory_space<vmem>>, vector<64x1xf32>
    %4 = vector.broadcast %3 : vector<64x1xf32> to vector<64x2xf32>
    %5 = arith.addf %2, %4 : vector<64x2xf32>
    %cst_5 = arith.constant 0.000000e+00 : f32
    %6 = vector.broadcast %cst_5 : f32 to vector<64x2xf32>
    %7 = arith.maximumf %5, %6 : vector<64x2xf32>
    %8 = arith.truncf %7 : vector<64x2xf32> to vector<64x2xbf16>
    %c0_6 = arith.constant 0 : index
    %c0_7 = arith.constant 0 : index
    %9 = vector.load %arg4[%c0_6, %c0_7] : memref<64x2xbf16, #tpu.memory_space<vmem>>, vector<64x2xbf16>
    tpu.vector_store %arg4[%c0_6, %c0_7], %8 {strides = array<i32>} : memref<64x2xbf16, #tpu.memory_space<vmem>>, vector<64x2xbf16>,
    return
  }
  func.func @transform_0(%arg0: i32) -> (i32, i32) {
    %c0_i32 = arith.constant 0 : i32
    %c0_i32_0 = arith.constant 0 : i32
    %c0_i32_1 = arith.constant 0 : i32
    return %c0_i32, %c0_i32_0 : i32, i32
  }
  func.func @transform_1(%arg0: i32) -> (i32, i32) {
    %c0_i32 = arith.constant 0 : i32
    %c0_i32_0 = arith.constant 0 : i32
    return %c0_i32, %arg0 : i32, i32
  }
  func.func @transform_2(%arg0: i32) -> (i32, i32) {
    %c0_i32 = arith.constant 0 : i32
    %c0_i32_0 = arith.constant 0 : i32
    %c0_i32_1 = arith.constant 0 : i32
    return %c0_i32, %c0_i32_0 : i32, i32
  }
  func.func @transform_3(%arg0: i32) -> (i32, i32) {
    %c0_i32 = arith.constant 0 : i32
    %c0_i32_0 = arith.constant 0 : i32
    return %c0_i32, %arg0 : i32, i32
  }
}

module attributes {stable_mosaic.version = 11 : i64} {
  func.func @_conv_mm_kernel(%arg0: i32, %arg1: memref<64x32xbf16, #tpu.memory_space<vmem>>, %arg2: memref<32x2xbf16, #tpu.memory_space<vmem>>, %arg3: memref<64x1xf32, #tpu.memory_space<vmem>>, %arg4: memref<64x2xbf16, #tpu.memory_space<vmem>>) attributes {dimension_semantics = [#tpu.dimension_semantics<parallel>], iteration_bounds = array<i64: 1>, scalar_prefetch = 0 : i64, scratch_operands = 0 : i64, tpu.core_type = #tpu.core_type<tc>, window_params = [{pipeline_mode = #tpu.pipeline_mode<synchronous>, transform_indices = @transform_0, window_bounds = array<i64: 64, 32>}, {transform_indices = @transform_1, window_bounds = array<i64: 32, 2>}, {pipeline_mode = #tpu.pipeline_mode<synchronous>, transform_indices = @transform_2, window_bounds = array<i64: 64, 1>}, {transform_indices = @transform_3, window_bounds = array<i64: 64, 2>}]} {
    %c0 = arith.constant 0 : index
    %c0_0 = arith.constant 0 : index
    %0 = vector.load %arg1[%c0, %c0_0] : memref<64x32xbf16, #tpu.memory_space<vmem>>, vector<64x32xbf16>
    %c0_1 = arith.constant 0 : index
    %c0_2 = arith.constant 0 : index
    %1 = vector.load %arg2[%c0_1, %c0_2] : memref<32x2xbf16, #tpu.memory_space<vmem>>, vector<32x2xbf16>
    %cst = arith.constant dense<0.000000e+00> : vector<64x2xf32>
    %2 = tpu.matmul %0, %1, %cst {dimension_numbers = #tpu.dot_dimension_numbers<[1], [0], [0], [1], [0, 0, 1, 1], [], []>} : vector<64x32xbf16>, vector<32x2xbf16>, vector<64x2xf32> -> vector<64x2xf32>
    %c0_3 = arith.constant 0 : index
    %c0_4 = arith.constant 0 : index
    %3 = vector.load %arg3[%c0_3, %c0_4] : memref<64x1xf32, #tpu.memory_space<vmem>>, vector<64x1xf32>
    %4 = vector.broadcast %3 : vector<64x1xf32> to vector<64x2xf32>
    %5 = arith.addf %2, %4 : vector<64x2xf32>
    %6 = arith.truncf %5 : vector<64x2xf32> to vector<64x2xbf16>
    %c0_5 = arith.constant 0 : index
    %c0_6 = arith.constant 0 : index
    %7 = vector.load %arg4[%c0_5, %c0_6] : memref<64x2xbf16, #tpu.memory_space<vmem>>, vector<64x2xbf16>
    tpu.vector_store %arg4[%c0_5, %c0_6], %6 {strides = array<i32>} : memref<64x2xbf16, #tpu.memory_space<vmem>>, vector<64x2xbf16>,
    return
  }
  func.func @transform_0(%arg0: i32) -> (i32, i32) {
    %c0_i32 = arith.constant 0 : i32
    %c0_i32_0 = arith.constant 0 : i32
    %c0_i32_1 = arith.constant 0 : i32
    return %c0_i32, %c0_i32_0 : i32, i32
  }
  func.func @transform_1(%arg0: i32) -> (i32, i32) {
    %c0_i32 = arith.constant 0 : i32
    %c0_i32_0 = arith.constant 0 : i32
    return %c0_i32, %arg0 : i32, i32
  }
  func.func @transform_2(%arg0: i32) -> (i32, i32) {
    %c0_i32 = arith.constant 0 : i32
    %c0_i32_0 = arith.constant 0 : i32
    %c0_i32_1 = arith.constant 0 : i32
    return %c0_i32, %c0_i32_0 : i32, i32
  }
  func.func @transform_3(%arg0: i32) -> (i32, i32) {
    %c0_i32 = arith.constant 0 : i32
    %c0_i32_0 = arith.constant 0 : i32
    return %c0_i32, %arg0 : i32, i32
  }
}

module attributes {stable_mosaic.version = 11 : i64} {
  func.func @_conv_mm_kernel(%arg0: i32, %arg1: memref<64x576xbf16, #tpu.memory_space<vmem>>, %arg2: memref<576x2xbf16, #tpu.memory_space<vmem>>, %arg3: memref<64x1xf32, #tpu.memory_space<vmem>>, %arg4: memref<64x2xbf16, #tpu.memory_space<vmem>>, %arg5: memref<64x2xbf16, #tpu.memory_space<vmem>>) attributes {dimension_semantics = [#tpu.dimension_semantics<parallel>], iteration_bounds = array<i64: 1>, scalar_prefetch = 0 : i64, scratch_operands = 0 : i64, tpu.core_type = #tpu.core_type<tc>, window_params = [{pipeline_mode = #tpu.pipeline_mode<synchronous>, transform_indices = @transform_0, window_bounds = array<i64: 64, 576>}, {transform_indices = @transform_1, window_bounds = array<i64: 576, 2>}, {pipeline_mode = #tpu.pipeline_mode<synchronous>, transform_indices = @transform_2, window_bounds = array<i64: 64, 1>}, {transform_indices = @transform_3, window_bounds = array<i64: 64, 2>}, {transform_indices = @transform_4, window_bounds = array<i64: 64, 2>}]} {
    %c0 = arith.constant 0 : index
    %c0_0 = arith.constant 0 : index
    %0 = vector.load %arg1[%c0, %c0_0] : memref<64x576xbf16, #tpu.memory_space<vmem>>, vector<64x576xbf16>
    %c0_1 = arith.constant 0 : index
    %c0_2 = arith.constant 0 : index
    %1 = vector.load %arg2[%c0_1, %c0_2] : memref<576x2xbf16, #tpu.memory_space<vmem>>, vector<576x2xbf16>
    %cst = arith.constant dense<0.000000e+00> : vector<64x2xf32>
    %2 = tpu.matmul %0, %1, %cst {dimension_numbers = #tpu.dot_dimension_numbers<[1], [0], [0], [1], [0, 0, 1, 1], [], []>} : vector<64x576xbf16>, vector<576x2xbf16>, vector<64x2xf32> -> vector<64x2xf32>
    %c0_3 = arith.constant 0 : index
    %c0_4 = arith.constant 0 : index
    %3 = vector.load %arg3[%c0_3, %c0_4] : memref<64x1xf32, #tpu.memory_space<vmem>>, vector<64x1xf32>
    %4 = vector.broadcast %3 : vector<64x1xf32> to vector<64x2xf32>
    %5 = arith.addf %2, %4 : vector<64x2xf32>
    %c0_5 = arith.constant 0 : index
    %c0_6 = arith.constant 0 : index
    %6 = vector.load %arg4[%c0_5, %c0_6] : memref<64x2xbf16, #tpu.memory_space<vmem>>, vector<64x2xbf16>
    %7 = arith.extf %6 : vector<64x2xbf16> to vector<64x2xf32>
    %8 = arith.addf %5, %7 : vector<64x2xf32>
    %cst_7 = arith.constant 0.000000e+00 : f32
    %9 = vector.broadcast %cst_7 : f32 to vector<64x2xf32>
    %10 = arith.maximumf %8, %9 : vector<64x2xf32>
    %11 = arith.truncf %10 : vector<64x2xf32> to vector<64x2xbf16>
    %c0_8 = arith.constant 0 : index
    %c0_9 = arith.constant 0 : index
    %12 = vector.load %arg5[%c0_8, %c0_9] : memref<64x2xbf16, #tpu.memory_space<vmem>>, vector<64x2xbf16>
    tpu.vector_store %arg5[%c0_8, %c0_9], %11 {strides = array<i32>} : memref<64x2xbf16, #tpu.memory_space<vmem>>, vector<64x2xbf16>,
    return
  }
  func.func @transform_0(%arg0: i32) -> (i32, i32) {
    %c0_i32 = arith.constant 0 : i32
    %c0_i32_0 = arith.constant 0 : i32
    %c0_i32_1 = arith.constant 0 : i32
    return %c0_i32, %c0_i32_0 : i32, i32
  }
  func.func @transform_1(%arg0: i32) -> (i32, i32) {
    %c0_i32 = arith.constant 0 : i32
    %c0_i32_0 = arith.constant 0 : i32
    return %c0_i32, %arg0 : i32, i32
  }
  func.func @transform_2(%arg0: i32) -> (i32, i32) {
    %c0_i32 = arith.constant 0 : i32
    %c0_i32_0 = arith.constant 0 : i32
    %c0_i32_1 = arith.constant 0 : i32
    return %c0_i32, %c0_i32_0 : i32, i32
  }
  func.func @transform_3(%arg0: i32) -> (i32, i32) {
    %c0_i32 = arith.constant 0 : i32
    %c0_i32_0 = arith.constant 0 : i32
    return %c0_i32, %arg0 : i32, i32
  }
  func.func @transform_4(%arg0: i32) -> (i32, i32) {
    %c0_i32 = arith.constant 0 : i32
    %c0_i32_0 = arith.constant 0 : i32
    return %c0_i32, %arg0 : i32, i32
  }
}

module attributes {stable_mosaic.version = 11 : i64} {
  func.func @_conv_mm_kernel(%arg0: i32, %arg1: memref<64x576xbf16, #tpu.memory_space<vmem>>, %arg2: memref<576x2xbf16, #tpu.memory_space<vmem>>, %arg3: memref<64x1xf32, #tpu.memory_space<vmem>>, %arg4: memref<64x2xbf16, #tpu.memory_space<vmem>>) attributes {dimension_semantics = [#tpu.dimension_semantics<parallel>], iteration_bounds = array<i64: 1>, scalar_prefetch = 0 : i64, scratch_operands = 0 : i64, tpu.core_type = #tpu.core_type<tc>, window_params = [{pipeline_mode = #tpu.pipeline_mode<synchronous>, transform_indices = @transform_0, window_bounds = array<i64: 64, 576>}, {transform_indices = @transform_1, window_bounds = array<i64: 576, 2>}, {pipeline_mode = #tpu.pipeline_mode<synchronous>, transform_indices = @transform_2, window_bounds = array<i64: 64, 1>}, {transform_indices = @transform_3, window_bounds = array<i64: 64, 2>}]} {
    %c0 = arith.constant 0 : index
    %c0_0 = arith.constant 0 : index
    %0 = vector.load %arg1[%c0, %c0_0] : memref<64x576xbf16, #tpu.memory_space<vmem>>, vector<64x576xbf16>
    %c0_1 = arith.constant 0 : index
    %c0_2 = arith.constant 0 : index
    %1 = vector.load %arg2[%c0_1, %c0_2] : memref<576x2xbf16, #tpu.memory_space<vmem>>, vector<576x2xbf16>
    %cst = arith.constant dense<0.000000e+00> : vector<64x2xf32>
    %2 = tpu.matmul %0, %1, %cst {dimension_numbers = #tpu.dot_dimension_numbers<[1], [0], [0], [1], [0, 0, 1, 1], [], []>} : vector<64x576xbf16>, vector<576x2xbf16>, vector<64x2xf32> -> vector<64x2xf32>
    %c0_3 = arith.constant 0 : index
    %c0_4 = arith.constant 0 : index
    %3 = vector.load %arg3[%c0_3, %c0_4] : memref<64x1xf32, #tpu.memory_space<vmem>>, vector<64x1xf32>
    %4 = vector.broadcast %3 : vector<64x1xf32> to vector<64x2xf32>
    %5 = arith.addf %2, %4 : vector<64x2xf32>
    %cst_5 = arith.constant 0.000000e+00 : f32
    %6 = vector.broadcast %cst_5 : f32 to vector<64x2xf32>
    %7 = arith.maximumf %5, %6 : vector<64x2xf32>
    %8 = arith.truncf %7 : vector<64x2xf32> to vector<64x2xbf16>
    %c0_6 = arith.constant 0 : index
    %c0_7 = arith.constant 0 : index
    %9 = vector.load %arg4[%c0_6, %c0_7] : memref<64x2xbf16, #tpu.memory_space<vmem>>, vector<64x2xbf16>
    tpu.vector_store %arg4[%c0_6, %c0_7], %8 {strides = array<i32>} : memref<64x2xbf16, #tpu.memory_space<vmem>>, vector<64x2xbf16>,
    return
  }
  func.func @transform_0(%arg0: i32) -> (i32, i32) {
    %c0_i32 = arith.constant 0 : i32
    %c0_i32_0 = arith.constant 0 : i32
    %c0_i32_1 = arith.constant 0 : i32
    return %c0_i32, %c0_i32_0 : i32, i32
  }
  func.func @transform_1(%arg0: i32) -> (i32, i32) {
    %c0_i32 = arith.constant 0 : i32
    %c0_i32_0 = arith.constant 0 : i32
    return %c0_i32, %arg0 : i32, i32
  }
  func.func @transform_2(%arg0: i32) -> (i32, i32) {
    %c0_i32 = arith.constant 0 : i32
    %c0_i32_0 = arith.constant 0 : i32
    %c0_i32_1 = arith.constant 0 : i32
    return %c0_i32, %c0_i32_0 : i32, i32
  }
  func.func @transform_3(%arg0: i32) -> (i32, i32) {
    %c0_i32 = arith.constant 0 : i32
    %c0_i32_0 = arith.constant 0 : i32
    return %c0_i32, %arg0 : i32, i32
  }
}

module attributes {stable_mosaic.version = 11 : i64} {
  func.func @_pool_fc_kernel(%arg0: i32, %arg1: memref<2x64x1xbf16, #tpu.memory_space<vmem>>, %arg2: memref<64x10xf32, #tpu.memory_space<vmem>>, %arg3: memref<1x10xf32, #tpu.memory_space<vmem>>, %arg4: memref<2x10xf32, #tpu.memory_space<vmem>>) attributes {dimension_semantics = [#tpu.dimension_semantics<arbitrary>], iteration_bounds = array<i64: 1>, scalar_prefetch = 0 : i64, scratch_operands = 0 : i64, tpu.core_type = #tpu.core_type<tc>, window_params = [{pipeline_mode = #tpu.pipeline_mode<synchronous>, transform_indices = @transform_0, window_bounds = array<i64: 2, 64, 1>}, {pipeline_mode = #tpu.pipeline_mode<synchronous>, transform_indices = @transform_1, window_bounds = array<i64: 64, 10>}, {pipeline_mode = #tpu.pipeline_mode<synchronous>, transform_indices = @transform_2, window_bounds = array<i64: 1, 10>}, {pipeline_mode = #tpu.pipeline_mode<synchronous>, transform_indices = @transform_3, window_bounds = array<i64: 2, 10>}]} {
    %c0 = arith.constant 0 : index
    %c0_0 = arith.constant 0 : index
    %c0_1 = arith.constant 0 : index
    %0 = vector.load %arg1[%c0, %c0_0, %c0_1] : memref<2x64x1xbf16, #tpu.memory_space<vmem>>, vector<2x64x1xbf16>
    %1 = arith.extf %0 : vector<2x64x1xbf16> to vector<2x64x1xf32>
    %cst = arith.constant dense<0.000000e+00> : vector<2x64xf32>
    %2 = vector.multi_reduction <add>, %1, %cst [2] : vector<2x64x1xf32> to vector<2x64xf32>
    %cst_2 = arith.constant 1.000000e+00 : f32
    %3 = vector.broadcast %cst_2 : f32 to vector<2x64xf32>
    %4 = arith.divf %2, %3 : vector<2x64xf32>
    %c0_3 = arith.constant 0 : index
    %c0_4 = arith.constant 0 : index
    %5 = vector.load %arg2[%c0_3, %c0_4] : memref<64x10xf32, #tpu.memory_space<vmem>>, vector<64x10xf32>
    %cst_5 = arith.constant dense<0.000000e+00> : vector<2x10xf32>
    %6 = tpu.matmul %4, %5, %cst_5 {dimension_numbers = #tpu.dot_dimension_numbers<[1], [0], [0], [1], [0, 0, 1, 1], [], []>} : vector<2x64xf32>, vector<64x10xf32>, vector<2x10xf32> -> vector<2x10xf32>
    %c0_6 = arith.constant 0 : index
    %c0_7 = arith.constant 0 : index
    %7 = vector.load %arg3[%c0_6, %c0_7] : memref<1x10xf32, #tpu.memory_space<vmem>>, vector<1x10xf32>
    %8 = vector.broadcast %7 : vector<1x10xf32> to vector<2x10xf32>
    %9 = arith.addf %6, %8 : vector<2x10xf32>
    %c0_8 = arith.constant 0 : index
    %c0_9 = arith.constant 0 : index
    %10 = vector.load %arg4[%c0_8, %c0_9] : memref<2x10xf32, #tpu.memory_space<vmem>>, vector<2x10xf32>
    tpu.vector_store %arg4[%c0_8, %c0_9], %9 {strides = array<i32>} : memref<2x10xf32, #tpu.memory_space<vmem>>, vector<2x10xf32>,
    return
  }
  func.func @transform_0(%arg0: i32) -> (i32, i32, i32) {
    %c0_i32 = arith.constant 0 : i32
    %c0_i32_0 = arith.constant 0 : i32
    %c0_i32_1 = arith.constant 0 : i32
    %c0_i32_2 = arith.constant 0 : i32
    return %c0_i32, %c0_i32_0, %c0_i32_1 : i32, i32, i32
  }
  func.func @transform_1(%arg0: i32) -> (i32, i32) {
    %c0_i32 = arith.constant 0 : i32
    %c0_i32_0 = arith.constant 0 : i32
    %c0_i32_1 = arith.constant 0 : i32
    return %c0_i32, %c0_i32_0 : i32, i32
  }
  func.func @transform_2(%arg0: i32) -> (i32, i32) {
    %c0_i32 = arith.constant 0 : i32
    %c0_i32_0 = arith.constant 0 : i32
    %c0_i32_1 = arith.constant 0 : i32
    return %c0_i32, %c0_i32_0 : i32, i32
  }
  func.func @transform_3(%arg0: i32) -> (i32, i32) {
    %c0_i32 = arith.constant 0 : i32
    %c0_i32_0 = arith.constant 0 : i32
    %c0_i32_1 = arith.constant 0 : i32
    return %c0_i32, %c0_i32_0 : i32, i32
  }
}

</mosaic_0001>

<bundles_post_ra>
// kernel: _lambda_.22
= control target key start
LH: loop header
LB: loop body
LE: loop exit
PB: predicated region body
PF: predicated region fallthrough
CT: control target
= control target key end

     0   :  { %s720_s12 = smov 0   ;;  %s722_s13 = smov 0   ;;  %s863_s0 = inlined_call_operand.vmem [shape: bf16[8,147], index: 0, kind: input, shape index: {}]   ;;  %s864_s1 = inlined_call_operand.vmem [shape: bf16[147,512], index: 1, kind: input, shape index: {}]   ;;  %s865_s2 = inlined_call_operand.vmem [shape: f32[8,1], index: 2, kind: input, shape index: {}]   ;;  %s866_s3 = inlined_call_operand.vmem [shape: bf16[8,512], index: 3, kind: output, shape index: {}]  }
   0x1   :  { %s724_s14 = smov 0  }
   0x2 LB: > { %s541_s15 = sadd.s32 4294967295, %s696_s14   ;;  %s737_s16 = sadd.s32 1, %s696_s14   ;;  %s696_s14 = sphi %s724_s14, %s869_s14   ;;  %s692_s13 = sphi %s722_s13, %s868_s13   ;;  %s688_s12 = sphi %s720_s12, %s867_s12  }
   0x3   : > { %s38_s17 = ssub.s32 %s696_s14, %s737_s16  ;;  %s41_s18 = sadd.s32 1, %s692_s13 }
   0x4   : > { %p39_p0 = scmp.eq.s32.totalorder %s38_s17, 0  ;;  %p48_p1 = scmp.ne.s32.totalorder %s692_s13, %s688_s12 }
   0x5   : > { %p49_p2 = scmp.eq.s32.totalorder %s696_s14, 0  ;;  %p544_p4 = scmp.ge.s32.totalorder %s696_s14, 2 }
   0x6   : > { %s746_s19 = scalar_select %p39_p0, %s692_s13, %s41_s18  }
   0x7   : > { %p50_p3 = por %p49_p2, %p48_p1  ;;  %127 = sbr.rel (%p544_p4) target bundleno = 35 (0x23), region = 24 }
   0xc   : > { %130 = sbr.rel (!%p50_p3) target bundleno = 35 (0x23), region = 28  ;;  %s132_s20 = sand.u32 (%p50_p3), 1, %s692_s13  }
   0xd   : > { %s626_s21 = sshll.u32 (%p50_p3), %s696_s14, 3  ;;  %s645_s22 = smul.u32 (%p50_p3), 152, %s132_s20 }
   0xe   : > { %s754_s25 = scalar_lea.vmem (%p50_p3), %s864_s1, %s626_s21 }
   0xf   : > { %v202_v0 = vld [vmem:[%s754_s25] sm:$0xff] (%p50_p3)  ;;  %v204_v1 = vld [vmem:[%s754_s25 + $0x10] sm:$0xff] (%p50_p3)  ;;  %s759_s26 = scalar_lea.vmem (%p50_p3), [#allocation2], %s645_s22 }
  0x10   : > { %v206_v2 = vld [vmem:[%s754_s25 + $0x20] sm:$0xff] (%p50_p3)  ;;  %203 = vst [vmem:[%s759_s26] sm:$0xff] (%p50_p3), %v202_v0  ;;  %v208_v3 = vld [vmem:[%s754_s25 + $0x30] sm:$0xff] (%p50_p3) }
  0x11   : > { %205 = vst [vmem:[%s759_s26 + $0x8] sm:$0xff] %v204_v1  ;;  %v210_v4 = vld [vmem:[%s754_s25 + $0x40] sm:$0xff]  ;;  %v212_v5 = vld [vmem:[%s754_s25 + $0x50] sm:$0xff] }
  0x12   : > { %207 = vst [vmem:[%s759_s26 + $0x10] sm:$0xff] %v206_v2  ;;  %v214_v6 = vld [vmem:[%s754_s25 + $0x60] sm:$0xff]  ;;  %v216_v7 = vld [vmem:[%s754_s25 + $0x70] sm:$0xff] }
  0x13   : > { %209 = vst [vmem:[%s759_s26 + $0x18] sm:$0xff] %v208_v3  ;;  %v218_v8 = vld [vmem:[%s754_s25 + $0x80] sm:$0xff]  ;;  %v220_v9 = vld [vmem:[%s754_s25 + $0x90] sm:$0xff] }
  0x14   : > { %211 = vst [vmem:[%s759_s26 + $0x20] sm:$0xff] %v210_v4  ;;  %v222_v10 = vld [vmem:[%s754_s25 + $0xa0] sm:$0xff]  ;;  %v224_v11 = vld [vmem:[%s754_s25 + $0xb0] sm:$0xff] }
  0x15   : > { %213 = vst [vmem:[%s759_s26 + $0x28] sm:$0xff] %v212_v5  ;;  %v226_v12 = vld [vmem:[%s754_s25 + $0xc0] sm:$0xff]  ;;  %v228_v13 = vld [vmem:[%s754_s25 + $0xd0] sm:$0xff] }
  0x16   : > { %215 = vst [vmem:[%s759_s26 + $0x30] sm:$0xff] %v214_v6  ;;  %v230_v14 = vld [vmem:[%s754_s25 + $0xe0] sm:$0xff]  ;;  %v232_v15 = vld [vmem:[%s754_s25 + $0xf0] sm:$0xff] }
  0x17   : > { %217 = vst [vmem:[%s759_s26 + $0x38] sm:$0xff] %v216_v7  ;;  %v234_v16 = vld [vmem:[%s754_s25 + $0x100] sm:$0xff]  ;;  %v236_v17 = vld [vmem:[%s754_s25 + $0x110] sm:$0xff] }
  0x18   : > { %219 = vst [vmem:[%s759_s26 + $0x40] sm:$0xff] %v218_v8  ;;  %v238_v18 = vld [vmem:[%s754_s25 + $0x120] sm:$0xff] }
  0x19   : > { %221 = vst [vmem:[%s759_s26 + $0x48] sm:$0xff] %v220_v9 }
  0x1a   : > { %223 = vst [vmem:[%s759_s26 + $0x50] sm:$0xff] %v222_v10 }
  0x1b   : > { %225 = vst [vmem:[%s759_s26 + $0x58] sm:$0xff] %v224_v11 }
  0x1c   : > { %227 = vst [vmem:[%s759_s26 + $0x60] sm:$0xff] %v226_v12 }
  0x1d   : > { %229 = vst [vmem:[%s759_s26 + $0x68] sm:$0xff] %v228_v13 }
  0x1e   : > { %231 = vst [vmem:[%s759_s26 + $0x70] sm:$0xff] %v230_v14 }
  0x1f   : > { %233 = vst [vmem:[%s759_s26 + $0x78] sm:$0xff] %v232_v15 }
  0x20   : > { %235 = vst [vmem:[%s759_s26 + $0x80] sm:$0xff] %v234_v16 }
  0x21   : > { %237 = vst [vmem:[%s759_s26 + $0x88] sm:$0xff] %v236_v17 }
  0x22   : > { %239 = vst [vmem:[%s759_s26 + $0x90] sm:$0xff] %v238_v18 }
  0x23 PF: > { %p547_p5 = scmp.ge.s32.totalorder %s696_s14, 1  ;;  %p244_p6 = scmp.lt.s32.totalorder %s696_s14, 3 }
  0x25   : > { %p245_p7 = pnand %p547_p5, %p244_p6 }
  0x26   : > { %s251_s27 = sand.u32 (!%p245_p7), 1, %s688_s12   ;;  %s548_s7 = sshll.u32 (!%p245_p7), %s541_s15, 1 }
  0x27   : > { %248 = sbr.rel (%p245_p7) target bundleno = 220 (0xdc), region = 66  ;;  %p276_p8 = scmp.lt.s32.totalorder (!%p245_p7), %s548_s7, 3 }
  0x28   : > { %s646_s28 = smul.u32 (!%p245_p7), 152, %s251_s27 }
  0x2a   : > { %s799_s29 = scalar_lea.vmem (!%p245_p7), [#allocation2], %s646_s28 }
  0x2c   : > { %v608_v19 = vld [vmem:[%s799_s29 + $0x70] sm:$0xf]  ;;  %v642_v20 = vld [vmem:[%s799_s29 + $0x74] sm:$0xf0]  ;;  %v641_v21 = vld [vmem:[%s799_s29 + $0x74] sm:$0xf] }
  0x2d   : > { %v609_v22 = vor.u32 %v642_v20, %v608_v19  ;;  %v610_v23 = vld [vmem:[%s799_s29 + $0x78] sm:$0xf0]  ;;  %v600_v24 = vld [vmem:[%s799_s29 + $0x60] sm:$0xf]  ;;  %v640_v25 = vld [vmem:[%s799_s29 + $0x64] sm:$0xf0] }
  0x2e   : > { %v613_v26 = vor.u32 %v641_v21, %v610_v23  ;;  %v639_v27 = vld [vmem:[%s799_s29 + $0x64] sm:$0xf]  ;;  %v602_v28 = vld [vmem:[%s799_s29 + $0x68] sm:$0xf0]  ;;  %vm413_vm0 = vcmask 1040384   ;;  %v601_v29 = vor.u32 %v640_v25, %v600_v24  ;;  %vm414_vm1 = vcmask 1041408  }
  0x2f   : > { %423 = vmatpush.bf16.msra.mxu0 %v609_v22  ;;  %v605_v30 = vor.u32 %v639_v27, %v602_v28  ;;  %v592_v31 = vld [vmem:[%s799_s29 + $0x50] sm:$0xf]  ;;  %v638_v32 = vld [vmem:[%s799_s29 + $0x54] sm:$0xf0]  ;;  %v637_v33 = vld [vmem:[%s799_s29 + $0x54] sm:$0xf] }
  0x30   : > { %449 = vmatpush.bf16.msra.mxu2 %v613_v26  ;;  %v594_v34 = vld [vmem:[%s799_s29 + $0x58] sm:$0xf0]  ;;  %v698_v35 = vmov 65535   ;;  %v301_v37 = vld [vmem:[%s799_s29 + $0x90] sm:$0x33]  ;;  %v593_v38 = vor.u32 %v638_v32, %v592_v31  ;;  %v819_v45 = vld [vmem:[%s863_s0] sm:$0xff] }
  0x31   : > { %v415_v36 = vsel %vm413_vm0, 4294967295, %v698_v35  ;;  %v370_v39 = vunpack.c.h.b16 %v301_v37  ;;  %v369_v40 = vunpack.c.l.b16 %v301_v37  ;;  %v597_v41 = vor.u32 %v637_v33, %v594_v34  ;;  %v584_v42 = vld [vmem:[%s799_s29 + $0x40] sm:$0xf]  ;;  %v636_v43 = vld [vmem:[%s799_s29 + $0x44] sm:$0xf0]  ;;  %s871_s7 = smov (!%p276_p8, %s548_s7), 3 }
  0x32   : > { %v416_v44 = vsel %vm414_vm1, %v415_v36, 0  ;;  %v635_v46 = vld [vmem:[%s799_s29 + $0x44] sm:$0xf]  ;;  %v586_v47 = vld [vmem:[%s799_s29 + $0x48] sm:$0xf0]  ;;  %v585_v54 = vor.u32 %v636_v43, %v584_v42  ;;  %v310_v60 = vunpack.c.h.b16 %v819_v45  ;;  %v699_v2 = vmov 0  }
  0x33   : > { %424 = vmatpush.bf16.msra.mxu0 %v601_v29  ;;  %v390_v48 = vpack.c.b16 %v370_v39, %v370_v39  ;;  %v643_v49 = vld [vmem:[%s799_s29 + $0x84] sm:$0xf]  ;;  %v389_v50 = vpack.c.b16 %v369_v40, %v369_v40  ;;  %v618_v51 = vld [vmem:[%s799_s29 + $0x88] sm:$0xf0]  ;;  %v616_v52 = vld [vmem:[%s799_s29 + $0x80] sm:$0xf]  ;;  %v589_v57 = vor.u32 %v635_v46, %v586_v47  ;;  %673 = vset.pattern.permute.xlu0 %v699_v2  ;;  %v309_v22 = vunpack.c.l.b16 %v819_v45 }
  0x34   : > { %450 = vmatpush.bf16.msra.mxu2 %v605_v30  ;;  %v644_v53 = vld [vmem:[%s799_s29 + $0x84] sm:$0xf0]  ;;  %v576_v58 = vld [vmem:[%s799_s29 + $0x30] sm:$0xf]  ;;  %v634_v59 = vld [vmem:[%s799_s29 + $0x34] sm:$0xf0]  ;;  %v621_v0 = vor.u32 %v643_v49, %v618_v51  ;;  %v312_v7 = vpack.c.b16 %v310_v60, %v310_v60 }
  0x35   : > { %v421_v55 = vand.u32 %v416_v44, %v390_v48  ;;  %v418_v56 = vand.u32 %v416_v44, %v389_v50  ;;  %v302_v61 = vld [vmem:[%s865_s2] sm:$0xff]  ;;  %v633_v62 = vld [vmem:[%s799_s29 + $0x34] sm:$0xf]  ;;  %v578_v63 = vld [vmem:[%s799_s29 + $0x38] sm:$0xf0]  ;;  %v617_v1 = vor.u32 %v644_v53, %v616_v52  ;;  %v577_v3 = vor.u32 %v634_v59, %v576_v58  ;;  %s549_s8 = sshll.u32 %s871_s7, 2 }
  0x36   : > { %305 = vperm.xlu0 %673, %v302_v61   ;;  %v581_v4 = vor.u32 %v633_v62, %v578_v63  ;;  %v568_v5 = vld [vmem:[%s799_s29 + $0x20] sm:$0xf]  ;;  %v632_v6 = vld [vmem:[%s799_s29 + $0x24] sm:$0xf0]  ;;  %v631_v8 = vld [vmem:[%s799_s29 + $0x24] sm:$0xf]  ;;  %v311_v25 = vpack.c.b16 %v309_v22, %v309_v22  ;;  %s279_s11 = scalar_lea.vmem %s866_s3, %s549_s8 }
  0x37   : > { %425 = vmatpush.bf16.msra.mxu0 %v593_v38  ;;  %468 = vmatpush.bf16.msra.mxu3 %v421_v55  ;;  %v570_v9 = vld [vmem:[%s799_s29 + $0x28] sm:$0xf0]  ;;  %vm409_vm2 = vcmask 154624   ;;  %v569_v10 = vor.u32 %v632_v6, %v568_v5  ;;  %v560_v12 = vld [vmem:[%s799_s29 + $0x10] sm:$0xf] }
  0x38   : > { %451 = vmatpush.bf16.msra.mxu2 %v597_v41  ;;  %442 = vmatpush.bf16.msra.mxu1 %v418_v56  ;;  %v573_v11 = vor.u32 %v631_v8, %v570_v9  ;;  %v630_v13 = vld [vmem:[%s799_s29 + $0x14] sm:$0xf0]  ;;  %v629_v14 = vld [vmem:[%s799_s29 + $0x14] sm:$0xf]  ;;  %v562_v15 = vld [vmem:[%s799_s29 + $0x18] sm:$0xf0] }
  0x39   : > { %v561_v16 = vor.u32 %v630_v13, %v560_v12  ;;  %v565_v17 = vor.u32 %v629_v14, %v562_v15  ;;  %v552_v18 = vld [vmem:[%s799_s29] sm:$0xf]  ;;  %v628_v19 = vld [vmem:[%s799_s29 + $0x4] sm:$0xf0]  ;;  %v627_v20 = vld [vmem:[%s799_s29 + $0x4] sm:$0xf] }
  0x3a   : > { %v554_v21 = vld [vmem:[%s799_s29 + $0x8] sm:$0xf0]  ;;  %v553_v23 = vor.u32 %v628_v19, %v552_v18 }
  0x3b   : > { %426 = vmatpush.bf16.msra.mxu0 %v585_v54  ;;  %469 = vmatpush.bf16.msra.mxu3 %v621_v0  ;;  %v557_v24 = vor.u32 %v627_v20, %v554_v21 }
  0x3c   : > { %452 = vmatpush.bf16.msra.mxu2 %v589_v57  ;;  %443 = vmatpush.bf16.msra.mxu1 %v617_v1 }
  0x3e   : > { %623 = vmatmul.msk.bf16.vlgmr.msra.gmra.mxu3 %vm409_vm2, %v312_v7 }
  0x3f   : > { %427 = vmatpush.bf16.msra.mxu0 %v577_v3  ;;  %622 = vmatmul.msk.bf16.vlgmr.msra.gmra.mxu1 %vm409_vm2, %v312_v7 }
  0x40   : > { %453 = vmatpush.bf16.msra.mxu2 %v581_v4 }
  0x43   : > { %428 = vmatpush.bf16.msra.mxu0 %v569_v10 }
  0x44   : > { %454 = vmatpush.bf16.msra.mxu2 %v573_v11 }
  0x47   : > { %429 = vmatpush.bf16.msra.mxu0 %v561_v16 }
  0x48   : > { %455 = vmatpush.bf16.msra.mxu2 %v565_v17 }
  0x4b   : > { %430 = vmatpush.bf16.msra.mxu0 %v553_v23 }
  0x4c   : > { %456 = vmatpush.bf16.msra.mxu2 %v557_v24 }
  0x4e   : > { %431 = vmatmul.bf16.vlgmr.msra.gmra.mxu0 %v311_v25 }
  0x4f   : > { %457 = vmatmul.bf16.vlgmr.msra.gmra.mxu2 %v311_v25 }
  0xa8   : > { %v306_v29 = vpop.permute.xlu0 %305 }
  0xbc   : > { %v445_v26 = vpop.f32.mrf.mxu1 }
  0xc1   : > { %v471_v27 = vpop.f32.mrf.mxu3 }
  0xc4   : > { %v447_v28 = vpop.f32.mrf.mxu1 }
  0xc9   : > { %v473_v31 = vpop.f32.mrf.mxu3 }
  0xcb   : > { %v432_v30 = vpop.f32.mrf.mxu0 }
  0xcc   : > { %v433_v32 = vadd.f32 %v432_v30, %v306_v29 }
  0xce   : > { %v446_v33 = vadd.f32 %v445_v26, %v433_v32 }
  0xd0   : > { %v475_v37 = vmax.f32 %v446_v33, 0.0 }
  0xd2   : > { %v458_v34 = vpop.f32.mrf.mxu2 }
  0xd3   : > { %v459_v35 = vadd.f32 %v458_v34, %v306_v29  ;;  %v434_v36 = vpop.f32.mrf.mxu0 }
  0xd5   : > { %v472_v38 = vadd.f32 %v471_v27, %v459_v35 }
  0xd7   : > { %v476_v39 = vmax.f32 %v472_v38, 0.0 }
  0xd9   : > { %v477_v40 = vpack.c.bf16 %v476_v39, %v475_v37 }
  0xda   : > { %v460_v41 = vpop.f32.mrf.mxu2 }
  0xdb   : > { %478 = vst [vmem:[%s279_s11] sm:$0xff] %v477_v40 }
  0xdc PF: > { %p10_p9 = scmp.ge.s32.totalorder %s737_s16, 4   ;;  %s867_s12 = smov %s692_s13 }
  0xdd   : > { %s868_s13 = smov %s746_s19  ;;  %s869_s14 = smov %s737_s16 }
  0xde   :  { %12 = sbr.rel (!%p10_p9) target bundleno = 2 (0x2), region = 105 }

// kernel: _lambda_.23
= control target key start
LH: loop header
LB: loop body
LE: loop exit
PB: predicated region body
PF: predicated region fallthrough
CT: control target
= control target key end

     0   :  { %s87_s0 = inlined_call_operand.vmem [shape: bf16[9,8,128], index: 0, kind: input, shape index: {}]   ;;  %s88_s1 = inlined_call_operand.vmem [shape: bf16[8,128], index: 1, kind: output, shape index: {}]  }
   0x1   :  { %v41_v0 = vld [vmem:[%s87_s0] sm:$0xff]   ;;  %v56_v1 = vld [vmem:[%s87_s0 + $0x8] sm:$0xff]   ;;  %v57_v2 = vld [vmem:[%s87_s0 + $0x10] sm:$0xff]  }
   0x2   :  { %v42_v3 = vunpack.c.l.bf16 %v41_v0  ;;  %v43_v4 = vunpack.c.h.bf16 %v41_v0  ;;  %v46_v5 = vunpack.c.l.bf16 %v56_v1  ;;  %v47_v6 = vunpack.c.h.bf16 %v56_v1  ;;  %v58_v7 = vld [vmem:[%s87_s0 + $0x18] sm:$0xff]   ;;  %v16_v8 = vld [vmem:[%s87_s0 + $0x20] sm:$0xf] }
   0x3   :  { %v50_v9 = vunpack.c.l.bf16 %v57_v2  ;;  %v51_v10 = vunpack.c.h.bf16 %v57_v2  ;;  %v54_v11 = vunpack.c.l.bf16 %v58_v7  ;;  %v55_v12 = vunpack.c.h.bf16 %v58_v7 }
   0x4   :  { %v25_v13 = vunpack.c.l.bf16 %v16_v8 }
   0x5   :  { %v26_v14 = vmax.f32 %v42_v3, %v50_v9  ;;  %v27_v15 = vmax.f32 %v43_v4, %v51_v10  ;;  %v28_v16 = vmax.f32 %v46_v5, %v54_v11  ;;  %v29_v17 = vmax.f32 %v47_v6, %v55_v12 }
   0x7   :  { %v30_v18 = vmax.f32 %v26_v14, %v25_v13  ;;  %v32_v19 = vmax.f32 %v28_v16, %v29_v17 }
   0x9   :  { %v31_v20 = vmax.f32 %v30_v18, %v27_v15 }
   0xb   :  { %v33_v21 = vmax.f32 %v31_v20, %v32_v19 }
   0xd   :  { %v34_v22 = vpack.c.bf16 %v33_v21, %v33_v21 }
   0xf   :  { %35 = vst [vmem:[%s88_s1] sm:$0xf] %v34_v22 }

// kernel: _lambda_.24
= control target key start
LH: loop header
LB: loop body
LE: loop exit
PB: predicated region body
PF: predicated region fallthrough
CT: control target
= control target key end

     0   :  { %v109_v1 = vmov 0   ;;  %vm62_vm0 = vcmask 1043456   ;;  %vm58_vm1 = vcmask 588800   ;;  %s154_s1 = inlined_call_operand.vmem [shape: bf16[72,128], index: 1, kind: input, shape index: {}]   ;;  %s155_s2 = inlined_call_operand.vmem [shape: f32[8,1], index: 2, kind: input, shape index: {}]   ;;  %s156_s0 = inlined_call_operand.vmem [shape: bf16[8,72], index: 0, kind: input, shape index: {}]   ;;  %s157_s3 = inlined_call_operand.vmem [shape: bf16[8,128], index: 3, kind: output, shape index: {}]  }
   0x1   :  { %v24_v0 = vld [vmem:[%s154_s1 + $0x20] sm:$0xf]  ;;  %108 = vset.pattern.permute.xlu0 %v109_v1  ;;  %v106_v6 = vld [vmem:[%s154_s1 + $0x18] sm:$0xff]  ;;  %v105_v7 = vld [vmem:[%s154_s1 + $0x10] sm:$0xff] }
   0x2   :  { %v48_v2 = vunpack.c.l.b16 %v24_v0  ;;  %v25_v3 = vld [vmem:[%s155_s2] sm:$0xff]  ;;  %v104_v8 = vld [vmem:[%s154_s1 + $0x8] sm:$0xff] }
   0x3   :  { %28 = vperm.xlu0 %108, %v25_v3   ;;  %v103_v9 = vld [vmem:[%s154_s1] sm:$0xff] }
   0x4   :  { %v53_v4 = vpack.c.b16 %v48_v2, %v48_v2  ;;  %v15_v10 = vld [vmem:[%s156_s0] sm:$0xf] }
   0x6   :  { %v64_v5 = vsel %vm62_vm0, %v53_v4, 0 }
   0x7   :  { %69 = vmatpush.bf16.msra.mxu0 %v64_v5 }
   0xb   :  { %70 = vmatpush.bf16.msra.mxu0 %v106_v6 }
   0xf   :  { %71 = vmatpush.bf16.msra.mxu0 %v105_v7 }
  0x13   :  { %72 = vmatpush.bf16.msra.mxu0 %v104_v8 }
  0x17   :  { %73 = vmatpush.bf16.msra.mxu0 %v103_v9 }
  0x1a   :  { %102 = vmatmul.msk.bf16.vlgmr.msra.gmra.mxu0 %vm58_vm1, %v15_v10 }
  0x75   :  { %v29_v11 = vpop.permute.xlu0 %28 }
  0x97   :  { %v75_v12 = vpop.f32.mrf.mxu0 }
  0x98   :  { %v76_v13 = vadd.f32 %v75_v12, %v29_v11 }
  0x9a   :  { %v79_v14 = vmax.f32 %v76_v13, 0.0 }
  0x9c   :  { %v80_v15 = vpack.c.bf16 %v79_v14, %v79_v14 }
  0x9e   :  { %81 = vst [vmem:[%s157_s3] sm:$0xf] %v80_v15 }
  0x9f   :  { %v77_v16 = vpop.f32.mrf.mxu0 }

// kernel: _lambda_.25
= control target key start
LH: loop header
LB: loop body
LE: loop exit
PB: predicated region body
PF: predicated region fallthrough
CT: control target
= control target key end

     0   :  { %v115_v1 = vmov 0   ;;  %vm65_vm0 = vcmask 1043456   ;;  %vm61_vm1 = vcmask 588800   ;;  %s168_s1 = inlined_call_operand.vmem [shape: bf16[72,128], index: 1, kind: input, shape index: {}]   ;;  %s169_s2 = inlined_call_operand.vmem [shape: f32[8,1], index: 2, kind: input, shape index: {}]   ;;  %s170_s0 = inlined_call_operand.vmem [shape: bf16[8,72], index: 0, kind: input, shape index: {}]   ;;  %s171_s3 = inlined_call_operand.vmem [shape: bf16[8,128], index: 3, kind: input, shape index: {}]   ;;  %s172_s4 = inlined_call_operand.vmem [shape: bf16[8,128], index: 4, kind: output, shape index: {}]  }
   0x1   :  { %v27_v0 = vld [vmem:[%s168_s1 + $0x20] sm:$0xf]  ;;  %114 = vset.pattern.permute.xlu0 %v115_v1  ;;  %v112_v6 = vld [vmem:[%s168_s1 + $0x18] sm:$0xff]  ;;  %v111_v7 = vld [vmem:[%s168_s1 + $0x10] sm:$0xff] }
   0x2   :  { %v51_v2 = vunpack.c.l.b16 %v27_v0  ;;  %v28_v3 = vld [vmem:[%s169_s2] sm:$0xff]  ;;  %v110_v8 = vld [vmem:[%s168_s1 + $0x8] sm:$0xff] }
   0x3   :  { %31 = vperm.xlu0 %114, %v28_v3   ;;  %v109_v9 = vld [vmem:[%s168_s1] sm:$0xff] }
   0x4   :  { %v56_v4 = vpack.c.b16 %v51_v2, %v51_v2  ;;  %v18_v10 = vld [vmem:[%s170_s0] sm:$0xf] }
   0x5   :  { %v82_v11 = vld [vmem:[%s171_s3] sm:$0xf] }
   0x6   :  { %v67_v5 = vsel %vm65_vm0, %v56_v4, 0  ;;  %v83_v13 = vunpack.c.l.bf16 %v82_v11 }
   0x7   :  { %72 = vmatpush.bf16.msra.mxu0 %v67_v5 }
   0xb   :  { %73 = vmatpush.bf16.msra.mxu0 %v112_v6 }
   0xf   :  { %74 = vmatpush.bf16.msra.mxu0 %v111_v7 }
  0x13   :  { %75 = vmatpush.bf16.msra.mxu0 %v110_v8 }
  0x17   :  { %76 = vmatpush.bf16.msra.mxu0 %v109_v9 }
  0x1a   :  { %108 = vmatmul.msk.bf16.vlgmr.msra.gmra.mxu0 %vm61_vm1, %v18_v10 }
  0x75   :  { %v32_v12 = vpop.permute.xlu0 %31 }
  0x97   :  { %v78_v14 = vpop.f32.mrf.mxu0 }
  0x98   :  { %v79_v15 = vadd.f32 %v78_v14, %v32_v12 }
  0x9a   :  { %v84_v16 = vadd.f32 %v83_v13, %v79_v15 }
  0x9c   :  { %v85_v17 = vmax.f32 %v84_v16, 0.0 }
  0x9e   :  { %v86_v18 = vpack.c.bf16 %v85_v17, %v85_v17 }
  0x9f   :  { %v80_v19 = vpop.f32.mrf.mxu0 }
  0xa0   :  { %87 = vst [vmem:[%s172_s4] sm:$0xf] %v86_v18 }

// kernel: _lambda_.29
= control target key start
LH: loop header
LB: loop body
LE: loop exit
PB: predicated region body
PF: predicated region fallthrough
CT: control target
= control target key end

     0   :  { %v131_v1 = vmov 0   ;;  %vm74_vm0 = vcmask 1043456   ;;  %vm70_vm1 = vcmask 588800   ;;  %vm96_vm2 = vcmask 257024   ;;  %s182_s1 = inlined_call_operand.vmem [shape: bf16[72,32], index: 1, kind: input, shape index: {}]   ;;  %s183_s2 = inlined_call_operand.vmem [shape: f32[16,1], index: 2, kind: input, shape index: {}]   ;;  %s184_s0 = inlined_call_operand.vmem [shape: bf16[16,72], index: 0, kind: input, shape index: {}]   ;;  %s185_s3 = inlined_call_operand.vmem [shape: bf16[16,32], index: 3, kind: output, shape index: {}]  }
   0x1   :  { %v25_v0 = vld [vmem:[%s182_s1 + $0x20] sm:$0xf]  ;;  %130 = vset.pattern.permute.xlu0 %v131_v1  ;;  %v128_v6 = vld [vmem:[%s182_s1 + $0x18] sm:$0xff]  ;;  %v27_v7 = vld [vmem:[%s183_s2 + $0x8] sm:$0xff] }
   0x2   :  { %v60_v2 = vunpack.c.l.b16 %v25_v0  ;;  %v26_v3 = vld [vmem:[%s183_s2] sm:$0xff]  ;;  %v127_v8 = vld [vmem:[%s182_s1 + $0x10] sm:$0xff]  ;;  %v126_v9 = vld [vmem:[%s182_s1 + $0x8] sm:$0xff] }
   0x3   :  { %30 = vperm.xlu0 %130, %v26_v3   ;;  %v125_v10 = vld [vmem:[%s182_s1] sm:$0xff] }
   0x4   :  { %v65_v4 = vpack.c.b16 %v60_v2, %v60_v2  ;;  %v124_v11 = vld [vmem:[%s184_s0] sm:$0xff] }
   0x6   :  { %v76_v5 = vsel %vm74_vm0, %v65_v4, 0 }
   0x7   :  { %81 = vmatpush.bf16.msra.mxu0 %v76_v5 }
   0xb   :  { %82 = vmatpush.bf16.msra.mxu0 %v128_v6  ;;  %35 = vperm.xlu0 %130, %v27_v7  }
   0xf   :  { %83 = vmatpush.bf16.msra.mxu0 %v127_v8 }
  0x13   :  { %84 = vmatpush.bf16.msra.mxu0 %v126_v9 }
  0x17   :  { %85 = vmatpush.bf16.msra.mxu0 %v125_v10 }
  0x1a   :  { %123 = vmatmul.msk.bf16.vlgmr.msra.gmra.mxu0 %vm70_vm1, %v124_v11 }
  0x75   :  { %v31_v12 = vpop.permute.xlu0 %30 }
  0x7d   :  { %v36_v17 = vpop.permute.xlu0 %35 }
  0x97   :  { %v87_v13 = vpop.f32.mrf.mxu0 }
  0x98   :  { %v88_v14 = vadd.f32 %v87_v13, %v31_v12 }
  0x9a   :  { %v92_v15 = vmax.f32 %v88_v14, 0.0 }
  0x9c   :  { %v94_v16 = vpack.c.bf16 %v92_v15, %v92_v15 }
  0x9e   :  { %97 = vst.msk [vmem:[%s185_s3] sm:$0xf] %vm96_vm2, %v94_v16 }
  0x9f   :  { %v89_v18 = vpop.f32.mrf.mxu0 }
  0xa0   :  { %v90_v19 = vadd.f32 %v89_v18, %v36_v17 }
  0xa2   :  { %v93_v20 = vmax.f32 %v90_v19, 0.0 }
  0xa4   :  { %v95_v21 = vpack.c.bf16 %v93_v20, %v93_v20 }
  0xa6   :  { %98 = vst.msk [vmem:[%s185_s3 + $0x4] sm:$0xf] %vm96_vm2, %v95_v21 }

// kernel: _lambda_.28
= control target key start
LH: loop header
LB: loop body
LE: loop exit
PB: predicated region body
PF: predicated region fallthrough
CT: control target
= control target key end

     0   :  { %vm39_vm0 = vcmask 1043456   ;;  %v74_v1 = vmov 0   ;;  %vm35_vm1 = vcmask 64512   ;;  %vm59_vm2 = vcmask 257024   ;;  %s113_s1 = inlined_call_operand.vmem [shape: bf16[8,32], index: 1, kind: input, shape index: {}]   ;;  %s114_s0 = inlined_call_operand.vmem [shape: bf16[16,8], index: 0, kind: input, shape index: {}]   ;;  %s115_s2 = inlined_call_operand.vmem [shape: f32[16,1], index: 2, kind: input, shape index: {}]   ;;  %s116_s3 = inlined_call_operand.vmem [shape: bf16[16,32], index: 3, kind: output, shape index: {}]  }
   0x1   :  { %v17_v0 = vld [vmem:[%s113_s1] sm:$0xf]  ;;  %73 = vset.pattern.permute.xlu0 %v74_v1  ;;  %v19_v5 = vld [vmem:[%s115_s2 + $0x8] sm:$0xff] }
   0x2   :  { %v18_v2 = vld [vmem:[%s115_s2] sm:$0xff]  ;;  %v41_v3 = vsel %vm39_vm0, %v17_v0, 0 }
   0x3   :  { %v71_v4 = vld [vmem:[%s114_s0] sm:$0xff]  ;;  %22 = vperm.xlu0 %73, %v18_v2   ;;  %50 = vmatpush.bf16.msra.mxu0 %v41_v3 }
   0x6   :  { %70 = vmatmul.msk.bf16.vlgmr.msra.gmra.mxu0 %vm35_vm1, %v71_v4 }
   0xb   :  { %27 = vperm.xlu0 %73, %v19_v5  }
  0x75   :  { %v23_v6 = vpop.permute.xlu0 %22 }
  0x7d   :  { %v28_v10 = vpop.permute.xlu0 %27 }
  0x83   :  { %v52_v7 = vpop.f32.mrf.mxu0 }
  0x84   :  { %v53_v8 = vadd.f32 %v52_v7, %v23_v6 }
  0x86   :  { %v57_v9 = vpack.c.bf16 %v53_v8, %v53_v8 }
  0x88   :  { %60 = vst.msk [vmem:[%s116_s3] sm:$0xf] %vm59_vm2, %v57_v9 }
  0x8b   :  { %v54_v11 = vpop.f32.mrf.mxu0 }
  0x8c   :  { %v55_v12 = vadd.f32 %v54_v11, %v28_v10 }
  0x8e   :  { %v58_v13 = vpack.c.bf16 %v55_v12, %v55_v12 }
  0x90   :  { %61 = vst.msk [vmem:[%s116_s3 + $0x4] sm:$0xf] %vm59_vm2, %v58_v13 }

// kernel: _lambda_.30
= control target key start
LH: loop header
LB: loop body
LE: loop exit
PB: predicated region body
PF: predicated region fallthrough
CT: control target
= control target key end

     0   :  { %v224_v4 = vmov 0   ;;  %vm113_vm0 = vcmask 130048   ;;  %vm155_vm1 = vcmask 257024   ;;  %s304_s1 = inlined_call_operand.vmem [shape: bf16[144,32], index: 1, kind: input, shape index: {}]   ;;  %s305_s0 = inlined_call_operand.vmem [shape: bf16[16,144], index: 0, kind: input, shape index: {}]   ;;  %s306_s2 = inlined_call_operand.vmem [shape: f32[16,1], index: 2, kind: input, shape index: {}]   ;;  %s307_s3 = inlined_call_operand.vmem [shape: bf16[16,32], index: 3, kind: input, shape index: {}]   ;;  %s308_s4 = inlined_call_operand.vmem [shape: bf16[16,32], index: 4, kind: output, shape index: {}]  }
   0x1   :  { %v216_v0 = vld [vmem:[%s304_s1 + $0x38] sm:$0xff]  ;;  %v215_v1 = vld [vmem:[%s304_s1 + $0x30] sm:$0xff]  ;;  %v217_v2 = vld [vmem:[%s304_s1 + $0x40] sm:$0xff]  ;;  %223 = vset.pattern.permute.xlu0 %v224_v4 }
   0x2   :  { %117 = vmatpush.bf16.msra.mxu0 %v216_v0  ;;  %v207_v3 = vld [vmem:[%s305_s0 + $0x4] sm:$0xf]  ;;  %v166_v5 = vld [vmem:[%s305_s0 + $0x8] sm:$0xf0]  ;;  %138 = vmatpush.bf16.msra.mxu1 %v217_v2  ;;  %v212_v11 = vld [vmem:[%s304_s1 + $0x18] sm:$0xff] }
   0x3   :  { %v169_v6 = vor.u32 %v207_v3, %v166_v5  ;;  %v38_v7 = vld [vmem:[%s306_s2] sm:$0xff]  ;;  %v214_v8 = vld [vmem:[%s304_s1 + $0x28] sm:$0xff]  ;;  %v211_v12 = vld [vmem:[%s304_s1 + $0x10] sm:$0xff] }
   0x4   :  { %42 = vperm.xlu0 %223, %v38_v7   ;;  %v213_v9 = vld [vmem:[%s304_s1 + $0x20] sm:$0xff]  ;;  %v39_v10 = vld [vmem:[%s306_s2 + $0x8] sm:$0xff] }
   0x5   :  { %206 = vmatmul.msk.bf16.vlgmr.msra.gmra.mxu1 %vm113_vm0, %v169_v6  ;;  %v210_v13 = vld [vmem:[%s304_s1 + $0x8] sm:$0xff]  ;;  %v209_v14 = vld [vmem:[%s304_s1] sm:$0xff] }
   0x6   :  { %118 = vmatpush.bf16.msra.mxu0 %v215_v1  ;;  %v164_v15 = vld [vmem:[%s305_s0] sm:$0xf]  ;;  %v208_v16 = vld [vmem:[%s305_s0 + $0x4] sm:$0xf0] }
   0x7   :  { %v165_v17 = vor.u32 %v208_v16, %v164_v15  ;;  %v219_v19 = vld [vmem:[%s307_s3] sm:$0xff]  }
   0x8   :  { %v220_v23 = vunpack.c.l.bf16 %v219_v19  ;;  %v221_v31 = vunpack.c.h.bf16 %v219_v19 }
   0xa   :  { %119 = vmatpush.bf16.msra.mxu0 %v214_v8 }
   0xc   :  { %47 = vperm.xlu0 %223, %v39_v10  }
   0xe   :  { %120 = vmatpush.bf16.msra.mxu0 %v213_v9 }
  0x12   :  { %121 = vmatpush.bf16.msra.mxu0 %v212_v11 }
  0x16   :  { %122 = vmatpush.bf16.msra.mxu0 %v211_v12 }
  0x1a   :  { %123 = vmatpush.bf16.msra.mxu0 %v210_v13 }
  0x1e   :  { %124 = vmatpush.bf16.msra.mxu0 %v209_v14 }
  0x21   :  { %125 = vmatmul.bf16.vlgmr.msra.gmra.mxu0 %v165_v17 }
  0x76   :  { %v43_v18 = vpop.permute.xlu0 %42 }
  0x7e   :  { %v48_v27 = vpop.permute.xlu0 %47 }
  0x82   :  { %v140_v20 = vpop.f32.mrf.mxu1 }
  0x8a   :  { %v142_v32 = vpop.f32.mrf.mxu1 }
  0x9e   :  { %v126_v21 = vpop.f32.mrf.mxu0 }
  0x9f   :  { %v127_v22 = vadd.f32 %v126_v21, %v43_v18 }
  0xa1   :  { %v141_v24 = vadd.f32 %v140_v20, %v127_v22 }
  0xa3   :  { %v149_v25 = vadd.f32 %v220_v23, %v141_v24 }
  0xa5   :  { %v151_v26 = vmax.f32 %v149_v25, 0.0 }
  0xa6   :  { %v128_v28 = vpop.f32.mrf.mxu0 }
  0xa7   :  { %v153_v29 = vpack.c.bf16 %v151_v26, %v151_v26  ;;  %v129_v30 = vadd.f32 %v128_v28, %v48_v27 }
  0xa9   :  { %156 = vst.msk [vmem:[%s308_s4] sm:$0xf] %vm155_vm1, %v153_v29  ;;  %v143_v33 = vadd.f32 %v142_v32, %v129_v30 }
  0xab   :  { %v150_v34 = vadd.f32 %v221_v31, %v143_v33 }
  0xad   :  { %v152_v35 = vmax.f32 %v150_v34, 0.0 }
  0xaf   :  { %v154_v36 = vpack.c.bf16 %v152_v35, %v152_v35 }
  0xb1   :  { %157 = vst.msk [vmem:[%s308_s4 + $0x4] sm:$0xf] %vm155_vm1, %v154_v36 }

// kernel: _lambda_.31
= control target key start
LH: loop header
LB: loop body
LE: loop exit
PB: predicated region body
PF: predicated region fallthrough
CT: control target
= control target key end

     0   :  { %v211_v4 = vmov 0   ;;  %vm110_vm0 = vcmask 130048   ;;  %vm146_vm1 = vcmask 257024   ;;  %s283_s1 = inlined_call_operand.vmem [shape: bf16[144,32], index: 1, kind: input, shape index: {}]   ;;  %s284_s0 = inlined_call_operand.vmem [shape: bf16[16,144], index: 0, kind: input, shape index: {}]   ;;  %s285_s2 = inlined_call_operand.vmem [shape: f32[16,1], index: 2, kind: input, shape index: {}]   ;;  %s286_s3 = inlined_call_operand.vmem [shape: bf16[16,32], index: 3, kind: output, shape index: {}]  }
   0x1   :  { %v207_v0 = vld [vmem:[%s283_s1 + $0x38] sm:$0xff]  ;;  %v206_v1 = vld [vmem:[%s283_s1 + $0x30] sm:$0xff]  ;;  %v208_v2 = vld [vmem:[%s283_s1 + $0x40] sm:$0xff]  ;;  %210 = vset.pattern.permute.xlu0 %v211_v4 }
   0x2   :  { %114 = vmatpush.bf16.msra.mxu0 %v207_v0  ;;  %v198_v3 = vld [vmem:[%s284_s0 + $0x4] sm:$0xf]  ;;  %v157_v5 = vld [vmem:[%s284_s0 + $0x8] sm:$0xf0]  ;;  %135 = vmatpush.bf16.msra.mxu1 %v208_v2  ;;  %v203_v11 = vld [vmem:[%s283_s1 + $0x18] sm:$0xff] }
   0x3   :  { %v160_v6 = vor.u32 %v198_v3, %v157_v5  ;;  %v35_v7 = vld [vmem:[%s285_s2] sm:$0xff]  ;;  %v205_v8 = vld [vmem:[%s283_s1 + $0x28] sm:$0xff]  ;;  %v202_v12 = vld [vmem:[%s283_s1 + $0x10] sm:$0xff] }
   0x4   :  { %39 = vperm.xlu0 %210, %v35_v7   ;;  %v204_v9 = vld [vmem:[%s283_s1 + $0x20] sm:$0xff]  ;;  %v36_v10 = vld [vmem:[%s285_s2 + $0x8] sm:$0xff] }
   0x5   :  { %197 = vmatmul.msk.bf16.vlgmr.msra.gmra.mxu1 %vm110_vm0, %v160_v6  ;;  %v201_v13 = vld [vmem:[%s283_s1 + $0x8] sm:$0xff]  ;;  %v200_v14 = vld [vmem:[%s283_s1] sm:$0xff] }
   0x6   :  { %115 = vmatpush.bf16.msra.mxu0 %v206_v1  ;;  %v155_v15 = vld [vmem:[%s284_s0] sm:$0xf]  ;;  %v199_v16 = vld [vmem:[%s284_s0 + $0x4] sm:$0xf0] }
   0x7   :  { %v156_v17 = vor.u32 %v199_v16, %v155_v15 }
   0xa   :  { %116 = vmatpush.bf16.msra.mxu0 %v205_v8 }
   0xc   :  { %44 = vperm.xlu0 %210, %v36_v10  }
   0xe   :  { %117 = vmatpush.bf16.msra.mxu0 %v204_v9 }
  0x12   :  { %118 = vmatpush.bf16.msra.mxu0 %v203_v11 }
  0x16   :  { %119 = vmatpush.bf16.msra.mxu0 %v202_v12 }
  0x1a   :  { %120 = vmatpush.bf16.msra.mxu0 %v201_v13 }
  0x1e   :  { %121 = vmatpush.bf16.msra.mxu0 %v200_v14 }
  0x21   :  { %122 = vmatmul.bf16.vlgmr.msra.gmra.mxu0 %v156_v17 }
  0x76   :  { %v40_v18 = vpop.permute.xlu0 %39 }
  0x7e   :  { %v45_v25 = vpop.permute.xlu0 %44 }
  0x82   :  { %v137_v19 = vpop.f32.mrf.mxu1 }
  0x8a   :  { %v139_v28 = vpop.f32.mrf.mxu1 }
  0x9e   :  { %v123_v20 = vpop.f32.mrf.mxu0 }
  0x9f   :  { %v124_v21 = vadd.f32 %v123_v20, %v40_v18 }
  0xa1   :  { %v138_v22 = vadd.f32 %v137_v19, %v124_v21 }
  0xa3   :  { %v142_v23 = vmax.f32 %v138_v22, 0.0 }
  0xa5   :  { %v144_v24 = vpack.c.bf16 %v142_v23, %v142_v23 }
  0xa6   :  { %v125_v26 = vpop.f32.mrf.mxu0 }
  0xa7   :  { %147 = vst.msk [vmem:[%s286_s3] sm:$0xf] %vm146_vm1, %v144_v24  ;;  %v126_v27 = vadd.f32 %v125_v26, %v45_v25 }
  0xa9   :  { %v140_v29 = vadd.f32 %v139_v28, %v126_v27 }
  0xab   :  { %v143_v30 = vmax.f32 %v140_v29, 0.0 }
  0xad   :  { %v145_v31 = vpack.c.bf16 %v143_v30, %v143_v30 }
  0xaf   :  { %148 = vst.msk [vmem:[%s286_s3 + $0x4] sm:$0xf] %vm146_vm1, %v145_v31 }

// kernel: _lambda_.34
= control target key start
LH: loop header
LB: loop body
LE: loop exit
PB: predicated region body
PF: predicated region fallthrough
CT: control target
= control target key end

     0   :  { %v273_v6 = vmov 0   ;;  %vm133_vm0 = vcmask 130048   ;;  %vm186_vm1 = vcmask 60416   ;;  %s375_s1 = inlined_call_operand.vmem [shape: bf16[144,8], index: 1, kind: input, shape index: {}]   ;;  %s376_s0 = inlined_call_operand.vmem [shape: bf16[32,144], index: 0, kind: input, shape index: {}]   ;;  %s377_s2 = inlined_call_operand.vmem [shape: f32[32,1], index: 2, kind: input, shape index: {}]   ;;  %s378_s3 = inlined_call_operand.vmem [shape: bf16[32,8], index: 3, kind: output, shape index: {}]  }
   0x1   :  { %v260_v0 = vld [vmem:[%s375_s1 + $0x38] sm:$0xff]  ;;  %v261_v1 = vld [vmem:[%s375_s1 + $0x40] sm:$0xff]  ;;  %v259_v3 = vld [vmem:[%s375_s1 + $0x30] sm:$0xff]  ;;  %272 = vset.pattern.permute.xlu1 %v273_v6  ;;  %271 = vset.pattern.permute.xlu0 %v273_v6 }
   0x2   :  { %v249_v2 = vld [vmem:[%s376_s0 + $0x4] sm:$0xf]  ;;  %140 = vmatpush.bf16.msra.mxu0 %v260_v0  ;;  %262 = vmatpush.bf16.msra.mxu2 %v260_v0  ;;  %v199_v4 = vld [vmem:[%s376_s0 + $0x8] sm:$0xf0]  ;;  %v39_v7 = vld [vmem:[%s377_s2 + $0x10] sm:$0xff] }
   0x3   :  { %166 = vmatpush.bf16.msra.mxu1 %v261_v1  ;;  %v202_v5 = vor.u32 %v249_v2, %v199_v4  ;;  %v258_v8 = vld [vmem:[%s375_s1 + $0x28] sm:$0xff]  ;;  %v37_v9 = vld [vmem:[%s377_s2] sm:$0xff]  ;;  %53 = vperm.xlu1 %272, %v39_v7   ;;  %v40_v11 = vld [vmem:[%s377_s2 + $0x18] sm:$0xff] }
   0x4   :  { %43 = vperm.xlu0 %271, %v37_v9   ;;  %v257_v10 = vld [vmem:[%s375_s1 + $0x20] sm:$0xff]  ;;  %v38_v12 = vld [vmem:[%s377_s2 + $0x8] sm:$0xff]  ;;  %v256_v13 = vld [vmem:[%s375_s1 + $0x18] sm:$0xff] }
   0x5   :  { %v251_v14 = vld [vmem:[%s376_s0 + $0x14] sm:$0xf]  ;;  %v207_v15 = vld [vmem:[%s376_s0 + $0x18] sm:$0xf0]  ;;  %v254_v18 = vld [vmem:[%s375_s1 + $0x8] sm:$0xff] }
   0x6   :  { %141 = vmatpush.bf16.msra.mxu0 %v259_v3  ;;  %263 = vmatpush.bf16.msra.mxu2 %v259_v3  ;;  %v255_v16 = vld [vmem:[%s375_s1 + $0x10] sm:$0xff]  ;;  %v210_v17 = vor.u32 %v251_v14, %v207_v15  ;;  %v253_v19 = vld [vmem:[%s375_s1] sm:$0xff]  ;;  %v250_v21 = vld [vmem:[%s376_s0 + $0x4] sm:$0xf0] }
   0x7   :  { %247 = vmatmul.msk.bf16.vlgmr.msra.gmra.mxu1 %vm133_vm0, %v202_v5  ;;  %v197_v20 = vld [vmem:[%s376_s0] sm:$0xf]  ;;  %v205_v22 = vld [vmem:[%s376_s0 + $0x10] sm:$0xf]  ;;  %v252_v23 = vld [vmem:[%s376_s0 + $0x14] sm:$0xf0] }
   0x8   :  { %v198_v24 = vor.u32 %v250_v21, %v197_v20  ;;  %v206_v25 = vor.u32 %v252_v23, %v205_v22 }
   0xa   :  { %142 = vmatpush.bf16.msra.mxu0 %v258_v8  ;;  %264 = vmatpush.bf16.msra.mxu2 %v258_v8 }
   0xb   :  { %58 = vperm.xlu1 %272, %v40_v11  }
   0xc   :  { %48 = vperm.xlu0 %271, %v38_v12  }
   0xe   :  { %143 = vmatpush.bf16.msra.mxu0 %v257_v10  ;;  %265 = vmatpush.bf16.msra.mxu2 %v257_v10 }
  0x12   :  { %144 = vmatpush.bf16.msra.mxu0 %v256_v13  ;;  %266 = vmatpush.bf16.msra.mxu2 %v256_v13 }
  0x16   :  { %145 = vmatpush.bf16.msra.mxu0 %v255_v16  ;;  %267 = vmatpush.bf16.msra.mxu2 %v255_v16 }
  0x17   :  { %248 = vmatmul.msk.bf16.gmra.mxu1 %vm133_vm0, %v210_v17 }
  0x1a   :  { %146 = vmatpush.bf16.msra.mxu0 %v254_v18  ;;  %268 = vmatpush.bf16.msra.mxu2 %v254_v18 }
  0x1e   :  { %147 = vmatpush.bf16.msra.mxu0 %v253_v19  ;;  %269 = vmatpush.bf16.msra.mxu2 %v253_v19 }
  0x21   :  { %148 = vmatmul.bf16.vlgmr.msra.gmra.mxu0 %v198_v24  ;;  %153 = vmatmul.bf16.vlgmr.msra.gmra.mxu2 %v206_v25 }
  0x75   :  { %v54_v32 = vpop.permute.xlu1 %53 }
  0x76   :  { %v44_v28 = vpop.permute.xlu0 %43 }
  0x7d   :  { %v59_v46 = vpop.permute.xlu1 %58 }
  0x7e   :  { %v49_v38 = vpop.permute.xlu0 %48 }
  0x84   :  { %v168_v26 = vpop.f32.mrf.mxu1 }
  0x8c   :  { %v170_v27 = vpop.f32.mrf.mxu1 }
  0x94   :  { %v173_v34 = vpop.f32.mrf.mxu1 }
  0x9c   :  { %v175_v50 = vpop.f32.mrf.mxu1 }
  0x9e   :  { %v149_v29 = vpop.f32.mrf.mxu0 }
  0x9f   :  { %v150_v30 = vadd.f32 %v149_v29, %v44_v28 }
  0xa1   :  { %v169_v31 = vadd.f32 %v168_v26, %v150_v30 }
  0xa3   :  { %v178_v33 = vmax.f32 %v169_v31, 0.0 }
  0xa4   :  { %v154_v35 = vpop.f32.mrf.mxu2 }
  0xa5   :  { %v182_v36 = vpack.c.bf16 %v178_v33, %v178_v33  ;;  %v155_v37 = vadd.f32 %v154_v35, %v54_v32 }
  0xa6   :  { %v151_v39 = vpop.f32.mrf.mxu0 }
  0xa7   :  { %187 = vst.msk [vmem:[%s378_s3] sm:$0xf] %vm186_vm1, %v182_v36  ;;  %v174_v40 = vadd.f32 %v173_v34, %v155_v37  ;;  %v152_v41 = vadd.f32 %v151_v39, %v49_v38 }
  0xa9   :  { %v180_v42 = vmax.f32 %v174_v40, 0.0  ;;  %v171_v43 = vadd.f32 %v170_v27, %v152_v41 }
  0xab   :  { %v184_v44 = vpack.c.bf16 %v180_v42, %v180_v42  ;;  %v179_v45 = vmax.f32 %v171_v43, 0.0 }
  0xac   :  { %v156_v47 = vpop.f32.mrf.mxu2 }
  0xad   :  { %189 = vst.msk [vmem:[%s378_s3 + $0x8] sm:$0xf] %vm186_vm1, %v184_v44  ;;  %v183_v48 = vpack.c.bf16 %v179_v45, %v179_v45  ;;  %v157_v49 = vadd.f32 %v156_v47, %v59_v46 }
  0xaf   :  { %188 = vst.msk [vmem:[%s378_s3 + $0x4] sm:$0xf] %vm186_vm1, %v183_v48  ;;  %v176_v51 = vadd.f32 %v175_v50, %v157_v49 }
  0xb1   :  { %v181_v52 = vmax.f32 %v176_v51, 0.0 }
  0xb3   :  { %v185_v53 = vpack.c.bf16 %v181_v52, %v181_v52 }
  0xb5   :  { %190 = vst.msk [vmem:[%s378_s3 + $0xc] sm:$0xf] %vm186_vm1, %v185_v53 }

// kernel: _lambda_.33
= control target key start
LH: loop header
LB: loop body
LE: loop exit
PB: predicated region body
PF: predicated region fallthrough
CT: control target
= control target key end

     0   :  { %v121_v2 = vmov 0   ;;  %vm61_vm0 = vcmask 130048   ;;  %vm91_vm1 = vcmask 60416   ;;  %s175_s1 = inlined_call_operand.vmem [shape: bf16[16,8], index: 1, kind: input, shape index: {}]   ;;  %s176_s0 = inlined_call_operand.vmem [shape: bf16[32,16], index: 0, kind: input, shape index: {}]   ;;  %s177_s2 = inlined_call_operand.vmem [shape: f32[32,1], index: 2, kind: input, shape index: {}]   ;;  %s178_s3 = inlined_call_operand.vmem [shape: bf16[32,8], index: 3, kind: output, shape index: {}]  }
   0x1   :  { %v116_v0 = vld [vmem:[%s175_s1] sm:$0xff]  ;;  %120 = vset.pattern.permute.xlu1 %v121_v2  ;;  %119 = vset.pattern.permute.xlu0 %v121_v2  ;;  %v115_v3 = vld [vmem:[%s176_s0 + $0x8] sm:$0xff]  ;;  %v23_v4 = vld [vmem:[%s177_s2 + $0x10] sm:$0xff] }
   0x2   :  { %v114_v1 = vld [vmem:[%s176_s0] sm:$0xff]  ;;  %75 = vmatpush.bf16.msra.mxu0 %v116_v0  ;;  %117 = vmatpush.bf16.msra.mxu1 %v116_v0  ;;  %v24_v6 = vld [vmem:[%s177_s2 + $0x18] sm:$0xff]  ;;  %v22_v7 = vld [vmem:[%s177_s2 + $0x8] sm:$0xff] }
   0x3   :  { %v21_v5 = vld [vmem:[%s177_s2] sm:$0xff]  ;;  %37 = vperm.xlu1 %120, %v23_v4  }
   0x4   :  { %27 = vperm.xlu0 %119, %v21_v5  }
   0x5   :  { %112 = vmatmul.msk.bf16.vlgmr.msra.gmra.mxu0 %vm61_vm0, %v114_v1  ;;  %113 = vmatmul.msk.bf16.vlgmr.msra.gmra.mxu1 %vm61_vm0, %v115_v3 }
   0xb   :  { %42 = vperm.xlu1 %120, %v24_v6  }
   0xc   :  { %32 = vperm.xlu0 %119, %v22_v7  }
  0x75   :  { %v38_v8 = vpop.permute.xlu1 %37 }
  0x76   :  { %v28_v9 = vpop.permute.xlu0 %27 }
  0x7d   :  { %v43_v16 = vpop.permute.xlu1 %42 }
  0x7e   :  { %v33_v17 = vpop.permute.xlu0 %32 }
  0x82   :  { %v77_v10 = vpop.f32.mrf.mxu0  ;;  %v82_v11 = vpop.f32.mrf.mxu1 }
  0x83   :  { %v78_v12 = vadd.f32 %v77_v10, %v28_v9  ;;  %v83_v13 = vadd.f32 %v82_v11, %v38_v8 }
  0x85   :  { %v87_v14 = vpack.c.bf16 %v78_v12, %v78_v12  ;;  %v89_v15 = vpack.c.bf16 %v83_v13, %v83_v13 }
  0x87   :  { %92 = vst.msk [vmem:[%s178_s3] sm:$0xf] %vm91_vm1, %v87_v14 }
  0x88   :  { %94 = vst.msk [vmem:[%s178_s3 + $0x8] sm:$0xf] %vm91_vm1, %v89_v15 }
  0x8a   :  { %v79_v18 = vpop.f32.mrf.mxu0  ;;  %v84_v19 = vpop.f32.mrf.mxu1 }
  0x8b   :  { %v80_v20 = vadd.f32 %v79_v18, %v33_v17  ;;  %v85_v21 = vadd.f32 %v84_v19, %v43_v16 }
  0x8d   :  { %v88_v22 = vpack.c.bf16 %v80_v20, %v80_v20  ;;  %v90_v23 = vpack.c.bf16 %v85_v21, %v85_v21 }
  0x8f   :  { %93 = vst.msk [vmem:[%s178_s3 + $0x4] sm:$0xf] %vm91_vm1, %v88_v22 }
  0x90   :  { %95 = vst.msk [vmem:[%s178_s3 + $0xc] sm:$0xf] %vm91_vm1, %v90_v23 }

// kernel: _lambda_.35
= control target key start
LH: loop header
LB: loop body
LE: loop exit
PB: predicated region body
PF: predicated region fallthrough
CT: control target
= control target key end

     0   :  { %v459_v5 = vmov 0   ;;  %vm224_vm0 = vcmask 261120   ;;  %vm308_vm1 = vcmask 60416   ;;  %s611_s1 = inlined_call_operand.vmem [shape: bf16[288,8], index: 1, kind: input, shape index: {}]   ;;  %s612_s0 = inlined_call_operand.vmem [shape: bf16[32,288], index: 0, kind: input, shape index: {}]   ;;  %s613_s2 = inlined_call_operand.vmem [shape: f32[32,1], index: 2, kind: input, shape index: {}]   ;;  %s614_s3 = inlined_call_operand.vmem [shape: bf16[32,8], index: 3, kind: input, shape index: {}]   ;;  %s615_s4 = inlined_call_operand.vmem [shape: bf16[32,8], index: 4, kind: output, shape index: {}]  }
   0x1   :  { %v428_v0 = vld [vmem:[%s611_s1 + $0x38] sm:$0xff]  ;;  %v427_v2 = vld [vmem:[%s611_s1 + $0x30] sm:$0xff]  ;;  %v438_v3 = vld [vmem:[%s611_s1 + $0x88] sm:$0xff]  ;;  %457 = vset.pattern.permute.xlu0 %v459_v5  ;;  %458 = vset.pattern.permute.xlu1 %v459_v5 }
   0x2   :  { %v436_v1 = vld [vmem:[%s611_s1 + $0x78] sm:$0xff]  ;;  %231 = vmatpush.bf16.msra.mxu0 %v428_v0  ;;  %448 = vmatpush.bf16.msra.mxu3 %v428_v0  ;;  %v435_v4 = vld [vmem:[%s611_s1 + $0x70] sm:$0xff]  ;;  %v437_v6 = vld [vmem:[%s611_s1 + $0x80] sm:$0xff] }
   0x3   :  { %250 = vmatpush.bf16.msra.mxu1 %v436_v1  ;;  %275 = vmatpush.bf16.msra.mxu2 %v438_v3  ;;  %v327_v7 = vld [vmem:[%s612_s0 + $0x8] sm:$0xf]  ;;  %v417_v8 = vld [vmem:[%s612_s0 + $0x10] sm:$0xf0]  ;;  %v62_v12 = vld [vmem:[%s613_s2] sm:$0xff] }
   0x4   :  { %v426_v9 = vld [vmem:[%s611_s1 + $0x28] sm:$0xff]  ;;  %v328_v11 = vor.u32 %v417_v8, %v327_v7  ;;  %v425_v13 = vld [vmem:[%s611_s1 + $0x20] sm:$0xff]  ;;  %68 = vperm.xlu0 %457, %v62_v12   ;;  %v424_v15 = vld [vmem:[%s611_s1 + $0x18] sm:$0xff] }
   0x5   :  { %v434_v10 = vld [vmem:[%s611_s1 + $0x68] sm:$0xff]  ;;  %v433_v14 = vld [vmem:[%s611_s1 + $0x60] sm:$0xff]  ;;  %v432_v16 = vld [vmem:[%s611_s1 + $0x58] sm:$0xff] }
   0x6   :  { %232 = vmatpush.bf16.msra.mxu0 %v427_v2  ;;  %449 = vmatpush.bf16.msra.mxu3 %v427_v2  ;;  %v423_v17 = vld [vmem:[%s611_s1 + $0x10] sm:$0xff]  ;;  %v63_v19 = vld [vmem:[%s613_s2 + $0x8] sm:$0xff]  ;;  %v339_v21 = vld [vmem:[%s612_s0 + $0x20] sm:$0xf] }
   0x7   :  { %251 = vmatpush.bf16.msra.mxu1 %v435_v4  ;;  %276 = vmatpush.bf16.msra.mxu2 %v437_v6  ;;  %v64_v18 = vld [vmem:[%s613_s2 + $0x10] sm:$0xff]  ;;  %v420_v22 = vld [vmem:[%s612_s0 + $0x28] sm:$0xf0]  ;;  %v421_v26 = vld [vmem:[%s611_s1] sm:$0xff] }
   0x8   :  { %v431_v20 = vld [vmem:[%s611_s1 + $0x50] sm:$0xff]  ;;  %78 = vperm.xlu1 %458, %v64_v18   ;;  %v422_v23 = vld [vmem:[%s611_s1 + $0x8] sm:$0xff]  ;;  %v340_v25 = vor.u32 %v420_v22, %v339_v21  ;;  %v319_v27 = vld [vmem:[%s612_s0] sm:$0xf] }
   0x9   :  { %v430_v24 = vld [vmem:[%s611_s1 + $0x48] sm:$0xff]  ;;  %v65_v28 = vld [vmem:[%s613_s2 + $0x18] sm:$0xff]  ;;  %v419_v31 = vld [vmem:[%s612_s0 + $0x20] sm:$0xf0] }
   0xa   :  { %233 = vmatpush.bf16.msra.mxu0 %v426_v9  ;;  %450 = vmatpush.bf16.msra.mxu3 %v426_v9  ;;  %v416_v29 = vld [vmem:[%s612_s0 + $0x8] sm:$0xf0]  ;;  %v331_v30 = vld [vmem:[%s612_s0 + $0x18] sm:$0xf]  ;;  %v429_v32 = vld [vmem:[%s611_s1 + $0x40] sm:$0xff] }
   0xb   :  { %252 = vmatpush.bf16.msra.mxu1 %v434_v10  ;;  %413 = vmatmul.msk.bf16.vlgmr.msra.gmra.mxu2 %vm224_vm0, %v328_v11  ;;  %v415_v33 = vld [vmem:[%s612_s0 + $0x4] sm:$0xf]  ;;  %v321_v34 = vld [vmem:[%s612_s0 + $0xc] sm:$0xf0]  ;;  %v320_v35 = vor.u32 %v416_v29, %v319_v27  ;;  %v332_v36 = vor.u32 %v419_v31, %v331_v30  ;;  %v418_v38 = vld [vmem:[%s612_s0 + $0x1c] sm:$0xf] }
   0xc   :  { %73 = vperm.xlu0 %457, %v63_v19   ;;  %v324_v37 = vor.u32 %v415_v33, %v321_v34  ;;  %v333_v39 = vld [vmem:[%s612_s0 + $0x24] sm:$0xf0]  ;;  %v440_v44 = vld [vmem:[%s614_s3] sm:$0xff]  }
   0xd   :  { %v336_v40 = vor.u32 %v418_v38, %v333_v39  ;;  %v441_v48 = vunpack.c.l.bf16 %v440_v44  ;;  %v442_v61 = vunpack.c.h.bf16 %v440_v44  ;;  %v447_v1 = vld [vmem:[%s614_s3 + $0x8] sm:$0xff]  }
   0xe   :  { %234 = vmatpush.bf16.msra.mxu0 %v425_v13  ;;  %451 = vmatpush.bf16.msra.mxu3 %v425_v13  ;;  %v445_v6 = vunpack.c.l.bf16 %v447_v1 }
   0xf   :  { %253 = vmatpush.bf16.msra.mxu1 %v433_v14 }
  0x10   :  { %83 = vperm.xlu1 %458, %v65_v28  }
  0x12   :  { %235 = vmatpush.bf16.msra.mxu0 %v424_v15  ;;  %452 = vmatpush.bf16.msra.mxu3 %v424_v15 }
  0x13   :  { %254 = vmatpush.bf16.msra.mxu1 %v432_v16 }
  0x16   :  { %236 = vmatpush.bf16.msra.mxu0 %v423_v17  ;;  %453 = vmatpush.bf16.msra.mxu3 %v423_v17  ;;  %v446_v17 = vunpack.c.h.bf16 %v447_v1 }
  0x17   :  { %255 = vmatpush.bf16.msra.mxu1 %v431_v20 }
  0x1a   :  { %237 = vmatpush.bf16.msra.mxu0 %v422_v23  ;;  %454 = vmatpush.bf16.msra.mxu3 %v422_v23 }
  0x1b   :  { %256 = vmatpush.bf16.msra.mxu1 %v430_v24  ;;  %414 = vmatmul.msk.bf16.gmra.mxu2 %vm224_vm0, %v340_v25 }
  0x1e   :  { %238 = vmatpush.bf16.msra.mxu0 %v421_v26  ;;  %455 = vmatpush.bf16.msra.mxu3 %v421_v26 }
  0x1f   :  { %257 = vmatpush.bf16.msra.mxu1 %v429_v32 }
  0x21   :  { %239 = vmatmul.bf16.vlgmr.msra.gmra.mxu0 %v320_v35  ;;  %244 = vmatmul.bf16.vlgmr.msra.gmra.mxu3 %v332_v36 }
  0x22   :  { %258 = vmatmul.bf16.vlgmr.msra.gmra.mxu1 %v324_v37 }
  0x32   :  { %263 = vmatmul.bf16.gmra.mxu1 %v336_v40 }
  0x76   :  { %v69_v41 = vpop.permute.xlu0 %68 }
  0x7a   :  { %v79_v58 = vpop.permute.xlu1 %78 }
  0x7e   :  { %v74_v50 = vpop.permute.xlu0 %73 }
  0x82   :  { %v84_v9 = vpop.permute.xlu1 %83 }
  0x8e   :  { %v278_v42 = vpop.f32.mrf.mxu2 }
  0x96   :  { %v280_v52 = vpop.f32.mrf.mxu2 }
  0x9e   :  { %v240_v43 = vpop.f32.mrf.mxu0  ;;  %v283_v3 = vpop.f32.mrf.mxu2 }
  0x9f   :  { %v241_v45 = vadd.f32 %v240_v43, %v69_v41  ;;  %v259_v46 = vpop.f32.mrf.mxu1 }
  0xa1   :  { %v260_v47 = vadd.f32 %v259_v46, %v241_v45 }
  0xa3   :  { %v279_v49 = vadd.f32 %v278_v42, %v260_v47 }
  0xa4   :  { %v245_v59 = vpop.f32.mrf.mxu3 }
  0xa5   :  { %v296_v51 = vadd.f32 %v441_v48, %v279_v49  ;;  %v246_v63 = vadd.f32 %v245_v59, %v79_v58 }
  0xa6   :  { %v242_v53 = vpop.f32.mrf.mxu0  ;;  %v285_v18 = vpop.f32.mrf.mxu2 }
  0xa7   :  { %v300_v54 = vmax.f32 %v296_v51, 0.0  ;;  %v243_v55 = vadd.f32 %v242_v53, %v74_v50  ;;  %v261_v56 = vpop.f32.mrf.mxu1 }
  0xa9   :  { %v304_v57 = vpack.c.bf16 %v300_v54, %v300_v54  ;;  %v262_v60 = vadd.f32 %v261_v56, %v243_v55 }
  0xab   :  { %309 = vst.msk [vmem:[%s615_s4] sm:$0xf] %vm308_vm1, %v304_v57  ;;  %v281_v62 = vadd.f32 %v280_v52, %v262_v60 }
  0xac   :  { %v247_v10 = vpop.f32.mrf.mxu3 }
  0xad   :  { %v297_v0 = vadd.f32 %v442_v61, %v281_v62  ;;  %v248_v12 = vadd.f32 %v247_v10, %v84_v9 }
  0xaf   :  { %v301_v2 = vmax.f32 %v297_v0, 0.0  ;;  %v264_v4 = vpop.f32.mrf.mxu1 }
  0xb0   :  { %v265_v5 = vadd.f32 %v264_v4, %v246_v63 }
  0xb1   :  { %v305_v7 = vpack.c.bf16 %v301_v2, %v301_v2 }
  0xb2   :  { %v284_v8 = vadd.f32 %v283_v3, %v265_v5 }
  0xb3   :  { %310 = vst.msk [vmem:[%s615_s4 + $0x4] sm:$0xf] %vm308_vm1, %v305_v7 }
  0xb4   :  { %v298_v11 = vadd.f32 %v445_v6, %v284_v8 }
  0xb6   :  { %v302_v13 = vmax.f32 %v298_v11, 0.0 }
  0xb7   :  { %v266_v14 = vpop.f32.mrf.mxu1 }
  0xb8   :  { %v306_v15 = vpack.c.bf16 %v302_v13, %v302_v13  ;;  %v267_v16 = vadd.f32 %v266_v14, %v248_v12 }
  0xba   :  { %311 = vst.msk [vmem:[%s615_s4 + $0x8] sm:$0xf] %vm308_vm1, %v306_v15  ;;  %v286_v19 = vadd.f32 %v285_v18, %v267_v16 }
  0xbc   :  { %v299_v20 = vadd.f32 %v446_v17, %v286_v19 }
  0xbe   :  { %v303_v21 = vmax.f32 %v299_v20, 0.0 }
  0xc0   :  { %v307_v22 = vpack.c.bf16 %v303_v21, %v303_v21 }
  0xc2   :  { %312 = vst.msk [vmem:[%s615_s4 + $0xc] sm:$0xf] %vm308_vm1, %v307_v22 }

// kernel: _lambda_.36
= control target key start
LH: loop header
LB: loop body
LE: loop exit
PB: predicated region body
PF: predicated region fallthrough
CT: control target
= control target key end

     0   :  { %v435_v5 = vmov 0   ;;  %vm221_vm0 = vcmask 261120   ;;  %vm293_vm1 = vcmask 60416   ;;  %s576_s1 = inlined_call_operand.vmem [shape: bf16[288,8], index: 1, kind: input, shape index: {}]   ;;  %s577_s0 = inlined_call_operand.vmem [shape: bf16[32,288], index: 0, kind: input, shape index: {}]   ;;  %s578_s2 = inlined_call_operand.vmem [shape: f32[32,1], index: 2, kind: input, shape index: {}]   ;;  %s579_s3 = inlined_call_operand.vmem [shape: bf16[32,8], index: 3, kind: output, shape index: {}]  }
   0x1   :  { %v413_v0 = vld [vmem:[%s576_s1 + $0x38] sm:$0xff]  ;;  %v412_v2 = vld [vmem:[%s576_s1 + $0x30] sm:$0xff]  ;;  %v423_v3 = vld [vmem:[%s576_s1 + $0x88] sm:$0xff]  ;;  %433 = vset.pattern.permute.xlu0 %v435_v5  ;;  %434 = vset.pattern.permute.xlu1 %v435_v5 }
   0x2   :  { %v421_v1 = vld [vmem:[%s576_s1 + $0x78] sm:$0xff]  ;;  %228 = vmatpush.bf16.msra.mxu0 %v413_v0  ;;  %424 = vmatpush.bf16.msra.mxu3 %v413_v0  ;;  %v420_v4 = vld [vmem:[%s576_s1 + $0x70] sm:$0xff]  ;;  %v422_v6 = vld [vmem:[%s576_s1 + $0x80] sm:$0xff] }
   0x3   :  { %247 = vmatpush.bf16.msra.mxu1 %v421_v1  ;;  %272 = vmatpush.bf16.msra.mxu2 %v423_v3  ;;  %v312_v7 = vld [vmem:[%s577_s0 + $0x8] sm:$0xf]  ;;  %v402_v8 = vld [vmem:[%s577_s0 + $0x10] sm:$0xf0]  ;;  %v59_v12 = vld [vmem:[%s578_s2] sm:$0xff] }
   0x4   :  { %v411_v9 = vld [vmem:[%s576_s1 + $0x28] sm:$0xff]  ;;  %v313_v11 = vor.u32 %v402_v8, %v312_v7  ;;  %v410_v13 = vld [vmem:[%s576_s1 + $0x20] sm:$0xff]  ;;  %65 = vperm.xlu0 %433, %v59_v12   ;;  %v409_v15 = vld [vmem:[%s576_s1 + $0x18] sm:$0xff] }
   0x5   :  { %v419_v10 = vld [vmem:[%s576_s1 + $0x68] sm:$0xff]  ;;  %v418_v14 = vld [vmem:[%s576_s1 + $0x60] sm:$0xff]  ;;  %v417_v16 = vld [vmem:[%s576_s1 + $0x58] sm:$0xff] }
   0x6   :  { %229 = vmatpush.bf16.msra.mxu0 %v412_v2  ;;  %425 = vmatpush.bf16.msra.mxu3 %v412_v2  ;;  %v408_v17 = vld [vmem:[%s576_s1 + $0x10] sm:$0xff]  ;;  %v60_v19 = vld [vmem:[%s578_s2 + $0x8] sm:$0xff]  ;;  %v324_v21 = vld [vmem:[%s577_s0 + $0x20] sm:$0xf] }
   0x7   :  { %248 = vmatpush.bf16.msra.mxu1 %v420_v4  ;;  %273 = vmatpush.bf16.msra.mxu2 %v422_v6  ;;  %v61_v18 = vld [vmem:[%s578_s2 + $0x10] sm:$0xff]  ;;  %v405_v22 = vld [vmem:[%s577_s0 + $0x28] sm:$0xf0]  ;;  %v406_v26 = vld [vmem:[%s576_s1] sm:$0xff] }
   0x8   :  { %v416_v20 = vld [vmem:[%s576_s1 + $0x50] sm:$0xff]  ;;  %75 = vperm.xlu1 %434, %v61_v18   ;;  %v407_v23 = vld [vmem:[%s576_s1 + $0x8] sm:$0xff]  ;;  %v325_v25 = vor.u32 %v405_v22, %v324_v21  ;;  %v304_v27 = vld [vmem:[%s577_s0] sm:$0xf] }
   0x9   :  { %v415_v24 = vld [vmem:[%s576_s1 + $0x48] sm:$0xff]  ;;  %v62_v28 = vld [vmem:[%s578_s2 + $0x18] sm:$0xff]  ;;  %v404_v31 = vld [vmem:[%s577_s0 + $0x20] sm:$0xf0] }
   0xa   :  { %230 = vmatpush.bf16.msra.mxu0 %v411_v9  ;;  %426 = vmatpush.bf16.msra.mxu3 %v411_v9  ;;  %v401_v29 = vld [vmem:[%s577_s0 + $0x8] sm:$0xf0]  ;;  %v316_v30 = vld [vmem:[%s577_s0 + $0x18] sm:$0xf]  ;;  %v414_v32 = vld [vmem:[%s576_s1 + $0x40] sm:$0xff] }
   0xb   :  { %249 = vmatpush.bf16.msra.mxu1 %v419_v10  ;;  %398 = vmatmul.msk.bf16.vlgmr.msra.gmra.mxu2 %vm221_vm0, %v313_v11  ;;  %v400_v33 = vld [vmem:[%s577_s0 + $0x4] sm:$0xf]  ;;  %v306_v34 = vld [vmem:[%s577_s0 + $0xc] sm:$0xf0]  ;;  %v305_v35 = vor.u32 %v401_v29, %v304_v27  ;;  %v317_v36 = vor.u32 %v404_v31, %v316_v30  ;;  %v403_v38 = vld [vmem:[%s577_s0 + $0x1c] sm:$0xf] }
   0xc   :  { %70 = vperm.xlu0 %433, %v60_v19   ;;  %v309_v37 = vor.u32 %v400_v33, %v306_v34  ;;  %v318_v39 = vld [vmem:[%s577_s0 + $0x24] sm:$0xf0] }
   0xd   :  { %v321_v40 = vor.u32 %v403_v38, %v318_v39 }
   0xe   :  { %231 = vmatpush.bf16.msra.mxu0 %v410_v13  ;;  %427 = vmatpush.bf16.msra.mxu3 %v410_v13 }
   0xf   :  { %250 = vmatpush.bf16.msra.mxu1 %v418_v14 }
  0x10   :  { %80 = vperm.xlu1 %434, %v62_v28  }
  0x12   :  { %232 = vmatpush.bf16.msra.mxu0 %v409_v15  ;;  %428 = vmatpush.bf16.msra.mxu3 %v409_v15 }
  0x13   :  { %251 = vmatpush.bf16.msra.mxu1 %v417_v16 }
  0x16   :  { %233 = vmatpush.bf16.msra.mxu0 %v408_v17  ;;  %429 = vmatpush.bf16.msra.mxu3 %v408_v17 }
  0x17   :  { %252 = vmatpush.bf16.msra.mxu1 %v416_v20 }
  0x1a   :  { %234 = vmatpush.bf16.msra.mxu0 %v407_v23  ;;  %430 = vmatpush.bf16.msra.mxu3 %v407_v23 }
  0x1b   :  { %253 = vmatpush.bf16.msra.mxu1 %v415_v24  ;;  %399 = vmatmul.msk.bf16.gmra.mxu2 %vm221_vm0, %v325_v25 }
  0x1e   :  { %235 = vmatpush.bf16.msra.mxu0 %v406_v26  ;;  %431 = vmatpush.bf16.msra.mxu3 %v406_v26 }
  0x1f   :  { %254 = vmatpush.bf16.msra.mxu1 %v414_v32 }
  0x21   :  { %236 = vmatmul.bf16.vlgmr.msra.gmra.mxu0 %v305_v35  ;;  %241 = vmatmul.bf16.vlgmr.msra.gmra.mxu3 %v317_v36 }
  0x22   :  { %255 = vmatmul.bf16.vlgmr.msra.gmra.mxu1 %v309_v37 }
  0x32   :  { %260 = vmatmul.bf16.gmra.mxu1 %v321_v40 }
  0x76   :  { %v66_v41 = vpop.permute.xlu0 %65 }
  0x7a   :  { %v76_v55 = vpop.permute.xlu1 %75 }
  0x7e   :  { %v71_v48 = vpop.permute.xlu0 %70 }
  0x82   :  { %v81_v2 = vpop.permute.xlu1 %80 }
  0x8e   :  { %v275_v42 = vpop.f32.mrf.mxu2 }
  0x96   :  { %v277_v50 = vpop.f32.mrf.mxu2 }
  0x9e   :  { %v237_v43 = vpop.f32.mrf.mxu0  ;;  %v280_v62 = vpop.f32.mrf.mxu2 }
  0x9f   :  { %v238_v44 = vadd.f32 %v237_v43, %v66_v41  ;;  %v256_v45 = vpop.f32.mrf.mxu1 }
  0xa1   :  { %v257_v46 = vadd.f32 %v256_v45, %v238_v44 }
  0xa3   :  { %v276_v47 = vadd.f32 %v275_v42, %v257_v46 }
  0xa4   :  { %v242_v56 = vpop.f32.mrf.mxu3 }
  0xa5   :  { %v285_v49 = vmax.f32 %v276_v47, 0.0  ;;  %v243_v59 = vadd.f32 %v242_v56, %v76_v55 }
  0xa6   :  { %v239_v51 = vpop.f32.mrf.mxu0  ;;  %v282_v9 = vpop.f32.mrf.mxu2 }
  0xa7   :  { %v289_v52 = vpack.c.bf16 %v285_v49, %v285_v49  ;;  %v240_v53 = vadd.f32 %v239_v51, %v71_v48  ;;  %v258_v54 = vpop.f32.mrf.mxu1 }
  0xa9   :  { %294 = vst.msk [vmem:[%s579_s3] sm:$0xf] %vm293_vm1, %v289_v52  ;;  %v259_v57 = vadd.f32 %v258_v54, %v240_v53 }
  0xab   :  { %v278_v58 = vadd.f32 %v277_v50, %v259_v57 }
  0xac   :  { %v244_v3 = vpop.f32.mrf.mxu3 }
  0xad   :  { %v286_v60 = vmax.f32 %v278_v58, 0.0  ;;  %v245_v5 = vadd.f32 %v244_v3, %v81_v2 }
  0xaf   :  { %v290_v61 = vpack.c.bf16 %v286_v60, %v286_v60  ;;  %v261_v63 = vpop.f32.mrf.mxu1 }
  0xb0   :  { %v262_v0 = vadd.f32 %v261_v63, %v243_v59 }
  0xb1   :  { %295 = vst.msk [vmem:[%s579_s3 + $0x4] sm:$0xf] %vm293_vm1, %v290_v61 }
  0xb2   :  { %v281_v1 = vadd.f32 %v280_v62, %v262_v0 }
  0xb4   :  { %v287_v4 = vmax.f32 %v281_v1, 0.0 }
  0xb6   :  { %v291_v6 = vpack.c.bf16 %v287_v4, %v287_v4 }
  0xb7   :  { %v263_v7 = vpop.f32.mrf.mxu1 }
  0xb8   :  { %296 = vst.msk [vmem:[%s579_s3 + $0x8] sm:$0xf] %vm293_vm1, %v291_v6  ;;  %v264_v8 = vadd.f32 %v263_v7, %v245_v5 }
  0xba   :  { %v283_v10 = vadd.f32 %v282_v9, %v264_v8 }
  0xbc   :  { %v288_v11 = vmax.f32 %v283_v10, 0.0 }
  0xbe   :  { %v292_v12 = vpack.c.bf16 %v288_v11, %v288_v11 }
  0xc0   :  { %297 = vst.msk [vmem:[%s579_s3 + $0xc] sm:$0xf] %vm293_vm1, %v292_v12 }

// kernel: _lambda_.39
= control target key start
LH: loop header
LB: loop body
LE: loop exit
PB: predicated region body
PF: predicated region fallthrough
CT: control target
= control target key end

     0   :  { %vm283_vm0 = vcmask 261120   ;;  %v586_v15 = vmov 0   ;;  %vm399_vm1 = vcmask 11264   ;;  %s813_s1 = inlined_call_operand.vmem [shape: bf16[288,2], index: 1, kind: input, shape index: {}]   ;;  %s814_s0 = inlined_call_operand.vmem [shape: bf16[64,288], index: 0, kind: input, shape index: {}]   ;;  %s815_s2 = inlined_call_operand.vmem [shape: f32[64,1], index: 2, kind: input, shape index: {}]   ;;  %s816_s3 = inlined_call_operand.vmem [shape: bf16[64,2], index: 3, kind: output, shape index: {}]  }
   0x1   :  { %v555_v0 = vld [vmem:[%s813_s1 + $0x38] sm:$0xff]  ;;  %v565_v2 = vld [vmem:[%s813_s1 + $0x88] sm:$0xff]  ;;  %v554_v3 = vld [vmem:[%s813_s1 + $0x30] sm:$0xff]  ;;  %584 = vset.pattern.permute.xlu1 %v586_v15  ;;  %583 = vset.pattern.permute.xlu0 %v586_v15 }
   0x2   :  { %v613_v1 = vld [vmem:[%s813_s1 + $0x78] sm:$0xff]  ;;  %296 = vmatpush.bf16.msra.mxu0 %v555_v0  ;;  %566 = vmatpush.bf16.msra.mxu3 %v555_v0  ;;  %v625_v4 = vld [vmem:[%s813_s1 + $0x70] sm:$0xff]  ;;  %v564_v5 = vld [vmem:[%s813_s1 + $0x80] sm:$0xff] }
   0x3   :  { %574 = vmatpush.bf16.msra.mxu1 %v613_v1  ;;  %360 = vmatpush.bf16.msra.mxu2 %v565_v2  ;;  %v422_v6 = vld [vmem:[%s814_s0 + $0x8] sm:$0xf]  ;;  %v538_v7 = vld [vmem:[%s814_s0 + $0x10] sm:$0xf0]  ;;  %v552_v11 = vld [vmem:[%s813_s1 + $0x20] sm:$0xff] }
   0x4   :  { %v553_v8 = vld [vmem:[%s813_s1 + $0x28] sm:$0xff]  ;;  %v423_v10 = vor.u32 %v538_v7, %v422_v6  ;;  %v653_v12 = vld [vmem:[%s813_s1 + $0x60] sm:$0xff]  ;;  %v551_v13 = vld [vmem:[%s813_s1 + $0x18] sm:$0xff]  ;;  %585 = vset.pattern.permute.xlu2 %v586_v15 }
   0x5   :  { %v643_v9 = vld [vmem:[%s813_s1 + $0x68] sm:$0xff]  ;;  %v662_v14 = vld [vmem:[%s813_s1 + $0x58] sm:$0xff]  ;;  %v550_v16 = vld [vmem:[%s813_s1 + $0x10] sm:$0xff] }
   0x6   :  { %297 = vmatpush.bf16.msra.mxu0 %v554_v3  ;;  %567 = vmatpush.bf16.msra.mxu3 %v554_v3  ;;  %v69_v17 = vld [vmem:[%s815_s2 + $0x10] sm:$0xff]  ;;  %v434_v19 = vld [vmem:[%s814_s0 + $0x20] sm:$0xf]  ;;  %v541_v20 = vld [vmem:[%s814_s0 + $0x28] sm:$0xf0] }
   0x7   :  { %575 = vmatpush.bf16.msra.mxu1 %v625_v4  ;;  %361 = vmatpush.bf16.msra.mxu2 %v564_v5  ;;  %v558_v18 = vld [vmem:[%s813_s1 + $0x50] sm:$0xff]  ;;  %v549_v21 = vld [vmem:[%s813_s1 + $0x8] sm:$0xff]  ;;  %v435_v23 = vor.u32 %v541_v20, %v434_v19  ;;  %v67_v24 = vld [vmem:[%s815_s2] sm:$0xff] }
   0x8   :  { %87 = vperm.xlu1 %584, %v69_v17   ;;  %v557_v22 = vld [vmem:[%s813_s1 + $0x48] sm:$0xff]  ;;  %77 = vperm.xlu0 %583, %v67_v24   ;;  %v548_v25 = vld [vmem:[%s813_s1] sm:$0xff]  ;;  %v426_v26 = vld [vmem:[%s814_s0 + $0x18] sm:$0xf] }
   0x9   :  { %v70_v27 = vld [vmem:[%s815_s2 + $0x18] sm:$0xff]  ;;  %v540_v28 = vld [vmem:[%s814_s0 + $0x20] sm:$0xf0]  ;;  %v414_v29 = vld [vmem:[%s814_s0] sm:$0xf] }
   0xa   :  { %298 = vmatpush.bf16.msra.mxu0 %v553_v8  ;;  %568 = vmatpush.bf16.msra.mxu3 %v553_v8  ;;  %v537_v30 = vld [vmem:[%s814_s0 + $0x8] sm:$0xf0]  ;;  %v556_v31 = vld [vmem:[%s813_s1 + $0x40] sm:$0xff]  ;;  %v539_v32 = vld [vmem:[%s814_s0 + $0x1c] sm:$0xf]  ;;  %v427_v34 = vor.u32 %v540_v28, %v426_v26 }
   0xb   :  { %576 = vmatpush.bf16.msra.mxu1 %v643_v9  ;;  %532 = vmatmul.msk.bf16.vlgmr.msra.gmra.mxu2 %vm283_vm0, %v423_v10  ;;  %v428_v33 = vld [vmem:[%s814_s0 + $0x24] sm:$0xf0]  ;;  %v415_v35 = vor.u32 %v537_v30, %v414_v29  ;;  %v74_v38 = vld [vmem:[%s815_s2 + $0x38] sm:$0xff]  ;;  %v71_v39 = vld [vmem:[%s815_s2 + $0x20] sm:$0xff] }
   0xc   :  { %v431_v36 = vor.u32 %v539_v32, %v428_v33  ;;  %v68_v37 = vld [vmem:[%s815_s2 + $0x8] sm:$0xff]  ;;  %v446_v40 = vld [vmem:[%s814_s0 + $0x38] sm:$0xf]  ;;  %v544_v41 = vld [vmem:[%s814_s0 + $0x40] sm:$0xf0]  ;;  %97 = vperm.xlu2 %585, %v71_v39  }
   0xd   :  { %v447_v42 = vor.u32 %v544_v41, %v446_v40  ;;  %v73_v43 = vld [vmem:[%s815_s2 + $0x30] sm:$0xff]  ;;  %v72_v44 = vld [vmem:[%s815_s2 + $0x28] sm:$0xff]  ;;  %v543_v46 = vld [vmem:[%s814_s0 + $0x38] sm:$0xf0] }
   0xe   :  { %299 = vmatpush.bf16.msra.mxu0 %v552_v11  ;;  %569 = vmatpush.bf16.msra.mxu3 %v552_v11  ;;  %v438_v45 = vld [vmem:[%s814_s0 + $0x30] sm:$0xf]  ;;  %v542_v47 = vld [vmem:[%s814_s0 + $0x34] sm:$0xf]  ;;  %v440_v48 = vld [vmem:[%s814_s0 + $0x3c] sm:$0xf0] }
   0xf   :  { %577 = vmatpush.bf16.msra.mxu1 %v653_v12  ;;  %v439_v49 = vor.u32 %v543_v46, %v438_v45  ;;  %v443_v50 = vor.u32 %v542_v47, %v440_v48  ;;  %v458_v51 = vld [vmem:[%s814_s0 + $0x50] sm:$0xf]  ;;  %v547_v52 = vld [vmem:[%s814_s0 + $0x58] sm:$0xf0]  ;;  %v536_v54 = vld [vmem:[%s814_s0 + $0x4] sm:$0xf] }
  0x10   :  { %92 = vperm.xlu1 %584, %v70_v27   ;;  %82 = vperm.xlu0 %583, %v68_v37   ;;  %v459_v53 = vor.u32 %v547_v52, %v458_v51  ;;  %v416_v55 = vld [vmem:[%s814_s0 + $0xc] sm:$0xf0]  ;;  %v450_v57 = vld [vmem:[%s814_s0 + $0x48] sm:$0xf]  ;;  %v546_v58 = vld [vmem:[%s814_s0 + $0x50] sm:$0xf0] }
  0x11   :  { %v419_v56 = vor.u32 %v536_v54, %v416_v55  ;;  %v545_v59 = vld [vmem:[%s814_s0 + $0x4c] sm:$0xf]  ;;  %v452_v60 = vld [vmem:[%s814_s0 + $0x54] sm:$0xf0]  ;;  %v451_v61 = vor.u32 %v546_v58, %v450_v57 }
  0x12   :  { %300 = vmatpush.bf16.msra.mxu0 %v551_v13  ;;  %570 = vmatpush.bf16.msra.mxu3 %v551_v13  ;;  %v455_v62 = vor.u32 %v545_v59, %v452_v60 }
  0x13   :  { %578 = vmatpush.bf16.msra.mxu1 %v662_v14 }
  0x14   :  { %102 = vperm.xlu2 %585, %v72_v44  }
  0x16   :  { %301 = vmatpush.bf16.msra.mxu0 %v550_v16  ;;  %571 = vmatpush.bf16.msra.mxu3 %v550_v16 }
  0x17   :  { %579 = vmatpush.bf16.msra.mxu1 %v558_v18 }
  0x18   :  { %112 = vperm.xlu1 %584, %v74_v38   ;;  %107 = vperm.xlu0 %583, %v73_v43  }
  0x1a   :  { %302 = vmatpush.bf16.msra.mxu0 %v549_v21  ;;  %572 = vmatpush.bf16.msra.mxu3 %v549_v21 }
  0x1b   :  { %580 = vmatpush.bf16.msra.mxu1 %v557_v22  ;;  %533 = vmatmul.msk.bf16.gmra.mxu2 %vm283_vm0, %v435_v23 }
  0x1e   :  { %303 = vmatpush.bf16.msra.mxu0 %v548_v25  ;;  %573 = vmatpush.bf16.msra.mxu3 %v548_v25 }
  0x1f   :  { %581 = vmatpush.bf16.msra.mxu1 %v556_v31 }
  0x21   :  { %309 = vmatmul.bf16.vlgmr.msra.gmra.mxu3 %v427_v34  ;;  %304 = vmatmul.bf16.vlgmr.msra.gmra.mxu0 %v415_v35 }
  0x22   :  { %325 = vmatpush.bf16.msrb.mxu0 %v613_v1  ;;  %338 = vmatmul.bf16.vlgmr.msra.gmra.mxu1 %v431_v36 }
  0x26   :  { %326 = vmatpush.bf16.msrb.mxu0 %v625_v4 }
  0x2a   :  { %327 = vmatpush.bf16.msrb.mxu0 %v643_v9 }
  0x2b   :  { %534 = vmatmul.msk.bf16.gmra.mxu2 %vm283_vm0, %v447_v42 }
  0x2e   :  { %328 = vmatpush.bf16.msrb.mxu0 %v653_v12 }
  0x31   :  { %314 = vmatmul.bf16.gmra.mxu3 %v439_v49 }
  0x32   :  { %329 = vmatpush.bf16.msrb.mxu0 %v662_v14  ;;  %343 = vmatmul.bf16.gmra.mxu1 %v443_v50 }
  0x36   :  { %330 = vmatpush.bf16.msrb.mxu0 %v558_v18 }
  0x3a   :  { %331 = vmatpush.bf16.msrb.mxu0 %v557_v22 }
  0x3b   :  { %535 = vmatmul.msk.bf16.gmra.mxu2 %vm283_vm0, %v459_v53 }
  0x3e   :  { %332 = vmatpush.bf16.msrb.mxu0 %v556_v31 }
  0x41   :  { %333 = vmatmul.bf16.vlgmr.msrb.gmra.mxu0 %v419_v56  ;;  %319 = vmatmul.bf16.gmra.mxu3 %v451_v61 }
  0x42   :  { %348 = vmatmul.bf16.gmra.mxu1 %v455_v62 }
  0x66   :  { %v98_v19 = vpop.permute.xlu2 %97 }
  0x6e   :  { %v103_v32 = vpop.permute.xlu2 %102 }
  0x7a   :  { %v88_v3 = vpop.permute.xlu1 %87  ;;  %v78_v16 = vpop.permute.xlu0 %77 }
  0x82   :  { %v93_v11 = vpop.permute.xlu1 %92  ;;  %v83_v28 = vpop.permute.xlu0 %82 }
  0x8a   :  { %v108_v46 = vpop.permute.xlu0 %107  ;;  %v113_v61 = vpop.permute.xlu1 %112 }
  0x8e   :  { %v363_v63 = vpop.f32.mrf.mxu2 }
  0x96   :  { %v365_v0 = vpop.f32.mrf.mxu2 }
  0x9e   :  { %v368_v1 = vpop.f32.mrf.mxu2  ;;  %v305_v8 = vpop.f32.mrf.mxu0 }
  0x9f   :  { %v339_v2 = vpop.f32.mrf.mxu1  ;;  %v306_v30 = vadd.f32 %v305_v8, %v78_v16 }
  0xa4   :  { %v310_v4 = vpop.f32.mrf.mxu3 }
  0xa5   :  { %v311_v5 = vadd.f32 %v310_v4, %v88_v3 }
  0xa6   :  { %v370_v9 = vpop.f32.mrf.mxu2  ;;  %v307_v21 = vpop.f32.mrf.mxu0 }
  0xa7   :  { %v340_v6 = vadd.f32 %v339_v2, %v311_v5  ;;  %v341_v7 = vpop.f32.mrf.mxu1  ;;  %v308_v44 = vadd.f32 %v307_v21, %v83_v28 }
  0xa9   :  { %v369_v10 = vadd.f32 %v368_v1, %v340_v6 }
  0xab   :  { %v385_v12 = vmax.f32 %v369_v10, 0.0 }
  0xac   :  { %v312_v13 = vpop.f32.mrf.mxu3 }
  0xad   :  { %v393_v14 = vpack.c.bf16 %v385_v12, %v385_v12  ;;  %v313_v15 = vadd.f32 %v312_v13, %v93_v11 }
  0xae   :  { %v373_v22 = vpop.f32.mrf.mxu2 }
  0xaf   :  { %402 = vst.msk [vmem:[%s816_s3 + $0x8] sm:$0xf] %vm399_vm1, %v393_v14  ;;  %v342_v17 = vadd.f32 %v341_v7, %v313_v15  ;;  %v344_v18 = vpop.f32.mrf.mxu1 }
  0xb1   :  { %v371_v20 = vadd.f32 %v370_v9, %v342_v17 }
  0xb3   :  { %v386_v23 = vmax.f32 %v371_v20, 0.0 }
  0xb4   :  { %v315_v24 = vpop.f32.mrf.mxu3 }
  0xb5   :  { %v394_v25 = vpack.c.bf16 %v386_v23, %v386_v23  ;;  %v316_v26 = vadd.f32 %v315_v24, %v98_v19 }
  0xb6   :  { %v375_v35 = vpop.f32.mrf.mxu2 }
  0xb7   :  { %403 = vst.msk [vmem:[%s816_s3 + $0xc] sm:$0xf] %vm399_vm1, %v394_v25  ;;  %v345_v27 = vadd.f32 %v344_v18, %v316_v26  ;;  %v346_v31 = vpop.f32.mrf.mxu1 }
  0xb9   :  { %v374_v29 = vadd.f32 %v373_v22, %v345_v27 }
  0xbb   :  { %v387_v33 = vmax.f32 %v374_v29, 0.0 }
  0xbc   :  { %v317_v37 = vpop.f32.mrf.mxu3 }
  0xbd   :  { %v395_v38 = vpack.c.bf16 %v387_v33, %v387_v33  ;;  %v318_v39 = vadd.f32 %v317_v37, %v103_v32 }
  0xbe   :  { %v334_v34 = vpop.f32.mrf.mxu0  ;;  %v378_v54 = vpop.f32.mrf.mxu2 }
  0xbf   :  { %v335_v36 = vadd.f32 %v334_v34, %v306_v30  ;;  %404 = vst.msk [vmem:[%s816_s3 + $0x10] sm:$0xf] %vm399_vm1, %v395_v38  ;;  %v347_v41 = vadd.f32 %v346_v31, %v318_v39  ;;  %v349_v49 = vpop.f32.mrf.mxu1 }
  0xc1   :  { %v364_v40 = vadd.f32 %v363_v63, %v335_v36  ;;  %v376_v43 = vadd.f32 %v375_v35, %v347_v41 }
  0xc3   :  { %v383_v42 = vmax.f32 %v364_v40, 0.0  ;;  %v388_v47 = vmax.f32 %v376_v43, 0.0 }
  0xc4   :  { %v320_v51 = vpop.f32.mrf.mxu3 }
  0xc5   :  { %v391_v45 = vpack.c.bf16 %v383_v42, %v383_v42  ;;  %v396_v52 = vpack.c.bf16 %v388_v47, %v388_v47  ;;  %v321_v53 = vadd.f32 %v320_v51, %v108_v46 }
  0xc6   :  { %v336_v48 = vpop.f32.mrf.mxu0  ;;  %v380_v3 = vpop.f32.mrf.mxu2 }
  0xc7   :  { %400 = vst.msk [vmem:[%s816_s3] sm:$0xf] %vm399_vm1, %v391_v45  ;;  %v337_v50 = vadd.f32 %v336_v48, %v308_v44  ;;  %v350_v56 = vadd.f32 %v349_v49, %v321_v53 }
  0xc8   :  { %405 = vst.msk [vmem:[%s816_s3 + $0x14] sm:$0xf] %vm399_vm1, %v396_v52 }
  0xc9   :  { %v366_v55 = vadd.f32 %v365_v0, %v337_v50  ;;  %v379_v58 = vadd.f32 %v378_v54, %v350_v56  ;;  %v351_v0 = vpop.f32.mrf.mxu1 }
  0xcb   :  { %v384_v57 = vmax.f32 %v366_v55, 0.0  ;;  %v389_v60 = vmax.f32 %v379_v58, 0.0 }
  0xcc   :  { %v322_v62 = vpop.f32.mrf.mxu3 }
  0xcd   :  { %v392_v59 = vpack.c.bf16 %v384_v57, %v384_v57  ;;  %v397_v63 = vpack.c.bf16 %v389_v60, %v389_v60  ;;  %v323_v1 = vadd.f32 %v322_v62, %v113_v61 }
  0xcf   :  { %401 = vst.msk [vmem:[%s816_s3 + $0x4] sm:$0xf] %vm399_vm1, %v392_v59  ;;  %v352_v2 = vadd.f32 %v351_v0, %v323_v1 }
  0xd0   :  { %406 = vst.msk [vmem:[%s816_s3 + $0x18] sm:$0xf] %vm399_vm1, %v397_v63 }
  0xd1   :  { %v381_v4 = vadd.f32 %v380_v3, %v352_v2 }
  0xd3   :  { %v390_v5 = vmax.f32 %v381_v4, 0.0 }
  0xd5   :  { %v398_v6 = vpack.c.bf16 %v390_v5, %v390_v5 }
  0xd7   :  { %407 = vst.msk [vmem:[%s816_s3 + $0x1c] sm:$0xf] %vm399_vm1, %v398_v6 }

// kernel: _lambda_.38
= control target key start
LH: loop header
LB: loop body
LE: loop exit
PB: predicated region body
PF: predicated region fallthrough
CT: control target
= control target key end

     0   :  { %v214_v0 = vmov 0   ;;  %vm107_vm0 = vcmask 261120   ;;  %vm157_vm1 = vcmask 11264   ;;  %s309_s2 = inlined_call_operand.vmem [shape: f32[64,1], index: 2, kind: input, shape index: {}]   ;;  %s310_s1 = inlined_call_operand.vmem [shape: bf16[32,2], index: 1, kind: input, shape index: {}]   ;;  %s311_s0 = inlined_call_operand.vmem [shape: bf16[64,32], index: 0, kind: input, shape index: {}]   ;;  %s312_s3 = inlined_call_operand.vmem [shape: bf16[64,2], index: 3, kind: output, shape index: {}]  }
   0x1   :  { %212 = vset.pattern.permute.xlu1 %v214_v0  ;;  %211 = vset.pattern.permute.xlu0 %v214_v0  ;;  %v29_v1 = vld [vmem:[%s309_s2 + $0x10] sm:$0xff]  ;;  %v27_v2 = vld [vmem:[%s309_s2] sm:$0xff]  ;;  %v203_v3 = vld [vmem:[%s310_s1 + $0x8] sm:$0xff] }
   0x2   :  { %47 = vperm.xlu1 %212, %v29_v1   ;;  %37 = vperm.xlu0 %211, %v27_v2   ;;  %v202_v4 = vld [vmem:[%s310_s1] sm:$0xff]  ;;  %v199_v7 = vld [vmem:[%s311_s0 + $0x8] sm:$0xff]  ;;  %v200_v8 = vld [vmem:[%s311_s0 + $0x10] sm:$0xff] }
   0x3   :  { %126 = vmatpush.bf16.msra.mxu0 %v203_v3  ;;  %204 = vmatpush.bf16.msra.mxu1 %v203_v3  ;;  %v31_v5 = vld [vmem:[%s309_s2 + $0x20] sm:$0xff]  ;;  %v201_v9 = vld [vmem:[%s311_s0 + $0x18] sm:$0xff]  ;;  %v28_v11 = vld [vmem:[%s309_s2 + $0x8] sm:$0xff] }
   0x4   :  { %205 = vmatpush.bf16.msra.mxu2 %v203_v3  ;;  %206 = vmatpush.bf16.msra.mxu3 %v203_v3  ;;  %v198_v6 = vld [vmem:[%s311_s0] sm:$0xff]  ;;  %v30_v10 = vld [vmem:[%s309_s2 + $0x18] sm:$0xff]  ;;  %v32_v12 = vld [vmem:[%s309_s2 + $0x28] sm:$0xff] }
   0x5   :  { %213 = vset.pattern.permute.xlu2 %v214_v0  ;;  %v34_v13 = vld [vmem:[%s309_s2 + $0x38] sm:$0xff]  ;;  %v33_v14 = vld [vmem:[%s309_s2 + $0x30] sm:$0xff] }
   0x6   :  { %57 = vperm.xlu2 %213, %v31_v5  }
   0x7   :  { %127 = vmatpush.bf16.msra.mxu0 %v202_v4  ;;  %207 = vmatpush.bf16.msra.mxu1 %v202_v4 }
   0x8   :  { %208 = vmatpush.bf16.msra.mxu2 %v202_v4  ;;  %209 = vmatpush.bf16.msra.mxu3 %v202_v4 }
   0xa   :  { %194 = vmatmul.msk.bf16.vlgmr.msra.gmra.mxu0 %vm107_vm0, %v198_v6  ;;  %195 = vmatmul.msk.bf16.vlgmr.msra.gmra.mxu1 %vm107_vm0, %v199_v7 }
   0xb   :  { %196 = vmatmul.msk.bf16.vlgmr.msra.gmra.mxu2 %vm107_vm0, %v200_v8  ;;  %197 = vmatmul.msk.bf16.vlgmr.msra.gmra.mxu3 %vm107_vm0, %v201_v9 }
   0xc   :  { %52 = vperm.xlu1 %212, %v30_v10   ;;  %42 = vperm.xlu0 %211, %v28_v11  }
   0xe   :  { %62 = vperm.xlu2 %213, %v32_v12  }
  0x14   :  { %72 = vperm.xlu1 %212, %v34_v13   ;;  %67 = vperm.xlu0 %211, %v33_v14  }
  0x60   :  { %v58_v25 = vpop.permute.xlu2 %57 }
  0x68   :  { %v63_v40 = vpop.permute.xlu2 %62 }
  0x74   :  { %v38_v15 = vpop.permute.xlu0 %37  ;;  %v48_v16 = vpop.permute.xlu1 %47 }
  0x7e   :  { %v43_v17 = vpop.permute.xlu0 %42  ;;  %v53_v24 = vpop.permute.xlu1 %52 }
  0x86   :  { %v68_v26 = vpop.permute.xlu0 %67  ;;  %v73_v39 = vpop.permute.xlu1 %72 }
  0x87   :  { %v129_v18 = vpop.f32.mrf.mxu0  ;;  %v134_v19 = vpop.f32.mrf.mxu1 }
  0x88   :  { %v130_v20 = vadd.f32 %v129_v18, %v38_v15  ;;  %v135_v21 = vadd.f32 %v134_v19, %v48_v16 }
  0x8a   :  { %v149_v22 = vpack.c.bf16 %v130_v20, %v130_v20  ;;  %v151_v23 = vpack.c.bf16 %v135_v21, %v135_v21 }
  0x8c   :  { %158 = vst.msk [vmem:[%s312_s3] sm:$0xf] %vm157_vm1, %v149_v22 }
  0x8d   :  { %160 = vst.msk [vmem:[%s312_s3 + $0x8] sm:$0xf] %vm157_vm1, %v151_v23 }
  0x8e   :  { %v139_v27 = vpop.f32.mrf.mxu2  ;;  %v144_v28 = vpop.f32.mrf.mxu3 }
  0x8f   :  { %v140_v29 = vadd.f32 %v139_v27, %v58_v25  ;;  %v145_v30 = vadd.f32 %v144_v28, %v68_v26  ;;  %v131_v31 = vpop.f32.mrf.mxu0  ;;  %v136_v32 = vpop.f32.mrf.mxu1 }
  0x90   :  { %v132_v33 = vadd.f32 %v131_v31, %v43_v17  ;;  %v137_v34 = vadd.f32 %v136_v32, %v53_v24 }
  0x91   :  { %v153_v35 = vpack.c.bf16 %v140_v29, %v140_v29  ;;  %v155_v36 = vpack.c.bf16 %v145_v30, %v145_v30 }
  0x92   :  { %v150_v37 = vpack.c.bf16 %v132_v33, %v132_v33  ;;  %v152_v38 = vpack.c.bf16 %v137_v34, %v137_v34 }
  0x93   :  { %162 = vst.msk [vmem:[%s312_s3 + $0x10] sm:$0xf] %vm157_vm1, %v153_v35 }
  0x94   :  { %164 = vst.msk [vmem:[%s312_s3 + $0x18] sm:$0xf] %vm157_vm1, %v155_v36 }
  0x95   :  { %159 = vst.msk [vmem:[%s312_s3 + $0x4] sm:$0xf] %vm157_vm1, %v150_v37 }
  0x96   :  { %161 = vst.msk [vmem:[%s312_s3 + $0xc] sm:$0xf] %vm157_vm1, %v152_v38  ;;  %v141_v41 = vpop.f32.mrf.mxu2  ;;  %v146_v42 = vpop.f32.mrf.mxu3 }
  0x97   :  { %v142_v43 = vadd.f32 %v141_v41, %v63_v40  ;;  %v147_v44 = vadd.f32 %v146_v42, %v73_v39 }
  0x99   :  { %v154_v45 = vpack.c.bf16 %v142_v43, %v142_v43  ;;  %v156_v46 = vpack.c.bf16 %v147_v44, %v147_v44 }
  0x9b   :  { %163 = vst.msk [vmem:[%s312_s3 + $0x14] sm:$0xf] %vm157_vm1, %v154_v45 }
  0x9c   :  { %165 = vst.msk [vmem:[%s312_s3 + $0x1c] sm:$0xf] %vm157_vm1, %v156_v46 }

// kernel: _lambda_.40
= control target key start
LH: loop header
LB: loop body
LE: loop exit
PB: predicated region body
PF: predicated region fallthrough
CT: control target
= control target key end

     0   :  { %v1012_v6 = vmov 0   ;;  %vm478_vm0 = vcmask 523264   ;;  %vm676_vm1 = vcmask 11264   ;;  %s1350_s1 = inlined_call_operand.vmem [shape: bf16[576,2], index: 1, kind: input, shape index: {}]   ;;  %s1351_s2 = inlined_call_operand.vmem [shape: f32[64,1], index: 2, kind: input, shape index: {}]   ;;  %s1352_s0 = inlined_call_operand.vmem [shape: bf16[64,576], index: 0, kind: input, shape index: {}]   ;;  %s1353_s3 = inlined_call_operand.vmem [shape: bf16[64,2], index: 3, kind: input, shape index: {}]   ;;  %s1354_s4 = inlined_call_operand.vmem [shape: bf16[64,2], index: 4, kind: output, shape index: {}]  }
   0x1   :  { %v944_v0 = vld [vmem:[%s1350_s1 + $0x38] sm:$0xff]  ;;  %v943_v1 = vld [vmem:[%s1350_s1 + $0x30] sm:$0xff]  ;;  %v942_v4 = vld [vmem:[%s1350_s1 + $0x28] sm:$0xff]  ;;  %1010 = vset.pattern.permute.xlu1 %v1012_v6  ;;  %1009 = vset.pattern.permute.xlu0 %v1012_v6 }
   0x2   :  { %992 = vmatpush.bf16.msra.mxu1 %v944_v0  ;;  %993 = vmatpush.bf16.msra.mxu2 %v944_v0  ;;  %v968_v2 = vld [vmem:[%s1350_s1 + $0xf8] sm:$0xff]  ;;  %v967_v3 = vld [vmem:[%s1350_s1 + $0xf0] sm:$0xff]  ;;  %v966_v5 = vld [vmem:[%s1350_s1 + $0xe8] sm:$0xff] }
   0x3   :  { %491 = vmatpush.bf16.msra.mxu0 %v944_v0  ;;  %578 = vmatpush.bf16.msra.mxu3 %v968_v2  ;;  %v941_v7 = vld [vmem:[%s1350_s1 + $0x20] sm:$0xff]  ;;  %v116_v8 = vld [vmem:[%s1351_s2 + $0x10] sm:$0xff]  ;;  %v940_v11 = vld [vmem:[%s1350_s1 + $0x18] sm:$0xff] }
   0x4   :  { %1011 = vset.pattern.permute.xlu2 %v1012_v6  ;;  %v965_v9 = vld [vmem:[%s1350_s1 + $0xe0] sm:$0xff]  ;;  %134 = vperm.xlu1 %1010, %v116_v8   ;;  %v964_v12 = vld [vmem:[%s1350_s1 + $0xd8] sm:$0xff]  ;;  %v939_v13 = vld [vmem:[%s1350_s1 + $0x10] sm:$0xff] }
   0x5   :  { %v114_v10 = vld [vmem:[%s1351_s2] sm:$0xff]  ;;  %v117_v14 = vld [vmem:[%s1351_s2 + $0x18] sm:$0xff]  ;;  %v963_v15 = vld [vmem:[%s1350_s1 + $0xd0] sm:$0xff] }
   0x6   :  { %994 = vmatpush.bf16.msra.mxu1 %v943_v1  ;;  %995 = vmatpush.bf16.msra.mxu2 %v943_v1  ;;  %v115_v16 = vld [vmem:[%s1351_s2 + $0x8] sm:$0xff]  ;;  %v937_v19 = vld [vmem:[%s1350_s1] sm:$0xff]  ;;  %v924_v21 = vld [vmem:[%s1352_s0 + $0x38] sm:$0xf0] }
   0x7   :  { %492 = vmatpush.bf16.msra.mxu0 %v943_v1  ;;  %579 = vmatpush.bf16.msra.mxu3 %v967_v3  ;;  %v938_v17 = vld [vmem:[%s1350_s1 + $0x8] sm:$0xff]  ;;  %v751_v22 = vld [vmem:[%s1352_s0 + $0x78] sm:$0xf]  ;;  %v691_v26 = vld [vmem:[%s1352_s0] sm:$0xf] }
   0x8   :  { %124 = vperm.xlu0 %1009, %v114_v10   ;;  %v962_v18 = vld [vmem:[%s1350_s1 + $0xc8] sm:$0xff]  ;;  %v960_v24 = vld [vmem:[%s1350_s1 + $0xb8] sm:$0xff]  ;;  %v961_v27 = vld [vmem:[%s1350_s1 + $0xc0] sm:$0xff] }
   0x9   :  { %v711_v20 = vld [vmem:[%s1352_s0 + $0x28] sm:$0xf]  ;;  %v934_v23 = vld [vmem:[%s1352_s0 + $0x88] sm:$0xf0]  ;;  %v952_v25 = vld [vmem:[%s1350_s1 + $0x78] sm:$0xff] }
   0xa   :  { %996 = vmatpush.bf16.msra.mxu1 %v942_v4  ;;  %997 = vmatpush.bf16.msra.mxu2 %v942_v4  ;;  %v712_v28 = vor.u32 %v924_v21, %v711_v20  ;;  %v752_v29 = vor.u32 %v934_v23, %v751_v22  ;;  %v919_v30 = vld [vmem:[%s1352_s0 + $0x10] sm:$0xf0]  ;;  %v918_v31 = vld [vmem:[%s1352_s0 + $0xc] sm:$0xf]  ;;  %v701_v32 = vld [vmem:[%s1352_s0 + $0x1c] sm:$0xf0] }
   0xb   :  { %493 = vmatpush.bf16.msra.mxu0 %v942_v4  ;;  %580 = vmatpush.bf16.msra.mxu3 %v966_v5  ;;  %v972_v33 = vld [vmem:[%s1350_s1 + $0x118] sm:$0xff]  ;;  %v959_v34 = vld [vmem:[%s1350_s1 + $0xb0] sm:$0xff]  ;;  %v692_v37 = vor.u32 %v919_v30, %v691_v26  ;;  %v704_v38 = vor.u32 %v918_v31, %v701_v32  ;;  %v958_v41 = vld [vmem:[%s1350_s1 + $0xa8] sm:$0xff] }
   0xc   :  { %139 = vperm.xlu1 %1010, %v117_v14   ;;  %v951_v35 = vld [vmem:[%s1350_s1 + $0x70] sm:$0xff]  ;;  %v121_v36 = vld [vmem:[%s1351_s2 + $0x38] sm:$0xff]  ;;  %v950_v42 = vld [vmem:[%s1350_s1 + $0x68] sm:$0xff] }
   0xd   :  { %v971_v39 = vld [vmem:[%s1350_s1 + $0x110] sm:$0xff]  ;;  %v970_v43 = vld [vmem:[%s1350_s1 + $0x108] sm:$0xff]  ;;  %v957_v44 = vld [vmem:[%s1350_s1 + $0xa0] sm:$0xff] }
   0xe   :  { %998 = vmatpush.bf16.msra.mxu1 %v941_v7  ;;  %999 = vmatpush.bf16.msra.mxu2 %v941_v7  ;;  %v120_v40 = vld [vmem:[%s1351_s2 + $0x30] sm:$0xff]  ;;  %v949_v45 = vld [vmem:[%s1350_s1 + $0x60] sm:$0xff]  ;;  %v956_v49 = vld [vmem:[%s1350_s1 + $0x98] sm:$0xff] }
   0xf   :  { %494 = vmatpush.bf16.msra.mxu0 %v941_v7  ;;  %581 = vmatpush.bf16.msra.mxu3 %v965_v9  ;;  %v731_v46 = vld [vmem:[%s1352_s0 + $0x50] sm:$0xf]  ;;  %v929_v47 = vld [vmem:[%s1352_s0 + $0x60] sm:$0xf0]  ;;  %v948_v50 = vld [vmem:[%s1350_s1 + $0x58] sm:$0xff] }
  0x10   :  { %129 = vperm.xlu0 %1009, %v115_v16   ;;  %v969_v48 = vld [vmem:[%s1350_s1 + $0x100] sm:$0xff]  ;;  %v707_v51 = vld [vmem:[%s1352_s0 + $0x10] sm:$0xf]  ;;  %v732_v52 = vor.u32 %v929_v47, %v731_v46  ;;  %v923_v54 = vld [vmem:[%s1352_s0 + $0x34] sm:$0xf] }
  0x11   :  { %v921_v53 = vld [vmem:[%s1352_s0 + $0x20] sm:$0xf0]  ;;  %v721_v55 = vld [vmem:[%s1352_s0 + $0x44] sm:$0xf0]  ;;  %v955_v56 = vld [vmem:[%s1350_s1 + $0x90] sm:$0xff] }
  0x12   :  { %1000 = vmatpush.bf16.msra.mxu1 %v940_v11  ;;  %1001 = vmatpush.bf16.msra.mxu2 %v940_v11  ;;  %v947_v57 = vld [vmem:[%s1350_s1 + $0x50] sm:$0xff]  ;;  %v708_v58 = vor.u32 %v921_v53, %v707_v51  ;;  %v724_v59 = vor.u32 %v923_v54, %v721_v55  ;;  %v118_v60 = vld [vmem:[%s1351_s2 + $0x20] sm:$0xff]  ;;  %v954_v61 = vld [vmem:[%s1350_s1 + $0x88] sm:$0xff] }
  0x13   :  { %495 = vmatpush.bf16.msra.mxu0 %v940_v11  ;;  %582 = vmatpush.bf16.msra.mxu3 %v964_v12  ;;  %v946_v62 = vld [vmem:[%s1350_s1 + $0x48] sm:$0xff]  ;;  %v953_v63 = vld [vmem:[%s1350_s1 + $0x80] sm:$0xff]  ;;  %v920_v2 = vld [vmem:[%s1352_s0 + $0x18] sm:$0xf0] }
  0x14   :  { %159 = vperm.xlu1 %1010, %v121_v36   ;;  %144 = vperm.xlu2 %1011, %v118_v60   ;;  %v945_v0 = vld [vmem:[%s1350_s1 + $0x40] sm:$0xff]  ;;  %v699_v1 = vld [vmem:[%s1352_s0 + $0x8] sm:$0xf]  ;;  %v693_v6 = vld [vmem:[%s1352_s0 + $0x14] sm:$0xf0] }
  0x15   :  { %v119_v3 = vld [vmem:[%s1351_s2 + $0x28] sm:$0xff]  ;;  %v700_v4 = vor.u32 %v920_v2, %v699_v1  ;;  %v917_v5 = vld [vmem:[%s1352_s0 + $0x4] sm:$0xf]  ;;  %v727_v7 = vld [vmem:[%s1352_s0 + $0x38] sm:$0xf] }
  0x16   :  { %1002 = vmatpush.bf16.msra.mxu1 %v939_v13  ;;  %1003 = vmatpush.bf16.msra.mxu2 %v939_v13  ;;  %v696_v8 = vor.u32 %v917_v5, %v693_v6  ;;  %v926_v9 = vld [vmem:[%s1352_s0 + $0x48] sm:$0xf0]  ;;  %v928_v10 = vld [vmem:[%s1352_s0 + $0x5c] sm:$0xf]  ;;  %v741_v11 = vld [vmem:[%s1352_s0 + $0x6c] sm:$0xf0] }
  0x17   :  { %496 = vmatpush.bf16.msra.mxu0 %v939_v13  ;;  %583 = vmatpush.bf16.msra.mxu3 %v963_v15  ;;  %v728_v12 = vor.u32 %v926_v9, %v727_v7  ;;  %v744_v13 = vor.u32 %v928_v10, %v741_v11  ;;  %v719_v14 = vld [vmem:[%s1352_s0 + $0x30] sm:$0xf]  ;;  %v925_v15 = vld [vmem:[%s1352_s0 + $0x40] sm:$0xf0]  ;;  %v931_v21 = vld [vmem:[%s1352_s0 + $0x70] sm:$0xf0] }
  0x18   :  { %154 = vperm.xlu0 %1009, %v120_v40   ;;  %v720_v16 = vor.u32 %v925_v15, %v719_v14  ;;  %v933_v22 = vld [vmem:[%s1352_s0 + $0x84] sm:$0xf]  ;;  %v761_v23 = vld [vmem:[%s1352_s0 + $0x94] sm:$0xf0]  ;;  %v733_v30 = vld [vmem:[%s1352_s0 + $0x64] sm:$0xf0] }
  0x19   :  { %v739_v26 = vld [vmem:[%s1352_s0 + $0x58] sm:$0xf]  ;;  %v767_v32 = vld [vmem:[%s1352_s0 + $0x88] sm:$0xf]  ;;  %v935_v36 = vld [vmem:[%s1352_s0 + $0x90] sm:$0xf0] }
  0x1a   :  { %1004 = vmatpush.bf16.msra.mxu1 %v938_v17  ;;  %1005 = vmatpush.bf16.msra.mxu2 %v938_v17 }
  0x1b   :  { %497 = vmatpush.bf16.msra.mxu0 %v938_v17  ;;  %584 = vmatpush.bf16.msra.mxu3 %v962_v18  ;;  %v922_v17 = vld [vmem:[%s1352_s0 + $0x2c] sm:$0xf]  ;;  %v713_v18 = vld [vmem:[%s1352_s0 + $0x3c] sm:$0xf0] }
  0x1c   :  { %149 = vperm.xlu2 %1011, %v119_v3   ;;  %v716_v20 = vor.u32 %v922_v17, %v713_v18 }
  0x1e   :  { %1006 = vmatpush.bf16.msra.mxu1 %v937_v19  ;;  %1007 = vmatpush.bf16.msra.mxu2 %v937_v19 }
  0x1f   :  { %498 = vmatpush.bf16.msra.mxu0 %v937_v19  ;;  %585 = vmatpush.bf16.msra.mxu3 %v961_v27  ;;  %v747_v19 = vld [vmem:[%s1352_s0 + $0x60] sm:$0xf]  ;;  %v930_v27 = vld [vmem:[%s1352_s0 + $0x68] sm:$0xf0] }
  0x21   :  { %504 = vmatmul.bf16.vlgmr.msra.gmra.mxu1 %v712_v28  ;;  %514 = vmatmul.bf16.vlgmr.msra.gmra.mxu2 %v752_v29  ;;  %v740_v28 = vor.u32 %v930_v27, %v739_v26  ;;  %v927_v29 = vld [vmem:[%s1352_s0 + $0x54] sm:$0xf] }
  0x22   :  { %549 = vmatpush.bf16.msrb.mxu2 %v960_v24  ;;  %520 = vmatpush.bf16.msrb.mxu1 %v952_v25  ;;  %v748_v24 = vor.u32 %v931_v21, %v747_v19  ;;  %v764_v25 = vor.u32 %v933_v22, %v761_v23  ;;  %v736_v31 = vor.u32 %v927_v29, %v733_v30  ;;  %v989_v19 = vld [vmem:[%s1353_s3 + $0x8] sm:$0xff]  }
  0x23   :  { %611 = vmatpush.bf16.msrb.mxu0 %v972_v33  ;;  %586 = vmatmul.bf16.vlgmr.msra.gmra.mxu3 %v704_v38  ;;  %v936_v33 = vld [vmem:[%s1352_s0 + $0x98] sm:$0xf0]  ;;  %v979_v26 = vunpack.c.l.bf16 %v989_v19 }
  0x24   :  { %499 = vmatmul.bf16.vlgmr.msra.gmra.mxu0 %v692_v37  ;;  %v932_v38 = vld [vmem:[%s1352_s0 + $0x7c] sm:$0xf] }
  0x26   :  { %550 = vmatpush.bf16.msrb.mxu2 %v959_v34  ;;  %521 = vmatpush.bf16.msrb.mxu1 %v951_v35  ;;  %v768_v34 = vor.u32 %v936_v33, %v767_v32  ;;  %v759_v35 = vld [vmem:[%s1352_s0 + $0x80] sm:$0xf] }
  0x27   :  { %612 = vmatpush.bf16.msrb.mxu0 %v971_v39  ;;  %v760_v37 = vor.u32 %v935_v36, %v759_v35  ;;  %v753_v39 = vld [vmem:[%s1352_s0 + $0x8c] sm:$0xf0] }
  0x28   :  { %v756_v40 = vor.u32 %v932_v38, %v753_v39  ;;  %v980_v39 = vunpack.c.h.bf16 %v989_v19 }
  0x2a   :  { %551 = vmatpush.bf16.msrb.mxu2 %v958_v41  ;;  %522 = vmatpush.bf16.msrb.mxu1 %v950_v42 }
  0x2b   :  { %613 = vmatpush.bf16.msrb.mxu0 %v970_v43 }
  0x2e   :  { %552 = vmatpush.bf16.msrb.mxu2 %v957_v44  ;;  %523 = vmatpush.bf16.msrb.mxu1 %v949_v45 }
  0x2f   :  { %614 = vmatpush.bf16.msrb.mxu0 %v969_v48 }
  0x31   :  { %509 = vmatmul.bf16.gmra.mxu1 %v732_v52 }
  0x32   :  { %553 = vmatpush.bf16.msrb.mxu2 %v956_v49  ;;  %524 = vmatpush.bf16.msrb.mxu1 %v948_v50 }
  0x33   :  { %591 = vmatmul.bf16.gmra.mxu3 %v724_v59 }
  0x34   :  { %913 = vmatmul.msk.bf16.vlgmr.msrb.gmra.mxu0 %vm478_vm0, %v708_v58 }
  0x36   :  { %554 = vmatpush.bf16.msrb.mxu2 %v955_v56  ;;  %525 = vmatpush.bf16.msrb.mxu1 %v947_v57  ;;  %v974_v57 = vld [vmem:[%s1353_s3] sm:$0xff]  }
  0x3a   :  { %555 = vmatpush.bf16.msrb.mxu2 %v954_v61  ;;  %526 = vmatpush.bf16.msrb.mxu1 %v946_v62  ;;  %v975_v62 = vunpack.c.l.bf16 %v974_v57 }
  0x3e   :  { %556 = vmatpush.bf16.msrb.mxu2 %v953_v63  ;;  %527 = vmatpush.bf16.msrb.mxu1 %v945_v0 }
  0x41   :  { %557 = vmatmul.bf16.vlgmr.msrb.gmra.mxu2 %v700_v4  ;;  %528 = vmatmul.bf16.vlgmr.msrb.gmra.mxu1 %v696_v8 }
  0x43   :  { %596 = vmatmul.bf16.gmra.mxu3 %v744_v13 }
  0x44   :  { %914 = vmatmul.msk.bf16.gmra.mxu0 %vm478_vm0, %v728_v12  ;;  %v976_v12 = vunpack.c.h.bf16 %v974_v57 }
  0x51   :  { %562 = vmatmul.bf16.gmra.mxu2 %v720_v16  ;;  %533 = vmatmul.bf16.gmra.mxu1 %v716_v20 }
  0x53   :  { %601 = vmatmul.bf16.gmra.mxu3 %v764_v25 }
  0x54   :  { %915 = vmatmul.msk.bf16.gmra.mxu0 %vm478_vm0, %v748_v24 }
  0x61   :  { %567 = vmatmul.bf16.gmra.mxu2 %v740_v28  ;;  %538 = vmatmul.bf16.gmra.mxu1 %v736_v31 }
  0x64   :  { %916 = vmatmul.msk.bf16.gmra.mxu0 %vm478_vm0, %v768_v34 }
  0x6e   :  { %v145_v32 = vpop.permute.xlu2 %144 }
  0x71   :  { %572 = vmatmul.bf16.gmra.mxu2 %v760_v37  ;;  %543 = vmatmul.bf16.gmra.mxu1 %v756_v40 }
  0x76   :  { %v135_v3 = vpop.permute.xlu1 %134 }
  0x7a   :  { %v125_v51 = vpop.permute.xlu0 %124 }
  0x7e   :  { %v140_v20 = vpop.permute.xlu1 %139 }
  0x82   :  { %v130_v60 = vpop.permute.xlu0 %129 }
  0x9e   :  { %v505_v41 = vpop.f32.mrf.mxu1 }
  0x9f   :  { %v506_v13 = vadd.f32 %v505_v41, %v135_v3 }
  0xa1   :  { %v500_v42 = vpop.f32.mrf.mxu0 }
  0xa2   :  { %v501_v52 = vadd.f32 %v500_v42, %v125_v51 }
  0xa4   :  { %v1296_v46 = vpop.f32.mrf.mxu2 }
  0xa6   :  { %v507_v43 = vpop.f32.mrf.mxu1  ;;  %v587_v47 = vpop.f32.mrf.mxu3 }
  0xa7   :  { %v508_v27 = vadd.f32 %v507_v43, %v140_v20 }
  0xa9   :  { %v502_v44 = vpop.f32.mrf.mxu0 }
  0xaa   :  { %v503_v63 = vadd.f32 %v502_v44, %v130_v60 }
  0xac   :  { %v1300_v50 = vpop.f32.mrf.mxu2 }
  0xae   :  { %v1294_v45 = vpop.f32.mrf.mxu1  ;;  %v589_v55 = vpop.f32.mrf.mxu3 }
  0xaf   :  { %v511_v40 = vadd.f32 %v1294_v45, %v145_v32 }
  0xb1   :  { %v616_v49 = vpop.f32.mrf.mxu0 }
  0xb6   :  { %v1298_v48 = vpop.f32.mrf.mxu1  ;;  %v592_v6 = vpop.f32.mrf.mxu3 }
  0xb9   :  { %v618_v58 = vpop.f32.mrf.mxu0 }
  0xbe   :  { %v529_v53 = vpop.f32.mrf.mxu1  ;;  %v594_v23 = vpop.f32.mrf.mxu3 }
  0xbf   :  { %v530_v54 = vadd.f32 %v529_v53, %v501_v52  ;;  %v990_v52 = vld [vmem:[%s1353_s3 + $0x10] sm:$0xff]   ;;  %v150_v53 = vpop.permute.xlu2 %149 }
  0xc0   :  { %v983_v57 = vunpack.c.l.bf16 %v990_v52 }
  0xc1   :  { %v621_v9 = vpop.f32.mrf.mxu0 }
  0xc4   :  { %v558_v56 = vpop.f32.mrf.mxu2 }
  0xc5   :  { %v559_v59 = vadd.f32 %v558_v56, %v530_v54 }
  0xc6   :  { %v531_v1 = vpop.f32.mrf.mxu1  ;;  %v597_v41 = vpop.f32.mrf.mxu3 }
  0xc7   :  { %v588_v61 = vadd.f32 %v587_v47, %v559_v59  ;;  %v532_v2 = vadd.f32 %v531_v1, %v503_v63 }
  0xc9   :  { %v617_v0 = vadd.f32 %v616_v49, %v588_v61  ;;  %v623_v28 = vpop.f32.mrf.mxu0 }
  0xcb   :  { %v652_v4 = vadd.f32 %v975_v62, %v617_v0 }
  0xcc   :  { %v560_v5 = vpop.f32.mrf.mxu2 }
  0xcd   :  { %v660_v7 = vmax.f32 %v652_v4, 0.0  ;;  %v561_v8 = vadd.f32 %v560_v5, %v532_v2  ;;  %v155_v2 = vpop.permute.xlu0 %154 }
  0xce   :  { %v534_v15 = vpop.f32.mrf.mxu1  ;;  %v599_v61 = vpop.f32.mrf.mxu3 }
  0xcf   :  { %v668_v10 = vpack.c.bf16 %v660_v7, %v660_v7  ;;  %v590_v11 = vadd.f32 %v589_v55, %v561_v8  ;;  %v535_v16 = vadd.f32 %v534_v15, %v506_v13  ;;  %v984_v7 = vunpack.c.h.bf16 %v990_v52  ;;  %v160_v15 = vpop.permute.xlu1 %159 }
  0xd1   :  { %677 = vst.msk [vmem:[%s1354_s4] sm:$0xf] %vm676_vm1, %v668_v10  ;;  %v619_v14 = vadd.f32 %v618_v58, %v590_v11  ;;  %v626_v44 = vpop.f32.mrf.mxu0  ;;  %v513_v58 = vadd.f32 %v1298_v48, %v150_v53  ;;  %v516_v48 = vadd.f32 %v1296_v46, %v155_v2 }
  0xd3   :  { %v653_v17 = vadd.f32 %v976_v12, %v619_v14  ;;  %v991_v14 = vld [vmem:[%s1353_s3 + $0x18] sm:$0xff]  }
  0xd4   :  { %v563_v18 = vpop.f32.mrf.mxu2  ;;  %v987_v20 = vunpack.c.l.bf16 %v991_v14  ;;  %v988_v32 = vunpack.c.h.bf16 %v991_v14 }
  0xd5   :  { %v661_v21 = vmax.f32 %v653_v17, 0.0  ;;  %v564_v22 = vadd.f32 %v563_v18, %v535_v16 }
  0xd6   :  { %v536_v30 = vpop.f32.mrf.mxu1  ;;  %v602_v12 = vpop.f32.mrf.mxu3 }
  0xd7   :  { %v669_v24 = vpack.c.bf16 %v661_v21, %v661_v21  ;;  %v593_v25 = vadd.f32 %v592_v6, %v564_v22  ;;  %v537_v31 = vadd.f32 %v536_v30, %v508_v27  ;;  %v518_v21 = vadd.f32 %v1300_v50, %v160_v15 }
  0xd9   :  { %678 = vst.msk [vmem:[%s1354_s4 + $0x4] sm:$0xf] %vm676_vm1, %v669_v24  ;;  %v622_v29 = vadd.f32 %v621_v9, %v593_v25  ;;  %v628_v0 = vpop.f32.mrf.mxu0 }
  0xdb   :  { %v654_v33 = vadd.f32 %v979_v26, %v622_v29 }
  0xdc   :  { %v565_v34 = vpop.f32.mrf.mxu2 }
  0xdd   :  { %v662_v35 = vmax.f32 %v654_v33, 0.0  ;;  %v566_v36 = vadd.f32 %v565_v34, %v537_v31 }
  0xde   :  { %v539_v43 = vpop.f32.mrf.mxu1  ;;  %v604_v29 = vpop.f32.mrf.mxu3 }
  0xdf   :  { %v670_v37 = vpack.c.bf16 %v662_v35, %v662_v35  ;;  %v595_v38 = vadd.f32 %v594_v23, %v566_v36  ;;  %v540_v47 = vadd.f32 %v539_v43, %v511_v40 }
  0xe1   :  { %679 = vst.msk [vmem:[%s1354_s4 + $0x8] sm:$0xf] %vm676_vm1, %v670_v37  ;;  %v624_v42 = vadd.f32 %v623_v28, %v595_v38  ;;  %v631_v18 = vpop.f32.mrf.mxu0 }
  0xe3   :  { %v655_v49 = vadd.f32 %v980_v39, %v624_v42 }
  0xe4   :  { %v568_v51 = vpop.f32.mrf.mxu2 }
  0xe5   :  { %v663_v54 = vmax.f32 %v655_v49, 0.0  ;;  %v569_v55 = vadd.f32 %v568_v51, %v540_v47 }
  0xe6   :  { %v541_v60 = vpop.f32.mrf.mxu1 }
  0xe7   :  { %v671_v45 = vpack.c.bf16 %v663_v54, %v663_v54  ;;  %v598_v56 = vadd.f32 %v597_v41, %v569_v55  ;;  %v542_v62 = vadd.f32 %v541_v60, %v513_v58 }
  0xe9   :  { %680 = vst.msk [vmem:[%s1354_s4 + $0xc] sm:$0xf] %vm676_vm1, %v671_v45  ;;  %v627_v59 = vadd.f32 %v626_v44, %v598_v56  ;;  %v633_v33 = vpop.f32.mrf.mxu0 }
  0xeb   :  { %v656_v63 = vadd.f32 %v983_v57, %v627_v59 }
  0xec   :  { %v570_v1 = vpop.f32.mrf.mxu2 }
  0xed   :  { %v664_v3 = vmax.f32 %v656_v63, 0.0  ;;  %v571_v4 = vadd.f32 %v570_v1, %v542_v62 }
  0xee   :  { %v544_v9 = vpop.f32.mrf.mxu1 }
  0xef   :  { %v672_v5 = vpack.c.bf16 %v664_v3, %v664_v3  ;;  %v600_v6 = vadd.f32 %v599_v61, %v571_v4  ;;  %v545_v10 = vadd.f32 %v544_v9, %v516_v48 }
  0xf1   :  { %681 = vst.msk [vmem:[%s1354_s4 + $0x10] sm:$0xf] %vm676_vm1, %v672_v5  ;;  %v629_v8 = vadd.f32 %v628_v0, %v600_v6 }
  0xf3   :  { %v657_v11 = vadd.f32 %v984_v7, %v629_v8 }
  0xf4   :  { %v573_v13 = vpop.f32.mrf.mxu2 }
  0xf5   :  { %v665_v16 = vmax.f32 %v657_v11, 0.0  ;;  %v574_v17 = vadd.f32 %v573_v13, %v545_v10 }
  0xf6   :  { %v546_v23 = vpop.f32.mrf.mxu1 }
  0xf7   :  { %v673_v46 = vpack.c.bf16 %v665_v16, %v665_v16  ;;  %v603_v19 = vadd.f32 %v602_v12, %v574_v17  ;;  %v547_v24 = vadd.f32 %v546_v23, %v518_v21 }
  0xf9   :  { %682 = vst.msk [vmem:[%s1354_s4 + $0x14] sm:$0xf] %vm676_vm1, %v673_v46  ;;  %v632_v22 = vadd.f32 %v631_v18, %v603_v19 }
  0xfb   :  { %v658_v25 = vadd.f32 %v987_v20, %v632_v22 }
  0xfc   :  { %v575_v26 = vpop.f32.mrf.mxu2 }
  0xfd   :  { %v666_v27 = vmax.f32 %v658_v25, 0.0  ;;  %v576_v28 = vadd.f32 %v575_v26, %v547_v24 }
  0xff   :  { %v674_v30 = vpack.c.bf16 %v666_v27, %v666_v27  ;;  %v605_v31 = vadd.f32 %v604_v29, %v576_v28 }
 0x101   :  { %683 = vst.msk [vmem:[%s1354_s4 + $0x18] sm:$0xf] %vm676_vm1, %v674_v30  ;;  %v634_v50 = vadd.f32 %v633_v33, %v605_v31 }
 0x103   :  { %v659_v34 = vadd.f32 %v988_v32, %v634_v50 }
 0x105   :  { %v667_v35 = vmax.f32 %v659_v34, 0.0 }
 0x107   :  { %v675_v36 = vpack.c.bf16 %v667_v35, %v667_v35 }
 0x109   :  { %684 = vst.msk [vmem:[%s1354_s4 + $0x1c] sm:$0xf] %vm676_vm1, %v675_v36 }

// kernel: _lambda_.41
= control target key start
LH: loop header
LB: loop body
LE: loop exit
PB: predicated region body
PF: predicated region fallthrough
CT: control target
= control target key end

     0   :  { %v966_v6 = vmov 0   ;;  %vm475_vm0 = vcmask 523264   ;;  %vm649_vm1 = vcmask 11264   ;;  %s1284_s1 = inlined_call_operand.vmem [shape: bf16[576,2], index: 1, kind: input, shape index: {}]   ;;  %s1285_s2 = inlined_call_operand.vmem [shape: f32[64,1], index: 2, kind: input, shape index: {}]   ;;  %s1286_s0 = inlined_call_operand.vmem [shape: bf16[64,576], index: 0, kind: input, shape index: {}]   ;;  %s1287_s3 = inlined_call_operand.vmem [shape: bf16[64,2], index: 3, kind: output, shape index: {}]  }
   0x1   :  { %v917_v0 = vld [vmem:[%s1284_s1 + $0x38] sm:$0xff]  ;;  %v916_v1 = vld [vmem:[%s1284_s1 + $0x30] sm:$0xff]  ;;  %v915_v4 = vld [vmem:[%s1284_s1 + $0x28] sm:$0xff]  ;;  %964 = vset.pattern.permute.xlu1 %v966_v6  ;;  %963 = vset.pattern.permute.xlu0 %v966_v6 }
   0x2   :  { %946 = vmatpush.bf16.msra.mxu1 %v917_v0  ;;  %947 = vmatpush.bf16.msra.mxu2 %v917_v0  ;;  %v941_v2 = vld [vmem:[%s1284_s1 + $0xf8] sm:$0xff]  ;;  %v940_v3 = vld [vmem:[%s1284_s1 + $0xf0] sm:$0xff]  ;;  %v939_v5 = vld [vmem:[%s1284_s1 + $0xe8] sm:$0xff] }
   0x3   :  { %488 = vmatpush.bf16.msra.mxu0 %v917_v0  ;;  %575 = vmatpush.bf16.msra.mxu3 %v941_v2  ;;  %v914_v7 = vld [vmem:[%s1284_s1 + $0x20] sm:$0xff]  ;;  %v113_v8 = vld [vmem:[%s1285_s2 + $0x10] sm:$0xff]  ;;  %v913_v11 = vld [vmem:[%s1284_s1 + $0x18] sm:$0xff] }
   0x4   :  { %965 = vset.pattern.permute.xlu2 %v966_v6  ;;  %v938_v9 = vld [vmem:[%s1284_s1 + $0xe0] sm:$0xff]  ;;  %131 = vperm.xlu1 %964, %v113_v8   ;;  %v937_v12 = vld [vmem:[%s1284_s1 + $0xd8] sm:$0xff]  ;;  %v912_v13 = vld [vmem:[%s1284_s1 + $0x10] sm:$0xff] }
   0x5   :  { %v111_v10 = vld [vmem:[%s1285_s2] sm:$0xff]  ;;  %v114_v14 = vld [vmem:[%s1285_s2 + $0x18] sm:$0xff]  ;;  %v936_v15 = vld [vmem:[%s1284_s1 + $0xd0] sm:$0xff] }
   0x6   :  { %948 = vmatpush.bf16.msra.mxu1 %v916_v1  ;;  %949 = vmatpush.bf16.msra.mxu2 %v916_v1  ;;  %v112_v16 = vld [vmem:[%s1285_s2 + $0x8] sm:$0xff]  ;;  %v910_v19 = vld [vmem:[%s1284_s1] sm:$0xff]  ;;  %v897_v21 = vld [vmem:[%s1286_s0 + $0x38] sm:$0xf0] }
   0x7   :  { %489 = vmatpush.bf16.msra.mxu0 %v916_v1  ;;  %576 = vmatpush.bf16.msra.mxu3 %v940_v3  ;;  %v911_v17 = vld [vmem:[%s1284_s1 + $0x8] sm:$0xff]  ;;  %v724_v22 = vld [vmem:[%s1286_s0 + $0x78] sm:$0xf]  ;;  %v664_v26 = vld [vmem:[%s1286_s0] sm:$0xf] }
   0x8   :  { %121 = vperm.xlu0 %963, %v111_v10   ;;  %v935_v18 = vld [vmem:[%s1284_s1 + $0xc8] sm:$0xff]  ;;  %v933_v24 = vld [vmem:[%s1284_s1 + $0xb8] sm:$0xff]  ;;  %v934_v27 = vld [vmem:[%s1284_s1 + $0xc0] sm:$0xff] }
   0x9   :  { %v684_v20 = vld [vmem:[%s1286_s0 + $0x28] sm:$0xf]  ;;  %v907_v23 = vld [vmem:[%s1286_s0 + $0x88] sm:$0xf0]  ;;  %v925_v25 = vld [vmem:[%s1284_s1 + $0x78] sm:$0xff] }
   0xa   :  { %950 = vmatpush.bf16.msra.mxu1 %v915_v4  ;;  %951 = vmatpush.bf16.msra.mxu2 %v915_v4  ;;  %v685_v28 = vor.u32 %v897_v21, %v684_v20  ;;  %v725_v29 = vor.u32 %v907_v23, %v724_v22  ;;  %v892_v30 = vld [vmem:[%s1286_s0 + $0x10] sm:$0xf0]  ;;  %v891_v31 = vld [vmem:[%s1286_s0 + $0xc] sm:$0xf]  ;;  %v674_v32 = vld [vmem:[%s1286_s0 + $0x1c] sm:$0xf0] }
   0xb   :  { %490 = vmatpush.bf16.msra.mxu0 %v915_v4  ;;  %577 = vmatpush.bf16.msra.mxu3 %v939_v5  ;;  %v945_v33 = vld [vmem:[%s1284_s1 + $0x118] sm:$0xff]  ;;  %v932_v34 = vld [vmem:[%s1284_s1 + $0xb0] sm:$0xff]  ;;  %v665_v37 = vor.u32 %v892_v30, %v664_v26  ;;  %v677_v38 = vor.u32 %v891_v31, %v674_v32  ;;  %v931_v41 = vld [vmem:[%s1284_s1 + $0xa8] sm:$0xff] }
   0xc   :  { %136 = vperm.xlu1 %964, %v114_v14   ;;  %v924_v35 = vld [vmem:[%s1284_s1 + $0x70] sm:$0xff]  ;;  %v118_v36 = vld [vmem:[%s1285_s2 + $0x38] sm:$0xff]  ;;  %v923_v42 = vld [vmem:[%s1284_s1 + $0x68] sm:$0xff] }
   0xd   :  { %v944_v39 = vld [vmem:[%s1284_s1 + $0x110] sm:$0xff]  ;;  %v943_v43 = vld [vmem:[%s1284_s1 + $0x108] sm:$0xff]  ;;  %v930_v44 = vld [vmem:[%s1284_s1 + $0xa0] sm:$0xff] }
   0xe   :  { %952 = vmatpush.bf16.msra.mxu1 %v914_v7  ;;  %953 = vmatpush.bf16.msra.mxu2 %v914_v7  ;;  %v117_v40 = vld [vmem:[%s1285_s2 + $0x30] sm:$0xff]  ;;  %v922_v45 = vld [vmem:[%s1284_s1 + $0x60] sm:$0xff]  ;;  %v929_v49 = vld [vmem:[%s1284_s1 + $0x98] sm:$0xff] }
   0xf   :  { %491 = vmatpush.bf16.msra.mxu0 %v914_v7  ;;  %578 = vmatpush.bf16.msra.mxu3 %v938_v9  ;;  %v704_v46 = vld [vmem:[%s1286_s0 + $0x50] sm:$0xf]  ;;  %v902_v47 = vld [vmem:[%s1286_s0 + $0x60] sm:$0xf0]  ;;  %v921_v50 = vld [vmem:[%s1284_s1 + $0x58] sm:$0xff] }
  0x10   :  { %126 = vperm.xlu0 %963, %v112_v16   ;;  %v942_v48 = vld [vmem:[%s1284_s1 + $0x100] sm:$0xff]  ;;  %v680_v51 = vld [vmem:[%s1286_s0 + $0x10] sm:$0xf]  ;;  %v705_v52 = vor.u32 %v902_v47, %v704_v46  ;;  %v896_v54 = vld [vmem:[%s1286_s0 + $0x34] sm:$0xf] }
  0x11   :  { %v894_v53 = vld [vmem:[%s1286_s0 + $0x20] sm:$0xf0]  ;;  %v694_v55 = vld [vmem:[%s1286_s0 + $0x44] sm:$0xf0]  ;;  %v928_v56 = vld [vmem:[%s1284_s1 + $0x90] sm:$0xff] }
  0x12   :  { %954 = vmatpush.bf16.msra.mxu1 %v913_v11  ;;  %955 = vmatpush.bf16.msra.mxu2 %v913_v11  ;;  %v920_v57 = vld [vmem:[%s1284_s1 + $0x50] sm:$0xff]  ;;  %v681_v58 = vor.u32 %v894_v53, %v680_v51  ;;  %v697_v59 = vor.u32 %v896_v54, %v694_v55  ;;  %v115_v60 = vld [vmem:[%s1285_s2 + $0x20] sm:$0xff]  ;;  %v927_v61 = vld [vmem:[%s1284_s1 + $0x88] sm:$0xff] }
  0x13   :  { %492 = vmatpush.bf16.msra.mxu0 %v913_v11  ;;  %579 = vmatpush.bf16.msra.mxu3 %v937_v12  ;;  %v919_v62 = vld [vmem:[%s1284_s1 + $0x48] sm:$0xff]  ;;  %v926_v63 = vld [vmem:[%s1284_s1 + $0x80] sm:$0xff]  ;;  %v893_v2 = vld [vmem:[%s1286_s0 + $0x18] sm:$0xf0] }
  0x14   :  { %156 = vperm.xlu1 %964, %v118_v36   ;;  %141 = vperm.xlu2 %965, %v115_v60   ;;  %v918_v0 = vld [vmem:[%s1284_s1 + $0x40] sm:$0xff]  ;;  %v672_v1 = vld [vmem:[%s1286_s0 + $0x8] sm:$0xf]  ;;  %v666_v6 = vld [vmem:[%s1286_s0 + $0x14] sm:$0xf0] }
  0x15   :  { %v116_v3 = vld [vmem:[%s1285_s2 + $0x28] sm:$0xff]  ;;  %v673_v4 = vor.u32 %v893_v2, %v672_v1  ;;  %v890_v5 = vld [vmem:[%s1286_s0 + $0x4] sm:$0xf]  ;;  %v700_v7 = vld [vmem:[%s1286_s0 + $0x38] sm:$0xf] }
  0x16   :  { %956 = vmatpush.bf16.msra.mxu1 %v912_v13  ;;  %957 = vmatpush.bf16.msra.mxu2 %v912_v13  ;;  %v669_v8 = vor.u32 %v890_v5, %v666_v6  ;;  %v899_v9 = vld [vmem:[%s1286_s0 + $0x48] sm:$0xf0]  ;;  %v901_v10 = vld [vmem:[%s1286_s0 + $0x5c] sm:$0xf]  ;;  %v714_v11 = vld [vmem:[%s1286_s0 + $0x6c] sm:$0xf0] }
  0x17   :  { %493 = vmatpush.bf16.msra.mxu0 %v912_v13  ;;  %580 = vmatpush.bf16.msra.mxu3 %v936_v15  ;;  %v701_v12 = vor.u32 %v899_v9, %v700_v7  ;;  %v717_v13 = vor.u32 %v901_v10, %v714_v11  ;;  %v692_v14 = vld [vmem:[%s1286_s0 + $0x30] sm:$0xf]  ;;  %v898_v15 = vld [vmem:[%s1286_s0 + $0x40] sm:$0xf0]  ;;  %v904_v21 = vld [vmem:[%s1286_s0 + $0x70] sm:$0xf0] }
  0x18   :  { %151 = vperm.xlu0 %963, %v117_v40   ;;  %v693_v16 = vor.u32 %v898_v15, %v692_v14  ;;  %v906_v22 = vld [vmem:[%s1286_s0 + $0x84] sm:$0xf]  ;;  %v734_v23 = vld [vmem:[%s1286_s0 + $0x94] sm:$0xf0]  ;;  %v706_v30 = vld [vmem:[%s1286_s0 + $0x64] sm:$0xf0] }
  0x19   :  { %v712_v26 = vld [vmem:[%s1286_s0 + $0x58] sm:$0xf]  ;;  %v740_v32 = vld [vmem:[%s1286_s0 + $0x88] sm:$0xf]  ;;  %v908_v36 = vld [vmem:[%s1286_s0 + $0x90] sm:$0xf0] }
  0x1a   :  { %958 = vmatpush.bf16.msra.mxu1 %v911_v17  ;;  %959 = vmatpush.bf16.msra.mxu2 %v911_v17 }
  0x1b   :  { %494 = vmatpush.bf16.msra.mxu0 %v911_v17  ;;  %581 = vmatpush.bf16.msra.mxu3 %v935_v18  ;;  %v895_v17 = vld [vmem:[%s1286_s0 + $0x2c] sm:$0xf]  ;;  %v686_v18 = vld [vmem:[%s1286_s0 + $0x3c] sm:$0xf0] }
  0x1c   :  { %146 = vperm.xlu2 %965, %v116_v3   ;;  %v689_v20 = vor.u32 %v895_v17, %v686_v18 }
  0x1e   :  { %960 = vmatpush.bf16.msra.mxu1 %v910_v19  ;;  %961 = vmatpush.bf16.msra.mxu2 %v910_v19 }
  0x1f   :  { %495 = vmatpush.bf16.msra.mxu0 %v910_v19  ;;  %582 = vmatpush.bf16.msra.mxu3 %v934_v27  ;;  %v720_v19 = vld [vmem:[%s1286_s0 + $0x60] sm:$0xf]  ;;  %v903_v27 = vld [vmem:[%s1286_s0 + $0x68] sm:$0xf0] }
  0x21   :  { %501 = vmatmul.bf16.vlgmr.msra.gmra.mxu1 %v685_v28  ;;  %511 = vmatmul.bf16.vlgmr.msra.gmra.mxu2 %v725_v29  ;;  %v713_v28 = vor.u32 %v903_v27, %v712_v26  ;;  %v900_v29 = vld [vmem:[%s1286_s0 + $0x54] sm:$0xf] }
  0x22   :  { %546 = vmatpush.bf16.msrb.mxu2 %v933_v24  ;;  %517 = vmatpush.bf16.msrb.mxu1 %v925_v25  ;;  %v721_v24 = vor.u32 %v904_v21, %v720_v19  ;;  %v737_v25 = vor.u32 %v906_v22, %v734_v23  ;;  %v709_v31 = vor.u32 %v900_v29, %v706_v30 }
  0x23   :  { %608 = vmatpush.bf16.msrb.mxu0 %v945_v33  ;;  %583 = vmatmul.bf16.vlgmr.msra.gmra.mxu3 %v677_v38  ;;  %v909_v33 = vld [vmem:[%s1286_s0 + $0x98] sm:$0xf0] }
  0x24   :  { %496 = vmatmul.bf16.vlgmr.msra.gmra.mxu0 %v665_v37  ;;  %v905_v38 = vld [vmem:[%s1286_s0 + $0x7c] sm:$0xf] }
  0x26   :  { %547 = vmatpush.bf16.msrb.mxu2 %v932_v34  ;;  %518 = vmatpush.bf16.msrb.mxu1 %v924_v35  ;;  %v741_v34 = vor.u32 %v909_v33, %v740_v32  ;;  %v732_v35 = vld [vmem:[%s1286_s0 + $0x80] sm:$0xf] }
  0x27   :  { %609 = vmatpush.bf16.msrb.mxu0 %v944_v39  ;;  %v733_v37 = vor.u32 %v908_v36, %v732_v35  ;;  %v726_v39 = vld [vmem:[%s1286_s0 + $0x8c] sm:$0xf0] }
  0x28   :  { %v729_v40 = vor.u32 %v905_v38, %v726_v39 }
  0x2a   :  { %548 = vmatpush.bf16.msrb.mxu2 %v931_v41  ;;  %519 = vmatpush.bf16.msrb.mxu1 %v923_v42 }
  0x2b   :  { %610 = vmatpush.bf16.msrb.mxu0 %v943_v43 }
  0x2e   :  { %549 = vmatpush.bf16.msrb.mxu2 %v930_v44  ;;  %520 = vmatpush.bf16.msrb.mxu1 %v922_v45 }
  0x2f   :  { %611 = vmatpush.bf16.msrb.mxu0 %v942_v48 }
  0x31   :  { %506 = vmatmul.bf16.gmra.mxu1 %v705_v52 }
  0x32   :  { %550 = vmatpush.bf16.msrb.mxu2 %v929_v49  ;;  %521 = vmatpush.bf16.msrb.mxu1 %v921_v50 }
  0x33   :  { %588 = vmatmul.bf16.gmra.mxu3 %v697_v59 }
  0x34   :  { %886 = vmatmul.msk.bf16.vlgmr.msrb.gmra.mxu0 %vm475_vm0, %v681_v58 }
  0x36   :  { %551 = vmatpush.bf16.msrb.mxu2 %v928_v56  ;;  %522 = vmatpush.bf16.msrb.mxu1 %v920_v57 }
  0x3a   :  { %552 = vmatpush.bf16.msrb.mxu2 %v927_v61  ;;  %523 = vmatpush.bf16.msrb.mxu1 %v919_v62 }
  0x3e   :  { %553 = vmatpush.bf16.msrb.mxu2 %v926_v63  ;;  %524 = vmatpush.bf16.msrb.mxu1 %v918_v0 }
  0x41   :  { %554 = vmatmul.bf16.vlgmr.msrb.gmra.mxu2 %v673_v4  ;;  %525 = vmatmul.bf16.vlgmr.msrb.gmra.mxu1 %v669_v8 }
  0x43   :  { %593 = vmatmul.bf16.gmra.mxu3 %v717_v13 }
  0x44   :  { %887 = vmatmul.msk.bf16.gmra.mxu0 %vm475_vm0, %v701_v12 }
  0x51   :  { %559 = vmatmul.bf16.gmra.mxu2 %v693_v16  ;;  %530 = vmatmul.bf16.gmra.mxu1 %v689_v20 }
  0x53   :  { %598 = vmatmul.bf16.gmra.mxu3 %v737_v25 }
  0x54   :  { %888 = vmatmul.msk.bf16.gmra.mxu0 %vm475_vm0, %v721_v24 }
  0x61   :  { %564 = vmatmul.bf16.gmra.mxu2 %v713_v28  ;;  %535 = vmatmul.bf16.gmra.mxu1 %v709_v31 }
  0x64   :  { %889 = vmatmul.msk.bf16.gmra.mxu0 %vm475_vm0, %v741_v34 }
  0x6e   :  { %v142_v25 = vpop.permute.xlu2 %141 }
  0x71   :  { %569 = vmatmul.bf16.gmra.mxu2 %v733_v37  ;;  %540 = vmatmul.bf16.gmra.mxu1 %v729_v40 }
  0x76   :  { %v132_v1 = vpop.permute.xlu1 %131  ;;  %v147_v39 = vpop.permute.xlu2 %146 }
  0x7a   :  { %v122_v51 = vpop.permute.xlu0 %121 }
  0x7e   :  { %v137_v15 = vpop.permute.xlu1 %136 }
  0x82   :  { %v127_v59 = vpop.permute.xlu0 %126 }
  0x9e   :  { %v502_v41 = vpop.f32.mrf.mxu1 }
  0x9f   :  { %v503_v9 = vadd.f32 %v502_v41, %v132_v1 }
  0xa1   :  { %v497_v42 = vpop.f32.mrf.mxu0 }
  0xa2   :  { %v498_v52 = vadd.f32 %v497_v42, %v122_v51 }
  0xa4   :  { %v1243_v46 = vpop.f32.mrf.mxu2 }
  0xa6   :  { %v504_v43 = vpop.f32.mrf.mxu1  ;;  %v584_v47 = vpop.f32.mrf.mxu3 }
  0xa7   :  { %v505_v20 = vadd.f32 %v504_v43, %v137_v15 }
  0xa9   :  { %v499_v44 = vpop.f32.mrf.mxu0 }
  0xaa   :  { %v500_v61 = vadd.f32 %v499_v44, %v127_v59 }
  0xac   :  { %v1247_v50 = vpop.f32.mrf.mxu2 }
  0xae   :  { %v507_v45 = vpop.f32.mrf.mxu1  ;;  %v586_v55 = vpop.f32.mrf.mxu3 }
  0xaf   :  { %v508_v31 = vadd.f32 %v507_v45, %v142_v25 }
  0xb1   :  { %v613_v49 = vpop.f32.mrf.mxu0 }
  0xb6   :  { %v1245_v48 = vpop.f32.mrf.mxu1  ;;  %v589_v4 = vpop.f32.mrf.mxu3 }
  0xb7   :  { %v510_v43 = vadd.f32 %v1245_v48, %v147_v39 }
  0xb9   :  { %v615_v57 = vpop.f32.mrf.mxu0 }
  0xbe   :  { %v526_v53 = vpop.f32.mrf.mxu1  ;;  %v591_v18 = vpop.f32.mrf.mxu3 }
  0xbf   :  { %v527_v54 = vadd.f32 %v526_v53, %v498_v52 }
  0xc1   :  { %v618_v7 = vpop.f32.mrf.mxu0 }
  0xc4   :  { %v555_v56 = vpop.f32.mrf.mxu2 }
  0xc5   :  { %v556_v58 = vadd.f32 %v555_v56, %v527_v54  ;;  %v152_v54 = vpop.permute.xlu0 %151 }
  0xc6   :  { %v528_v63 = vpop.f32.mrf.mxu1  ;;  %v594_v32 = vpop.f32.mrf.mxu3 }
  0xc7   :  { %v585_v60 = vadd.f32 %v584_v47, %v556_v58  ;;  %v529_v0 = vadd.f32 %v528_v63, %v500_v61  ;;  %v513_v58 = vadd.f32 %v1243_v46, %v152_v54 }
  0xc9   :  { %v614_v62 = vadd.f32 %v613_v49, %v585_v60  ;;  %v620_v21 = vpop.f32.mrf.mxu0 }
  0xcb   :  { %v633_v2 = vmax.f32 %v614_v62, 0.0 }
  0xcc   :  { %v557_v3 = vpop.f32.mrf.mxu2 }
  0xcd   :  { %v641_v5 = vpack.c.bf16 %v633_v2, %v633_v2  ;;  %v558_v6 = vadd.f32 %v557_v3, %v529_v0  ;;  %v157_v0 = vpop.permute.xlu1 %156 }
  0xce   :  { %v531_v11 = vpop.f32.mrf.mxu1  ;;  %v596_v47 = vpop.f32.mrf.mxu3 }
  0xcf   :  { %650 = vst.msk [vmem:[%s1287_s3] sm:$0xf] %vm649_vm1, %v641_v5  ;;  %v587_v8 = vadd.f32 %v586_v55, %v558_v6  ;;  %v532_v12 = vadd.f32 %v531_v11, %v503_v9  ;;  %v515_v5 = vadd.f32 %v1247_v50, %v157_v0 }
  0xd1   :  { %v616_v10 = vadd.f32 %v615_v57, %v587_v8  ;;  %v623_v35 = vpop.f32.mrf.mxu0 }
  0xd3   :  { %v634_v13 = vmax.f32 %v616_v10, 0.0 }
  0xd4   :  { %v560_v14 = vpop.f32.mrf.mxu2 }
  0xd5   :  { %v642_v16 = vpack.c.bf16 %v634_v13, %v634_v13  ;;  %v561_v17 = vadd.f32 %v560_v14, %v532_v12 }
  0xd6   :  { %v533_v23 = vpop.f32.mrf.mxu1  ;;  %v599_v62 = vpop.f32.mrf.mxu3 }
  0xd7   :  { %651 = vst.msk [vmem:[%s1287_s3 + $0x4] sm:$0xf] %vm649_vm1, %v642_v16  ;;  %v590_v19 = vadd.f32 %v589_v4, %v561_v17  ;;  %v534_v24 = vadd.f32 %v533_v23, %v505_v20 }
  0xd9   :  { %v619_v22 = vadd.f32 %v618_v7, %v590_v19  ;;  %v625_v52 = vpop.f32.mrf.mxu0 }
  0xdb   :  { %v635_v26 = vmax.f32 %v619_v22, 0.0 }
  0xdc   :  { %v562_v27 = vpop.f32.mrf.mxu2 }
  0xdd   :  { %v643_v28 = vpack.c.bf16 %v635_v26, %v635_v26  ;;  %v563_v29 = vadd.f32 %v562_v27, %v534_v24 }
  0xde   :  { %v536_v34 = vpop.f32.mrf.mxu1  ;;  %v601_v12 = vpop.f32.mrf.mxu3 }
  0xdf   :  { %652 = vst.msk [vmem:[%s1287_s3 + $0x8] sm:$0xf] %vm649_vm1, %v643_v28  ;;  %v592_v30 = vadd.f32 %v591_v18, %v563_v29  ;;  %v537_v36 = vadd.f32 %v536_v34, %v508_v31 }
  0xe1   :  { %v621_v33 = vadd.f32 %v620_v21, %v592_v30  ;;  %v628_v3 = vpop.f32.mrf.mxu0 }
  0xe3   :  { %v636_v37 = vmax.f32 %v621_v33, 0.0 }
  0xe4   :  { %v565_v38 = vpop.f32.mrf.mxu2 }
  0xe5   :  { %v644_v40 = vpack.c.bf16 %v636_v37, %v636_v37  ;;  %v566_v41 = vadd.f32 %v565_v38, %v537_v36 }
  0xe6   :  { %v538_v45 = vpop.f32.mrf.mxu1 }
  0xe7   :  { %653 = vst.msk [vmem:[%s1287_s3 + $0xc] sm:$0xf] %vm649_vm1, %v644_v40  ;;  %v595_v42 = vadd.f32 %v594_v32, %v566_v41  ;;  %v539_v49 = vadd.f32 %v538_v45, %v510_v43 }
  0xe9   :  { %v624_v44 = vadd.f32 %v623_v35, %v595_v42  ;;  %v630_v14 = vpop.f32.mrf.mxu0 }
  0xeb   :  { %v637_v51 = vmax.f32 %v624_v44, 0.0 }
  0xec   :  { %v567_v53 = vpop.f32.mrf.mxu2 }
  0xed   :  { %v645_v55 = vpack.c.bf16 %v637_v51, %v637_v51  ;;  %v568_v56 = vadd.f32 %v567_v53, %v539_v49 }
  0xee   :  { %v541_v48 = vpop.f32.mrf.mxu1 }
  0xef   :  { %654 = vst.msk [vmem:[%s1287_s3 + $0x10] sm:$0xf] %vm649_vm1, %v645_v55  ;;  %v597_v57 = vadd.f32 %v596_v47, %v568_v56  ;;  %v542_v60 = vadd.f32 %v541_v48, %v513_v58 }
  0xf1   :  { %v626_v59 = vadd.f32 %v625_v52, %v597_v57 }
  0xf3   :  { %v638_v61 = vmax.f32 %v626_v59, 0.0 }
  0xf4   :  { %v570_v63 = vpop.f32.mrf.mxu2 }
  0xf5   :  { %v646_v1 = vpack.c.bf16 %v638_v61, %v638_v61  ;;  %v571_v2 = vadd.f32 %v570_v63, %v542_v60 }
  0xf6   :  { %v543_v46 = vpop.f32.mrf.mxu1 }
  0xf7   :  { %655 = vst.msk [vmem:[%s1287_s3 + $0x14] sm:$0xf] %vm649_vm1, %v646_v1  ;;  %v600_v4 = vadd.f32 %v599_v62, %v571_v2  ;;  %v544_v7 = vadd.f32 %v543_v46, %v515_v5 }
  0xf9   :  { %v629_v6 = vadd.f32 %v628_v3, %v600_v4 }
  0xfb   :  { %v639_v8 = vmax.f32 %v629_v6, 0.0 }
  0xfc   :  { %v572_v9 = vpop.f32.mrf.mxu2 }
  0xfd   :  { %v647_v10 = vpack.c.bf16 %v639_v8, %v639_v8  ;;  %v573_v11 = vadd.f32 %v572_v9, %v544_v7 }
  0xff   :  { %656 = vst.msk [vmem:[%s1287_s3 + $0x18] sm:$0xf] %vm649_vm1, %v647_v10  ;;  %v602_v13 = vadd.f32 %v601_v12, %v573_v11 }
 0x101   :  { %v631_v15 = vadd.f32 %v630_v14, %v602_v13 }
 0x103   :  { %v640_v16 = vmax.f32 %v631_v15, 0.0 }
 0x105   :  { %v648_v17 = vpack.c.bf16 %v640_v16, %v640_v16 }
 0x107   :  { %657 = vst.msk [vmem:[%s1287_s3 + $0x1c] sm:$0xf] %vm649_vm1, %v648_v17 }

// kernel: _lambda_.43
= control target key start
LH: loop header
LB: loop body
LE: loop exit
PB: predicated region body
PF: predicated region fallthrough
CT: control target
= control target key end

     0   :  { %v340_v3 = vmov 0   ;;  %s426_s0 = inlined_call_operand.vmem [shape: bf16[2,64,1], index: 0, kind: input, shape index: {}]   ;;  %s427_s1 = inlined_call_operand.vmem [shape: f32[64,10], index: 1, kind: input, shape index: {}]   ;;  %s428_s2 = inlined_call_operand.vmem [shape: f32[1,10], index: 2, kind: input, shape index: {}]   ;;  %s429_s3 = inlined_call_operand.hbm [shape: f32[2,10], index: 3, kind: output, shape index: {}]  }
   0x1   :  { %v261_v0 = vld [vmem:[%s426_s0 + $0x8] sm:$0xff]   ;;  %v230_v2 = vld [vmem:[%s426_s0] sm:$0xff]   ;;  %281 = vset.pattern.permute.xlu1 %v340_v3  ;;  %270 = vset.pattern.permute.xlu0 %v340_v3  ;;  %v262_v8 = vld [vmem:[%s426_s0 + $0x10] sm:$0xff]  }
   0x2   :  { %v265_v1 = vld [vmem:[%s426_s0 + $0x28] sm:$0xff]   ;;  %v235_v4 = vunpack.c.l.bf16 %v261_v0  ;;  %v231_v6 = vunpack.c.l.bf16 %v230_v2  ;;  %v232_v7 = vunpack.c.h.bf16 %v230_v2  ;;  %292 = vset.pattern.permute.xlu2 %v340_v3  ;;  %v266_v9 = vld [vmem:[%s426_s0 + $0x30] sm:$0xff]   ;;  %v264_v11 = vld [vmem:[%s426_s0 + $0x20] sm:$0xff]  }
   0x3   :  { %v251_v5 = vunpack.c.l.bf16 %v265_v1 }
   0x5   :  { %v282_v10 = vpack.i.bf16 %v251_v5, %v235_v4 }
   0x6   :  { %8 = vsyncpa [#allocation3], 0  ;;  %v271_v12 = vpack.i.bf16 %v232_v7, %v231_v6  ;;  %v236_v13 = vunpack.c.h.bf16 %v261_v0  ;;  %v252_v14 = vunpack.c.h.bf16 %v265_v1  ;;  %v239_v15 = vunpack.c.l.bf16 %v262_v8  ;;  %v263_v24 = vld [vmem:[%s426_s0 + $0x18] sm:$0xff]   ;;  %v69_v34 = vld [vmem:[%s427_s1 + $0x30] sm:$0xff]  ;;  %s341_s17 = smov [#allocation2]   ;;  %s219_s21 = sshll.u32 %s429_s3, 4  ;;  %s220_s21 = int_to_ptr.hbm [resolvable:$true] %s219_s21 }
   0x7   :  { %283 = vperm.xlu1 %281, %v282_v10   ;;  %v255_v16 = vunpack.c.l.bf16 %v266_v9  ;;  %v247_v17 = vunpack.c.l.bf16 %v264_v11  ;;  %v248_v18 = vunpack.c.h.bf16 %v264_v11  ;;  %v240_v21 = vunpack.c.h.bf16 %v262_v8  ;;  %v267_v25 = vld [vmem:[%s426_s0 + $0x38] sm:$0xff]   ;;  %v68_v35 = vld [vmem:[%s427_s1 + $0x28] sm:$0xff]  ;;  %v67_v36 = vld [vmem:[%s427_s1 + $0x20] sm:$0xff]  ;;  %s217_s18 = sshll.u32 %s341_s17, 4  ;;  %s218_s18 = int_to_ptr.vmem [resolvable:$true] %s217_s18 }
   0x8   :  { %272 = vperm.xlu0 %270, %v271_v12   ;;  %v287_v20 = vpack.i.bf16 %v252_v14, %v236_v13  ;;  %v256_v22 = vunpack.c.h.bf16 %v266_v9  ;;  %v244_v26 = vunpack.c.h.bf16 %v263_v24  ;;  %v260_v27 = vunpack.c.h.bf16 %v267_v25  ;;  %v70_v33 = vld [vmem:[%s427_s1 + $0x38] sm:$0xff]  ;;  %v65_v38 = vld [vmem:[%s427_s1 + $0x10] sm:$0xff]  ;;  %v64_v39 = vld [vmem:[%s427_s1 + $0x8] sm:$0xff] }
   0x9   :  { %v293_v19 = vpack.i.bf16 %v255_v16, %v239_v15  ;;  %v276_v23 = vpack.i.bf16 %v248_v18, %v247_v17  ;;  %v243_v29 = vunpack.c.l.bf16 %v263_v24  ;;  %v259_v30 = vunpack.c.l.bf16 %v267_v25  ;;  %198 = vmatpush.msra.mxu0 %v70_v33  ;;  %v66_v37 = vld [vmem:[%s427_s1 + $0x18] sm:$0xff]  ;;  %v63_v40 = vld [vmem:[%s427_s1] sm:$0xff] }
   0xa   :  { %v298_v28 = vpack.i.bf16 %v256_v22, %v240_v21  ;;  %v308_v31 = vpack.i.bf16 %v260_v27, %v244_v26  ;;  %v139_v41 = vlaneseq  ;;  %vm144_vm0 = vcmask 130112  }
   0xb   :  { %294 = vperm.xlu2 %292, %v293_v19   ;;  %v303_v32 = vpack.i.bf16 %v259_v30, %v243_v29  ;;  %199 = vmatpush.msra.mxu0 %v69_v34  ;;  %vm148_vm1 = vcmask 195712   ;;  %vm152_vm2 = vcmask 261312   ;;  %vm156_vm3 = vcmask 326912  }
   0xc   :  { %v140_v42 = vand.u32 127, %v139_v41  ;;  %vm160_vm4 = vcmask 392512   ;;  %vm164_vm5 = vcmask 458112   ;;  %vm168_vm6 = vcmask 523712   ;;  %v313_v41 = vld [vmem:[%s428_s2] ss:$0 sm:$0xff] }
   0xd   :  { %200 = vmatpush.msra.mxu0 %v68_v35  ;;  %vm185_vm7 = vcmask 1041409   ;;  %vm187_vm8 = vcmask 523264   ;;  %vm210_vm9 = vcmask 74752  }
   0xe   :  { %v142_v46 = vadd.s32 4294967288, %v140_v42  ;;  %v146_v49 = vadd.s32 4294967280, %v140_v42  ;;  %v150_v53 = vadd.s32 4294967272, %v140_v42  ;;  %v154_v55 = vadd.s32 4294967264, %v140_v42 }
   0xf   :  { %288 = vperm.xlu1 %281, %v287_v20   ;;  %201 = vmatpush.msra.mxu0 %v67_v36  ;;  %v158_v7 = vadd.s32 4294967256, %v140_v42  ;;  %v166_v11 = vadd.s32 4294967240, %v140_v42  ;;  %v162_v20 = vadd.s32 4294967248, %v140_v42 }
  0x10   :  { %277 = vperm.xlu0 %270, %v276_v23  }
  0x11   :  { %202 = vmatpush.msra.mxu0 %v66_v37 }
  0x13   :  { %299 = vperm.xlu2 %292, %v298_v28   ;;  %203 = vmatpush.msra.mxu0 %v65_v38 }
  0x15   :  { %204 = vmatpush.msra.mxu0 %v64_v39 }
  0x17   :  { %309 = vperm.xlu1 %281, %v308_v31   ;;  %205 = vmatpush.msra.mxu0 %v63_v40 }
  0x18   :  { %304 = vperm.xlu0 %270, %v303_v32  }
  0x65   :  { %v295_v45 = vpop.permute.xlu2 %294 }
  0x66   :  { %v297_v1 = vunpack.i.h.bf16 %v295_v45  ;;  %v296_v2 = vunpack.i.l.bf16 %v295_v45 }
  0x68   :  { %v177_v16 = vperm.slane %v297_v1, %v154_v55  ;;  %v155_v17 = vperm.slane %v296_v2, %v154_v55 }
  0x6d   :  { %v300_v3 = vpop.permute.xlu2 %299 }
  0x6e   :  { %v302_v12 = vunpack.i.h.bf16 %v300_v3  ;;  %v301_v13 = vunpack.i.l.bf16 %v300_v3 }
  0x70   :  { %v179_v28 = vperm.slane %v302_v12, %v158_v7  ;;  %v159_v29 = vperm.slane %v301_v13, %v158_v7 }
  0x79   :  { %v284_v43 = vpop.permute.xlu1 %283 }
  0x7a   :  { %v273_v44 = vpop.permute.xlu0 %272  ;;  %v285_v50 = vunpack.i.l.bf16 %v284_v43  ;;  %v286_v56 = vunpack.i.h.bf16 %v284_v43 }
  0x7b   :  { %v275_v47 = vunpack.i.h.bf16 %v273_v44  ;;  %v274_v48 = vunpack.i.l.bf16 %v273_v44 }
  0x7c   :  { %v147_v59 = vperm.slane %v285_v50, %v146_v49  ;;  %v173_v6 = vperm.slane %v286_v56, %v146_v49 }
  0x7d   :  { %v143_v51 = vperm.slane %v275_v47, %v142_v46  ;;  %v141_v52 = vperm.slane %v274_v48, %v140_v42 }
  0x7f   :  { %v145_v63 = vsel %vm144_vm0, %v143_v51, %v141_v52 }
  0x80   :  { %v149_v9 = vsel %vm148_vm1, %v147_v59, %v145_v63 }
  0x81   :  { %v289_v54 = vpop.permute.xlu1 %288 }
  0x82   :  { %v290_v57 = vunpack.i.l.bf16 %v289_v54  ;;  %v278_v58 = vpop.permute.xlu0 %277  ;;  %v291_v60 = vunpack.i.h.bf16 %v289_v54 }
  0x83   :  { %v280_v61 = vunpack.i.h.bf16 %v278_v58  ;;  %v279_v62 = vunpack.i.l.bf16 %v278_v58 }
  0x84   :  { %v151_v0 = vperm.slane %v290_v57, %v150_v53  ;;  %v175_v8 = vperm.slane %v291_v60, %v150_v53 }
  0x85   :  { %v171_v4 = vperm.slane %v280_v61, %v142_v46  ;;  %v170_v5 = vperm.slane %v279_v62, %v140_v42 }
  0x86   :  { %v153_v14 = vsel %vm152_vm2, %v151_v0, %v149_v9 }
  0x87   :  { %v172_v10 = vsel %vm144_vm0, %v171_v4, %v170_v5  ;;  %v157_v24 = vsel %vm156_vm3, %v155_v17, %v153_v14 }
  0x88   :  { %v174_v15 = vsel %vm148_vm1, %v173_v6, %v172_v10  ;;  %v161_v34 = vsel %vm160_vm4, %v159_v29, %v157_v24 }
  0x89   :  { %v176_v18 = vsel %vm152_vm2, %v175_v8, %v174_v15  ;;  %v310_v19 = vpop.permute.xlu1 %309 }
  0x8a   :  { %v312_v21 = vunpack.i.h.bf16 %v310_v19  ;;  %v311_v22 = vunpack.i.l.bf16 %v310_v19  ;;  %v305_v23 = vpop.permute.xlu0 %304  ;;  %v178_v27 = vsel %vm156_vm3, %v177_v16, %v176_v18 }
  0x8b   :  { %v307_v25 = vunpack.i.h.bf16 %v305_v23  ;;  %v306_v26 = vunpack.i.l.bf16 %v305_v23  ;;  %v180_v35 = vsel %vm160_vm4, %v179_v28, %v178_v27 }
  0x8c   :  { %v183_v30 = vperm.slane %v312_v21, %v166_v11  ;;  %v167_v31 = vperm.slane %v311_v22, %v166_v11 }
  0x8d   :  { %v181_v32 = vperm.slane %v307_v25, %v162_v20  ;;  %v163_v33 = vperm.slane %v306_v26, %v162_v20 }
  0x8f   :  { %v165_v36 = vsel %vm164_vm5, %v163_v33, %v161_v34  ;;  %v182_v37 = vsel %vm164_vm5, %v181_v32, %v180_v35 }
  0x90   :  { %v169_v38 = vsel %vm168_vm6, %v167_v31, %v165_v36  ;;  %v184_v39 = vsel %vm168_vm6, %v183_v30, %v182_v37 }
  0x91   :  { %v186_v40 = vsel %vm185_vm7, %v184_v39, %v169_v38 }
  0x92   :  { %228 = vmatmul.msk.f32.vlgmr.msra.gmra.mxu0 %vm187_vm8, %v186_v40 }
 0x10f   :  { %v207_v42 = vpop.f32.mrf.mxu0 }
 0x110   :  { %v208_v43 = vadd.f32 %v313_v41, %v207_v42 }
 0x112   :  { %211 = vst.msk [vmem:[#allocation2] sm:$0x3] %vm210_vm9, %v208_v43 }
 0x113   :  { %222 = dma.vmem_to_hbm [thread:$0]  %s218_s18, 32, %s220_s21, [#allocation3]  }
 0x114   :  { %338 = dma.done.wait [#allocation3], 32  }
 0x115   :  { %339 = vsyncadd [#allocation3], 4294967264 }
 0x116   :  { %227 = vsyncpa [#allocation3], 1 }

</bundles_post_ra>
